<compile_context>
chip_gen: v5e
topology: v5e:2x2
jax: 0.10.0
libtpu: 0.0.40
codegen_flags: <defaults>
</compile_context>

<pallas_src>
import numpy as np
import jax
import jax.numpy as jnp
from jax.experimental import pallas as pl
from jax.experimental.pallas import tpu as pltpu


def _round_up(a, b):
    return (a + b - 1) // b * b


def make_kernel(N, H, W, Cp):
    """Build the fused BasicBlock kernel for fixed (N, H, W) and padded channels Cp."""
    Hp, Wp = H + 4, W + 4
    Lpad = N * Hp * Wp                       # flattened padded-grid size
    Lout = _round_up(Lpad, 128)              # lane-dense working width
    Lw = Lout + 128                          # per-dy base slice width (covers dx=0..4)
    S = 2 * Wp + 2                           # flat shift of the 5x5 "center" tap
    Lx = _round_up(max(S + Lpad, 4 * Wp + Lw), 128)   # conv1 input buffer width
    Lx2 = _round_up(4 * Wp + Lw, 128)                  # conv2 input buffer width
    count = float(N * H * W)                 # BN normalization count
    eps = 1e-5

    def kernel(xw_ref, xres_ref, m_ref, w1_ref, w2_ref, p_ref,
               o_ref, stk_ref, x2_ref):
        m1 = m_ref[0:1, :]                   # validity mask, conv1 (padded) frame
        m2 = m_ref[1:2, :]                   # validity mask, conv2 (top-left) frame

        def stage(src_ref):
            # 5 misaligned VMEM loads per conv (one per dy); dx shifts are done
            # on the in-register base value, then stored bf16 into the stack.
            for dy in range(5):
                base = src_ref[:, dy * Wp: dy * Wp + Lw]          # (Cp, Lw) bf16
                for dx in range(5):
                    t = dy * 5 + dx
                    stk_ref[t * Cp:(t + 1) * Cp, :] = base[:, dx:dx + Lout]

        def bn_relu(acc, mask, g, be):
            # Training-mode batch stats, single pass, f32.  am reused for s and q.
            am = acc * mask
            s = jnp.sum(am, axis=1, keepdims=True)
            q = jnp.sum(am * acc, axis=1, keepdims=True)
            mean = s * (1.0 / count)
            var = q * (1.0 / count) - mean * mean
            scale = jax.lax.rsqrt(var + eps) * g
            shift = be - mean * scale
            return jnp.maximum(acc * scale + shift, 0.0)

        # ---- conv1 (bias dropped: cancels exactly in training-mode BN) ----
        stage(xw_ref)
        acc1 = jnp.dot(w1_ref[...], stk_ref[...],
                       preferred_element_type=jnp.float32)
        y1 = bn_relu(acc1, m1, p_ref[:, 0:1], p_ref[:, 1:2]) * m1   # zero halo/tail

        # conv1 output already sits in the padded-grid frame: lane-aligned bf16
        # store at offset 0, zero only the small lane tail (no full re-pad trip).
        x2_ref[:, :Lout] = y1.astype(jnp.bfloat16)
        x2_ref[:, Lout:] = jnp.zeros((Cp, Lx2 - Lout), jnp.bfloat16)

        # ---- conv2 + bn2 + relu (same tap-stacked single bf16 matmul) ----
        stage(x2_ref)
        acc2 = jnp.dot(w2_ref[...], stk_ref[...],
                       preferred_element_type=jnp.float32)
        y2 = bn_relu(acc2, m2, p_ref[:, 2:3], p_ref[:, 3:4])

        # ---- residual add from the pre-aligned, lane-dense residual input ----
        o_ref[...] = y2 + xres_ref[...]

    dims = dict(Hp=Hp, Wp=Wp, Lpad=Lpad, Lout=Lout, Lw=Lw, Lx=Lx, Lx2=Lx2, S=S)
    return kernel, dims


def basic_block_pallas(x, w1, b1, g1, be1, w2, b2, g2, be2):
    """x: (N, C, H, W) float32 NCHW; conv weights in PyTorch OIHW layout.

    b1/b2 are accepted for drop-in compatibility but not used: a conv bias
    added immediately before training-mode BatchNorm cancels exactly.
    """
    del b1, b2
    N, C, H, W = x.shape
    Cout = w1.shape[0]
    assert Cout == C, "residual add requires in_channel == out_channel"
    Cp = _round_up(C, 8)                     # pad channels to a full sublane group
    kernel, d = make_kernel(N, H, W, Cp)
    Hp, Wp, Lpad, Lout = d["Hp"], d["Wp"], d["Lpad"], d["Lout"]
    Lx, Lx2, S = d["Lx"], d["Lx2"], d["S"]

    # conv1 input: channel-padded, spatially padded, flattened, bf16; data placed
    # at lane offset S so all 25 tap offsets are non-negative static offsets.
    xp = jnp.pad(x.astype(jnp.float32),
                 ((0, 0), (0, Cp - C), (2, 2), (2, 2)))             # (N, Cp, Hp, Wp)
    x_flat = jnp.transpose(xp, (1, 0, 2, 3)).reshape(Cp, Lpad)
    xw = jnp.pad(x_flat, ((0, 0), (S, Lx - S - Lpad))).astype(jnp.bfloat16)

    # lane-aligned residual view (f32): x_res[:, p] = x_flat[:, p + S]
    x_res = jnp.pad(x_flat[:, S:], ((0, 0), (0, Lout - (Lpad - S))))

    # validity masks packed into one (2, Lout) input
    m_pad = jnp.zeros((N, Hp, Wp), jnp.float32).at[:, 2:H + 2, 2:W + 2].set(1.0)
    m_tl = jnp.zeros((N, Hp, Wp), jnp.float32).at[:, :H, :W].set(1.0)
    masks = jnp.pad(jnp.stack([m_pad.reshape(Lpad), m_tl.reshape(Lpad)]),
                    ((0, 0), (0, Lout - Lpad)))

    # tap-stacked bf16 weights: w_s[o, t*Cp + i] = w[o, i, dy, dx], t = dy*5 + dx
    # (note: 25*Cp is generally not a multiple of 128, so the v5e MXU sees one
    #  ragged K tile; padding Cp to fix that is not worth it at these sizes)
    def stack_w(w):
        wt = jnp.transpose(w, (2, 3, 0, 1)).reshape(25, Cout, C)
        wt = jnp.pad(wt, ((0, 0), (0, Cp - Cout), (0, Cp - C)))
        return jnp.transpose(wt, (1, 0, 2)).reshape(Cp, 25 * Cp).astype(jnp.bfloat16)

    col = lambda v: jnp.pad(v.astype(jnp.float32), (0, Cp - Cout))
    params = jnp.stack([col(g1), col(be1), col(g2), col(be2)], axis=1)   # (Cp, 4)

    out_flat = pl.pallas_call(
        kernel,
        out_shape=jax.ShapeDtypeStruct((Cp, Lout), jnp.float32),
        in_specs=[pl.BlockSpec(memory_space=pltpu.MemorySpace.VMEM)] * 6,
        out_specs=pl.BlockSpec(memory_space=pltpu.MemorySpace.VMEM),
        scratch_shapes=[pltpu.VMEM((25 * Cp, Lout), jnp.bfloat16),   # tap stack
                        pltpu.VMEM((Cp, Lx2), jnp.bfloat16)],        # conv2 input
        # Above the v5e (16 MiB) / v6e (32 MiB) scoped defaults, well below v7x
        # physical VMEM; actual footprint here is <1.5 MiB.
        compiler_params=pltpu.CompilerParams(vmem_limit_bytes=48 * 1024 * 1024),
    )(xw, x_res, masks, stack_w(w1), stack_w(w2), params)

    out = out_flat[:C, :Lpad].reshape(C, N, Hp, Wp)[:, :, :H, :W]
    return jnp.transpose(out, (1, 0, 2, 3))                          # back to NCHW


def basic_block_ref(x, w1, b1, g1, be1, w2, b2, g2, be2, eps=1e-5,
                    conv_dtype=jnp.float32):
    """Pure-JAX reference of the PyTorch forward (training-mode BN).

    conv_dtype=bfloat16 mirrors the kernel's MXU precision (bf16 multiplies,
    f32 accumulation); conv_dtype=float32 is the full-precision reference.
    """
    prec = jax.lax.Precision.HIGHEST if conv_dtype == jnp.float32 else None

    def conv(x_, w, b):
        y = jax.lax.conv_general_dilated(
            x_.astype(conv_dtype), w.astype(conv_dtype), (1, 1),
            padding=((2, 2), (2, 2)),
            dimension_numbers=('NCHW', 'OIHW', 'NCHW'),
            preferred_element_type=jnp.float32, precision=prec)
        return y + b[None, :, None, None]

    def bn(y, g, be):
        mean = jnp.mean(y, axis=(0, 2, 3), keepdims=True)
        var = jnp.mean((y - mean) ** 2, axis=(0, 2, 3), keepdims=True)
        return (y - mean) * jax.lax.rsqrt(var + eps) * g[None, :, None, None] \
            + be[None, :, None, None]

    x2 = jax.nn.relu(bn(conv(x, w1, b1), g1, be1))
    x3 = jax.nn.relu(bn(conv(x2, w2, b2), g2, be2))
    return x3 + x


if __name__ == "__main__":
    # Deterministic parameters / inputs (synthetic, no checkpoint).
    # TODO(synk): BatchNorm running_mean/running_var updates are training-side
    # state and do not affect this forward pass; they are not modeled.
    N, C, H, W = 2, 4, 16, 16
    key = jax.random.PRNGKey(0)
    ks = jax.random.split(key, 9)
    fan = C * 25
    w1 = jax.random.normal(ks[0], (C, C, 5, 5), jnp.float32) / np.sqrt(fan)
    b1 = 0.1 * jax.random.normal(ks[1], (C,), jnp.float32)
    g1 = 1.0 + 0.1 * jax.random.normal(ks[2], (C,), jnp.float32)
    be1 = 0.1 * jax.random.normal(ks[3], (C,), jnp.float32)
    w2 = jax.random.normal(ks[4], (C, C, 5, 5), jnp.float32) / np.sqrt(fan)
    b2 = 0.1 * jax.random.normal(ks[5], (C,), jnp.float32)
    g2 = 1.0 + 0.1 * jax.random.normal(ks[6], (C,), jnp.float32)
    be2 = 0.1 * jax.random.normal(ks[7], (C,), jnp.float32)
    x = jax.random.normal(ks[8], (N, C, H, W), jnp.float32)

    fwd = jax.jit(basic_block_pallas)
    out = jax.block_until_ready(fwd(x, w1, b1, g1, be1, w2, b2, g2, be2))
    assert out.shape == (N, C, H, W)

    # Precision-matched check: reference conv also run with bf16 inputs + f32
    # accumulation (same as the MXU path the kernel uses).
    ref_bf16 = basic_block_ref(x, w1, b1, g1, be1, w2, b2, g2, be2,
                               conv_dtype=jnp.bfloat16)
    err_bf16 = float(jnp.max(jnp.abs(out - ref_bf16)))
    assert err_bf16 < 1e-2, f"mismatch vs bf16-matched reference: {err_bf16}"

    # Full-f32 reference: tolerance widened on purpose because the kernel
    # intentionally feeds the MXU bf16 inputs.
    ref_f32 = basic_block_ref(x, w1, b1, g1, be1, w2, b2, g2, be2)
    err_f32 = float(jnp.max(jnp.abs(out - ref_f32)))
    assert err_f32 < 8e-2, f"mismatch vs f32 reference: {err_f32}"

    print("KERNEL_OK")
</pallas_src>

<mosaic_0001>
module attributes {stable_mosaic.version = 11 : i64} {
  func.func @kernel(%arg0: memref<8x1152xbf16, #tpu.memory_space<vmem>>, %arg1: memref<8x896xf32, #tpu.memory_space<vmem>>, %arg2: memref<2x896xf32, #tpu.memory_space<vmem>>, %arg3: memref<8x200xbf16, #tpu.memory_space<vmem>>, %arg4: memref<8x200xbf16, #tpu.memory_space<vmem>>, %arg5: memref<8x4xf32, #tpu.memory_space<vmem>>, %arg6: memref<8x896xf32, #tpu.memory_space<vmem>>, %arg7: memref<200x896xbf16, #tpu.memory_space<vmem>>, %arg8: memref<8x1152xbf16, #tpu.memory_space<vmem>>) attributes {dimension_semantics = [], scalar_prefetch = 0 : i64, scratch_operands = 2 : i64, tpu.core_type = #tpu.core_type<tc>} {
    %c0 = arith.constant 0 : index
    %c0_0 = arith.constant 0 : index
    %0 = vector.load %arg2[%c0, %c0_0] : memref<2x896xf32, #tpu.memory_space<vmem>>, vector<1x896xf32>
    %c1 = arith.constant 1 : index
    %c0_1 = arith.constant 0 : index
    %1 = vector.load %arg2[%c1, %c0_1] : memref<2x896xf32, #tpu.memory_space<vmem>>, vector<1x896xf32>
    %c0_2 = arith.constant 0 : index
    %c0_3 = arith.constant 0 : index
    %2 = vector.load %arg0[%c0_2, %c0_3] : memref<8x1152xbf16, #tpu.memory_space<vmem>>, vector<8x1024xbf16>
    %3 = vector.extract_strided_slice %2 {offsets = [0, 0], sizes = [8, 896], strides = [1, 1]} : vector<8x1024xbf16> to vector<8x896xbf16>
    %c0_4 = arith.constant 0 : index
    %c0_5 = arith.constant 0 : index
    %4 = vector.load %arg7[%c0_4, %c0_5] : memref<200x896xbf16, #tpu.memory_space<vmem>>, vector<8x896xbf16>
    tpu.vector_store %arg7[%c0_4, %c0_5], %3 {strides = array<i32>} : memref<200x896xbf16, #tpu.memory_space<vmem>>, vector<8x896xbf16>,
    %5 = vector.extract_strided_slice %2 {offsets = [0, 1], sizes = [8, 896], strides = [1, 1]} : vector<8x1024xbf16> to vector<8x896xbf16>
    %c8 = arith.constant 8 : index
    %c0_6 = arith.constant 0 : index
    %6 = vector.load %arg7[%c8, %c0_6] : memref<200x896xbf16, #tpu.memory_space<vmem>>, vector<8x896xbf16>
    tpu.vector_store %arg7[%c8, %c0_6], %5 {strides = array<i32>} : memref<200x896xbf16, #tpu.memory_space<vmem>>, vector<8x896xbf16>,
    %7 = vector.extract_strided_slice %2 {offsets = [0, 2], sizes = [8, 896], strides = [1, 1]} : vector<8x1024xbf16> to vector<8x896xbf16>
    %c16 = arith.constant 16 : index
    %c0_7 = arith.constant 0 : index
    %8 = vector.load %arg7[%c16, %c0_7] : memref<200x896xbf16, #tpu.memory_space<vmem>>, vector<8x896xbf16>
    tpu.vector_store %arg7[%c16, %c0_7], %7 {strides = array<i32>} : memref<200x896xbf16, #tpu.memory_space<vmem>>, vector<8x896xbf16>,
    %9 = vector.extract_strided_slice %2 {offsets = [0, 3], sizes = [8, 896], strides = [1, 1]} : vector<8x1024xbf16> to vector<8x896xbf16>
    %c24 = arith.constant 24 : index
    %c0_8 = arith.constant 0 : index
    %10 = vector.load %arg7[%c24, %c0_8] : memref<200x896xbf16, #tpu.memory_space<vmem>>, vector<8x896xbf16>
    tpu.vector_store %arg7[%c24, %c0_8], %9 {strides = array<i32>} : memref<200x896xbf16, #tpu.memory_space<vmem>>, vector<8x896xbf16>,
    %11 = vector.extract_strided_slice %2 {offsets = [0, 4], sizes = [8, 896], strides = [1, 1]} : vector<8x1024xbf16> to vector<8x896xbf16>
    %c32 = arith.constant 32 : index
    %c0_9 = arith.constant 0 : index
    %12 = vector.load %arg7[%c32, %c0_9] : memref<200x896xbf16, #tpu.memory_space<vmem>>, vector<8x896xbf16>
    tpu.vector_store %arg7[%c32, %c0_9], %11 {strides = array<i32>} : memref<200x896xbf16, #tpu.memory_space<vmem>>, vector<8x896xbf16>,
    %c0_10 = arith.constant 0 : index
    %c20 = arith.constant 20 : index
    %13 = vector.load %arg0[%c0_10, %c20] : memref<8x1152xbf16, #tpu.memory_space<vmem>>, vector<8x1024xbf16>
    %14 = vector.extract_strided_slice %13 {offsets = [0, 0], sizes = [8, 896], strides = [1, 1]} : vector<8x1024xbf16> to vector<8x896xbf16>
    %c40 = arith.constant 40 : index
    %c0_11 = arith.constant 0 : index
    %15 = vector.load %arg7[%c40, %c0_11] : memref<200x896xbf16, #tpu.memory_space<vmem>>, vector<8x896xbf16>
    tpu.vector_store %arg7[%c40, %c0_11], %14 {strides = array<i32>} : memref<200x896xbf16, #tpu.memory_space<vmem>>, vector<8x896xbf16>,
    %16 = vector.extract_strided_slice %13 {offsets = [0, 1], sizes = [8, 896], strides = [1, 1]} : vector<8x1024xbf16> to vector<8x896xbf16>
    %c48 = arith.constant 48 : index
    %c0_12 = arith.constant 0 : index
    %17 = vector.load %arg7[%c48, %c0_12] : memref<200x896xbf16, #tpu.memory_space<vmem>>, vector<8x896xbf16>
    tpu.vector_store %arg7[%c48, %c0_12], %16 {strides = array<i32>} : memref<200x896xbf16, #tpu.memory_space<vmem>>, vector<8x896xbf16>,
    %18 = vector.extract_strided_slice %13 {offsets = [0, 2], sizes = [8, 896], strides = [1, 1]} : vector<8x1024xbf16> to vector<8x896xbf16>
    %c56 = arith.constant 56 : index
    %c0_13 = arith.constant 0 : index
    %19 = vector.load %arg7[%c56, %c0_13] : memref<200x896xbf16, #tpu.memory_space<vmem>>, vector<8x896xbf16>
    tpu.vector_store %arg7[%c56, %c0_13], %18 {strides = array<i32>} : memref<200x896xbf16, #tpu.memory_space<vmem>>, vector<8x896xbf16>,
    %20 = vector.extract_strided_slice %13 {offsets = [0, 3], sizes = [8, 896], strides = [1, 1]} : vector<8x1024xbf16> to vector<8x896xbf16>
    %c64 = arith.constant 64 : index
    %c0_14 = arith.constant 0 : index
    %21 = vector.load %arg7[%c64, %c0_14] : memref<200x896xbf16, #tpu.memory_space<vmem>>, vector<8x896xbf16>
    tpu.vector_store %arg7[%c64, %c0_14], %20 {strides = array<i32>} : memref<200x896xbf16, #tpu.memory_space<vmem>>, vector<8x896xbf16>,
    %22 = vector.extract_strided_slice %13 {offsets = [0, 4], sizes = [8, 896], strides = [1, 1]} : vector<8x1024xbf16> to vector<8x896xbf16>
    %c72 = arith.constant 72 : index
    %c0_15 = arith.constant 0 : index
    %23 = vector.load %arg7[%c72, %c0_15] : memref<200x896xbf16, #tpu.memory_space<vmem>>, vector<8x896xbf16>
    tpu.vector_store %arg7[%c72, %c0_15], %22 {strides = array<i32>} : memref<200x896xbf16, #tpu.memory_space<vmem>>, vector<8x896xbf16>,
    %c0_16 = arith.constant 0 : index
    %c40_17 = arith.constant 40 : index
    %24 = vector.load %arg0[%c0_16, %c40_17] : memref<8x1152xbf16, #tpu.memory_space<vmem>>, vector<8x1024xbf16>
    %25 = vector.extract_strided_slice %24 {offsets = [0, 0], sizes = [8, 896], strides = [1, 1]} : vector<8x1024xbf16> to vector<8x896xbf16>
    %c80 = arith.constant 80 : index
    %c0_18 = arith.constant 0 : index
    %26 = vector.load %arg7[%c80, %c0_18] : memref<200x896xbf16, #tpu.memory_space<vmem>>, vector<8x896xbf16>
    tpu.vector_store %arg7[%c80, %c0_18], %25 {strides = array<i32>} : memref<200x896xbf16, #tpu.memory_space<vmem>>, vector<8x896xbf16>,
    %27 = vector.extract_strided_slice %24 {offsets = [0, 1], sizes = [8, 896], strides = [1, 1]} : vector<8x1024xbf16> to vector<8x896xbf16>
    %c88 = arith.constant 88 : index
    %c0_19 = arith.constant 0 : index
    %28 = vector.load %arg7[%c88, %c0_19] : memref<200x896xbf16, #tpu.memory_space<vmem>>, vector<8x896xbf16>
    tpu.vector_store %arg7[%c88, %c0_19], %27 {strides = array<i32>} : memref<200x896xbf16, #tpu.memory_space<vmem>>, vector<8x896xbf16>,
    %29 = vector.extract_strided_slice %24 {offsets = [0, 2], sizes = [8, 896], strides = [1, 1]} : vector<8x1024xbf16> to vector<8x896xbf16>
    %c96 = arith.constant 96 : index
    %c0_20 = arith.constant 0 : index
    %30 = vector.load %arg7[%c96, %c0_20] : memref<200x896xbf16, #tpu.memory_space<vmem>>, vector<8x896xbf16>
    tpu.vector_store %arg7[%c96, %c0_20], %29 {strides = array<i32>} : memref<200x896xbf16, #tpu.memory_space<vmem>>, vector<8x896xbf16>,
    %31 = vector.extract_strided_slice %24 {offsets = [0, 3], sizes = [8, 896], strides = [1, 1]} : vector<8x1024xbf16> to vector<8x896xbf16>
    %c104 = arith.constant 104 : index
    %c0_21 = arith.constant 0 : index
    %32 = vector.load %arg7[%c104, %c0_21] : memref<200x896xbf16, #tpu.memory_space<vmem>>, vector<8x896xbf16>
    tpu.vector_store %arg7[%c104, %c0_21], %31 {strides = array<i32>} : memref<200x896xbf16, #tpu.memory_space<vmem>>, vector<8x896xbf16>,
    %33 = vector.extract_strided_slice %24 {offsets = [0, 4], sizes = [8, 896], strides = [1, 1]} : vector<8x1024xbf16> to vector<8x896xbf16>
    %c112 = arith.constant 112 : index
    %c0_22 = arith.constant 0 : index
    %34 = vector.load %arg7[%c112, %c0_22] : memref<200x896xbf16, #tpu.memory_space<vmem>>, vector<8x896xbf16>
    tpu.vector_store %arg7[%c112, %c0_22], %33 {strides = array<i32>} : memref<200x896xbf16, #tpu.memory_space<vmem>>, vector<8x896xbf16>,
    %c0_23 = arith.constant 0 : index
    %c60 = arith.constant 60 : index
    %35 = vector.load %arg0[%c0_23, %c60] : memref<8x1152xbf16, #tpu.memory_space<vmem>>, vector<8x1024xbf16>
    %36 = vector.extract_strided_slice %35 {offsets = [0, 0], sizes = [8, 896], strides = [1, 1]} : vector<8x1024xbf16> to vector<8x896xbf16>
    %c120 = arith.constant 120 : index
    %c0_24 = arith.constant 0 : index
    %37 = vector.load %arg7[%c120, %c0_24] : memref<200x896xbf16, #tpu.memory_space<vmem>>, vector<8x896xbf16>
    tpu.vector_store %arg7[%c120, %c0_24], %36 {strides = array<i32>} : memref<200x896xbf16, #tpu.memory_space<vmem>>, vector<8x896xbf16>,
    %38 = vector.extract_strided_slice %35 {offsets = [0, 1], sizes = [8, 896], strides = [1, 1]} : vector<8x1024xbf16> to vector<8x896xbf16>
    %c128 = arith.constant 128 : index
    %c0_25 = arith.constant 0 : index
    %39 = vector.load %arg7[%c128, %c0_25] : memref<200x896xbf16, #tpu.memory_space<vmem>>, vector<8x896xbf16>
    tpu.vector_store %arg7[%c128, %c0_25], %38 {strides = array<i32>} : memref<200x896xbf16, #tpu.memory_space<vmem>>, vector<8x896xbf16>,
    %40 = vector.extract_strided_slice %35 {offsets = [0, 2], sizes = [8, 896], strides = [1, 1]} : vector<8x1024xbf16> to vector<8x896xbf16>
    %c136 = arith.constant 136 : index
    %c0_26 = arith.constant 0 : index
    %41 = vector.load %arg7[%c136, %c0_26] : memref<200x896xbf16, #tpu.memory_space<vmem>>, vector<8x896xbf16>
    tpu.vector_store %arg7[%c136, %c0_26], %40 {strides = array<i32>} : memref<200x896xbf16, #tpu.memory_space<vmem>>, vector<8x896xbf16>,
    %42 = vector.extract_strided_slice %35 {offsets = [0, 3], sizes = [8, 896], strides = [1, 1]} : vector<8x1024xbf16> to vector<8x896xbf16>
    %c144 = arith.constant 144 : index
    %c0_27 = arith.constant 0 : index
    %43 = vector.load %arg7[%c144, %c0_27] : memref<200x896xbf16, #tpu.memory_space<vmem>>, vector<8x896xbf16>
    tpu.vector_store %arg7[%c144, %c0_27], %42 {strides = array<i32>} : memref<200x896xbf16, #tpu.memory_space<vmem>>, vector<8x896xbf16>,
    %44 = vector.extract_strided_slice %35 {offsets = [0, 4], sizes = [8, 896], strides = [1, 1]} : vector<8x1024xbf16> to vector<8x896xbf16>
    %c152 = arith.constant 152 : index
    %c0_28 = arith.constant 0 : index
    %45 = vector.load %arg7[%c152, %c0_28] : memref<200x896xbf16, #tpu.memory_space<vmem>>, vector<8x896xbf16>
    tpu.vector_store %arg7[%c152, %c0_28], %44 {strides = array<i32>} : memref<200x896xbf16, #tpu.memory_space<vmem>>, vector<8x896xbf16>,
    %c0_29 = arith.constant 0 : index
    %c80_30 = arith.constant 80 : index
    %46 = vector.load %arg0[%c0_29, %c80_30] : memref<8x1152xbf16, #tpu.memory_space<vmem>>, vector<8x1024xbf16>
    %47 = vector.extract_strided_slice %46 {offsets = [0, 0], sizes = [8, 896], strides = [1, 1]} : vector<8x1024xbf16> to vector<8x896xbf16>
    %c160 = arith.constant 160 : index
    %c0_31 = arith.constant 0 : index
    %48 = vector.load %arg7[%c160, %c0_31] : memref<200x896xbf16, #tpu.memory_space<vmem>>, vector<8x896xbf16>
    tpu.vector_store %arg7[%c160, %c0_31], %47 {strides = array<i32>} : memref<200x896xbf16, #tpu.memory_space<vmem>>, vector<8x896xbf16>,
    %49 = vector.extract_strided_slice %46 {offsets = [0, 1], sizes = [8, 896], strides = [1, 1]} : vector<8x1024xbf16> to vector<8x896xbf16>
    %c168 = arith.constant 168 : index
    %c0_32 = arith.constant 0 : index
    %50 = vector.load %arg7[%c168, %c0_32] : memref<200x896xbf16, #tpu.memory_space<vmem>>, vector<8x896xbf16>
    tpu.vector_store %arg7[%c168, %c0_32], %49 {strides = array<i32>} : memref<200x896xbf16, #tpu.memory_space<vmem>>, vector<8x896xbf16>,
    %51 = vector.extract_strided_slice %46 {offsets = [0, 2], sizes = [8, 896], strides = [1, 1]} : vector<8x1024xbf16> to vector<8x896xbf16>
    %c176 = arith.constant 176 : index
    %c0_33 = arith.constant 0 : index
    %52 = vector.load %arg7[%c176, %c0_33] : memref<200x896xbf16, #tpu.memory_space<vmem>>, vector<8x896xbf16>
    tpu.vector_store %arg7[%c176, %c0_33], %51 {strides = array<i32>} : memref<200x896xbf16, #tpu.memory_space<vmem>>, vector<8x896xbf16>,
    %53 = vector.extract_strided_slice %46 {offsets = [0, 3], sizes = [8, 896], strides = [1, 1]} : vector<8x1024xbf16> to vector<8x896xbf16>
    %c184 = arith.constant 184 : index
    %c0_34 = arith.constant 0 : index
    %54 = vector.load %arg7[%c184, %c0_34] : memref<200x896xbf16, #tpu.memory_space<vmem>>, vector<8x896xbf16>
    tpu.vector_store %arg7[%c184, %c0_34], %53 {strides = array<i32>} : memref<200x896xbf16, #tpu.memory_space<vmem>>, vector<8x896xbf16>,
    %55 = vector.extract_strided_slice %46 {offsets = [0, 4], sizes = [8, 896], strides = [1, 1]} : vector<8x1024xbf16> to vector<8x896xbf16>
    %c192 = arith.constant 192 : index
    %c0_35 = arith.constant 0 : index
    %56 = vector.load %arg7[%c192, %c0_35] : memref<200x896xbf16, #tpu.memory_space<vmem>>, vector<8x896xbf16>
    tpu.vector_store %arg7[%c192, %c0_35], %55 {strides = array<i32>} : memref<200x896xbf16, #tpu.memory_space<vmem>>, vector<8x896xbf16>,
    %c0_36 = arith.constant 0 : index
    %c0_37 = arith.constant 0 : index
    %57 = vector.load %arg3[%c0_36, %c0_37] : memref<8x200xbf16, #tpu.memory_space<vmem>>, vector<8x200xbf16>
    %c0_38 = arith.constant 0 : index
    %c0_39 = arith.constant 0 : index
    %58 = vector.load %arg7[%c0_38, %c0_39] : memref<200x896xbf16, #tpu.memory_space<vmem>>, vector<200x896xbf16>
    %cst = arith.constant dense<0.000000e+00> : vector<8x896xf32>
    %59 = tpu.matmul %57, %58, %cst {dimension_numbers = #tpu.dot_dimension_numbers<[1], [0], [0], [1], [0, 0, 1, 1], [], []>} : vector<8x200xbf16>, vector<200x896xbf16>, vector<8x896xf32> -> vector<8x896xf32>
    %c0_40 = arith.constant 0 : index
    %c0_41 = arith.constant 0 : index
    %60 = vector.load %arg5[%c0_40, %c0_41] : memref<8x4xf32, #tpu.memory_space<vmem>>, vector<8x1xf32>
    %c0_42 = arith.constant 0 : index
    %c1_43 = arith.constant 1 : index
    %61 = vector.load %arg5[%c0_42, %c1_43] : memref<8x4xf32, #tpu.memory_space<vmem>>, vector<8x1xf32>
    %62 = vector.broadcast %0 : vector<1x896xf32> to vector<8x896xf32>
    %63 = arith.mulf %59, %62 : vector<8x896xf32>
    %cst_44 = arith.constant dense<0.000000e+00> : vector<8xf32>
    %64 = vector.multi_reduction <add>, %63, %cst_44 [1] : vector<8x896xf32> to vector<8xf32>
    %65 = vector.shape_cast %64 : vector<8xf32> to vector<8x1xf32>
    %66 = arith.mulf %63, %59 : vector<8x896xf32>
    %cst_45 = arith.constant dense<0.000000e+00> : vector<8xf32>
    %67 = vector.multi_reduction <add>, %66, %cst_45 [1] : vector<8x896xf32> to vector<8xf32>
    %68 = vector.shape_cast %67 : vector<8xf32> to vector<8x1xf32>
    %cst_46 = arith.constant 0.001953125 : f32
    %69 = vector.broadcast %cst_46 : f32 to vector<8x1xf32>
    %70 = arith.mulf %65, %69 : vector<8x1xf32>
    %cst_47 = arith.constant 0.001953125 : f32
    %71 = vector.broadcast %cst_47 : f32 to vector<8x1xf32>
    %72 = arith.mulf %68, %71 : vector<8x1xf32>
    %73 = arith.mulf %70, %70 : vector<8x1xf32>
    %74 = arith.subf %72, %73 : vector<8x1xf32>
    %cst_48 = arith.constant 9.99999974E-6 : f32
    %75 = vector.broadcast %cst_48 : f32 to vector<8x1xf32>
    %76 = arith.addf %74, %75 : vector<8x1xf32>
    %77 = math.rsqrt %76 : vector<8x1xf32>
    %78 = arith.mulf %77, %60 : vector<8x1xf32>
    %79 = arith.mulf %70, %78 : vector<8x1xf32>
    %80 = arith.subf %61, %79 : vector<8x1xf32>
    %81 = vector.broadcast %78 : vector<8x1xf32> to vector<8x896xf32>
    %82 = arith.mulf %59, %81 : vector<8x896xf32>
    %83 = vector.broadcast %80 : vector<8x1xf32> to vector<8x896xf32>
    %84 = arith.addf %82, %83 : vector<8x896xf32>
    %cst_49 = arith.constant 0.000000e+00 : f32
    %85 = vector.broadcast %cst_49 : f32 to vector<8x896xf32>
    %86 = arith.maximumf %84, %85 : vector<8x896xf32>
    %87 = vector.broadcast %0 : vector<1x896xf32> to vector<8x896xf32>
    %88 = arith.mulf %86, %87 : vector<8x896xf32>
    %89 = arith.truncf %88 : vector<8x896xf32> to vector<8x896xbf16>
    %c0_50 = arith.constant 0 : index
    %c0_51 = arith.constant 0 : index
    %90 = vector.load %arg8[%c0_50, %c0_51] : memref<8x1152xbf16, #tpu.memory_space<vmem>>, vector<8x896xbf16>
    tpu.vector_store %arg8[%c0_50, %c0_51], %89 {strides = array<i32>} : memref<8x1152xbf16, #tpu.memory_space<vmem>>, vector<8x896xbf16>,
    %cst_52 = arith.constant 0.000000e+00 : bf16
    %91 = vector.broadcast %cst_52 : bf16 to vector<8x256xbf16>
    %c0_53 = arith.constant 0 : index
    %c896 = arith.constant 896 : index
    %92 = vector.load %arg8[%c0_53, %c896] : memref<8x1152xbf16, #tpu.memory_space<vmem>>, vector<8x256xbf16>
    tpu.vector_store %arg8[%c0_53, %c896], %91 {strides = array<i32>} : memref<8x1152xbf16, #tpu.memory_space<vmem>>, vector<8x256xbf16>,
    %c0_54 = arith.constant 0 : index
    %c0_55 = arith.constant 0 : index
    %93 = vector.load %arg8[%c0_54, %c0_55] : memref<8x1152xbf16, #tpu.memory_space<vmem>>, vector<8x1024xbf16>
    %94 = vector.extract_strided_slice %93 {offsets = [0, 0], sizes = [8, 896], strides = [1, 1]} : vector<8x1024xbf16> to vector<8x896xbf16>
    %c0_56 = arith.constant 0 : index
    %c0_57 = arith.constant 0 : index
    %95 = vector.load %arg7[%c0_56, %c0_57] : memref<200x896xbf16, #tpu.memory_space<vmem>>, vector<8x896xbf16>
    tpu.vector_store %arg7[%c0_56, %c0_57], %94 {strides = array<i32>} : memref<200x896xbf16, #tpu.memory_space<vmem>>, vector<8x896xbf16>,
    %96 = vector.extract_strided_slice %93 {offsets = [0, 1], sizes = [8, 896], strides = [1, 1]} : vector<8x1024xbf16> to vector<8x896xbf16>
    %c8_58 = arith.constant 8 : index
    %c0_59 = arith.constant 0 : index
    %97 = vector.load %arg7[%c8_58, %c0_59] : memref<200x896xbf16, #tpu.memory_space<vmem>>, vector<8x896xbf16>
    tpu.vector_store %arg7[%c8_58, %c0_59], %96 {strides = array<i32>} : memref<200x896xbf16, #tpu.memory_space<vmem>>, vector<8x896xbf16>,
    %98 = vector.extract_strided_slice %93 {offsets = [0, 2], sizes = [8, 896], strides = [1, 1]} : vector<8x1024xbf16> to vector<8x896xbf16>
    %c16_60 = arith.constant 16 : index
    %c0_61 = arith.constant 0 : index
    %99 = vector.load %arg7[%c16_60, %c0_61] : memref<200x896xbf16, #tpu.memory_space<vmem>>, vector<8x896xbf16>
    tpu.vector_store %arg7[%c16_60, %c0_61], %98 {strides = array<i32>} : memref<200x896xbf16, #tpu.memory_space<vmem>>, vector<8x896xbf16>,
    %100 = vector.extract_strided_slice %93 {offsets = [0, 3], sizes = [8, 896], strides = [1, 1]} : vector<8x1024xbf16> to vector<8x896xbf16>
    %c24_62 = arith.constant 24 : index
    %c0_63 = arith.constant 0 : index
    %101 = vector.load %arg7[%c24_62, %c0_63] : memref<200x896xbf16, #tpu.memory_space<vmem>>, vector<8x896xbf16>
    tpu.vector_store %arg7[%c24_62, %c0_63], %100 {strides = array<i32>} : memref<200x896xbf16, #tpu.memory_space<vmem>>, vector<8x896xbf16>,
    %102 = vector.extract_strided_slice %93 {offsets = [0, 4], sizes = [8, 896], strides = [1, 1]} : vector<8x1024xbf16> to vector<8x896xbf16>
    %c32_64 = arith.constant 32 : index
    %c0_65 = arith.constant 0 : index
    %103 = vector.load %arg7[%c32_64, %c0_65] : memref<200x896xbf16, #tpu.memory_space<vmem>>, vector<8x896xbf16>
    tpu.vector_store %arg7[%c32_64, %c0_65], %102 {strides = array<i32>} : memref<200x896xbf16, #tpu.memory_space<vmem>>, vector<8x896xbf16>,
    %c0_66 = arith.constant 0 : index
    %c20_67 = arith.constant 20 : index
    %104 = vector.load %arg8[%c0_66, %c20_67] : memref<8x1152xbf16, #tpu.memory_space<vmem>>, vector<8x1024xbf16>
    %105 = vector.extract_strided_slice %104 {offsets = [0, 0], sizes = [8, 896], strides = [1, 1]} : vector<8x1024xbf16> to vector<8x896xbf16>
    %c40_68 = arith.constant 40 : index
    %c0_69 = arith.constant 0 : index
    %106 = vector.load %arg7[%c40_68, %c0_69] : memref<200x896xbf16, #tpu.memory_space<vmem>>, vector<8x896xbf16>
    tpu.vector_store %arg7[%c40_68, %c0_69], %105 {strides = array<i32>} : memref<200x896xbf16, #tpu.memory_space<vmem>>, vector<8x896xbf16>,
    %107 = vector.extract_strided_slice %104 {offsets = [0, 1], sizes = [8, 896], strides = [1, 1]} : vector<8x1024xbf16> to vector<8x896xbf16>
    %c48_70 = arith.constant 48 : index
    %c0_71 = arith.constant 0 : index
    %108 = vector.load %arg7[%c48_70, %c0_71] : memref<200x896xbf16, #tpu.memory_space<vmem>>, vector<8x896xbf16>
    tpu.vector_store %arg7[%c48_70, %c0_71], %107 {strides = array<i32>} : memref<200x896xbf16, #tpu.memory_space<vmem>>, vector<8x896xbf16>,
    %109 = vector.extract_strided_slice %104 {offsets = [0, 2], sizes = [8, 896], strides = [1, 1]} : vector<8x1024xbf16> to vector<8x896xbf16>
    %c56_72 = arith.constant 56 : index
    %c0_73 = arith.constant 0 : index
    %110 = vector.load %arg7[%c56_72, %c0_73] : memref<200x896xbf16, #tpu.memory_space<vmem>>, vector<8x896xbf16>
    tpu.vector_store %arg7[%c56_72, %c0_73], %109 {strides = array<i32>} : memref<200x896xbf16, #tpu.memory_space<vmem>>, vector<8x896xbf16>,
    %111 = vector.extract_strided_slice %104 {offsets = [0, 3], sizes = [8, 896], strides = [1, 1]} : vector<8x1024xbf16> to vector<8x896xbf16>
    %c64_74 = arith.constant 64 : index
    %c0_75 = arith.constant 0 : index
    %112 = vector.load %arg7[%c64_74, %c0_75] : memref<200x896xbf16, #tpu.memory_space<vmem>>, vector<8x896xbf16>
    tpu.vector_store %arg7[%c64_74, %c0_75], %111 {strides = array<i32>} : memref<200x896xbf16, #tpu.memory_space<vmem>>, vector<8x896xbf16>,
    %113 = vector.extract_strided_slice %104 {offsets = [0, 4], sizes = [8, 896], strides = [1, 1]} : vector<8x1024xbf16> to vector<8x896xbf16>
    %c72_76 = arith.constant 72 : index
    %c0_77 = arith.constant 0 : index
    %114 = vector.load %arg7[%c72_76, %c0_77] : memref<200x896xbf16, #tpu.memory_space<vmem>>, vector<8x896xbf16>
    tpu.vector_store %arg7[%c72_76, %c0_77], %113 {strides = array<i32>} : memref<200x896xbf16, #tpu.memory_space<vmem>>, vector<8x896xbf16>,
    %c0_78 = arith.constant 0 : index
    %c40_79 = arith.constant 40 : index
    %115 = vector.load %arg8[%c0_78, %c40_79] : memref<8x1152xbf16, #tpu.memory_space<vmem>>, vector<8x1024xbf16>
    %116 = vector.extract_strided_slice %115 {offsets = [0, 0], sizes = [8, 896], strides = [1, 1]} : vector<8x1024xbf16> to vector<8x896xbf16>
    %c80_80 = arith.constant 80 : index
    %c0_81 = arith.constant 0 : index
    %117 = vector.load %arg7[%c80_80, %c0_81] : memref<200x896xbf16, #tpu.memory_space<vmem>>, vector<8x896xbf16>
    tpu.vector_store %arg7[%c80_80, %c0_81], %116 {strides = array<i32>} : memref<200x896xbf16, #tpu.memory_space<vmem>>, vector<8x896xbf16>,
    %118 = vector.extract_strided_slice %115 {offsets = [0, 1], sizes = [8, 896], strides = [1, 1]} : vector<8x1024xbf16> to vector<8x896xbf16>
    %c88_82 = arith.constant 88 : index
    %c0_83 = arith.constant 0 : index
    %119 = vector.load %arg7[%c88_82, %c0_83] : memref<200x896xbf16, #tpu.memory_space<vmem>>, vector<8x896xbf16>
    tpu.vector_store %arg7[%c88_82, %c0_83], %118 {strides = array<i32>} : memref<200x896xbf16, #tpu.memory_space<vmem>>, vector<8x896xbf16>,
    %120 = vector.extract_strided_slice %115 {offsets = [0, 2], sizes = [8, 896], strides = [1, 1]} : vector<8x1024xbf16> to vector<8x896xbf16>
    %c96_84 = arith.constant 96 : index
    %c0_85 = arith.constant 0 : index
    %121 = vector.load %arg7[%c96_84, %c0_85] : memref<200x896xbf16, #tpu.memory_space<vmem>>, vector<8x896xbf16>
    tpu.vector_store %arg7[%c96_84, %c0_85], %120 {strides = array<i32>} : memref<200x896xbf16, #tpu.memory_space<vmem>>, vector<8x896xbf16>,
    %122 = vector.extract_strided_slice %115 {offsets = [0, 3], sizes = [8, 896], strides = [1, 1]} : vector<8x1024xbf16> to vector<8x896xbf16>
    %c104_86 = arith.constant 104 : index
    %c0_87 = arith.constant 0 : index
    %123 = vector.load %arg7[%c104_86, %c0_87] : memref<200x896xbf16, #tpu.memory_space<vmem>>, vector<8x896xbf16>
    tpu.vector_store %arg7[%c104_86, %c0_87], %122 {strides = array<i32>} : memref<200x896xbf16, #tpu.memory_space<vmem>>, vector<8x896xbf16>,
    %124 = vector.extract_strided_slice %115 {offsets = [0, 4], sizes = [8, 896], strides = [1, 1]} : vector<8x1024xbf16> to vector<8x896xbf16>
    %c112_88 = arith.constant 112 : index
    %c0_89 = arith.constant 0 : index
    %125 = vector.load %arg7[%c112_88, %c0_89] : memref<200x896xbf16, #tpu.memory_space<vmem>>, vector<8x896xbf16>
    tpu.vector_store %arg7[%c112_88, %c0_89], %124 {strides = array<i32>} : memref<200x896xbf16, #tpu.memory_space<vmem>>, vector<8x896xbf16>,
    %c0_90 = arith.constant 0 : index
    %c60_91 = arith.constant 60 : index
    %126 = vector.load %arg8[%c0_90, %c60_91] : memref<8x1152xbf16, #tpu.memory_space<vmem>>, vector<8x1024xbf16>
    %127 = vector.extract_strided_slice %126 {offsets = [0, 0], sizes = [8, 896], strides = [1, 1]} : vector<8x1024xbf16> to vector<8x896xbf16>
    %c120_92 = arith.constant 120 : index
    %c0_93 = arith.constant 0 : index
    %128 = vector.load %arg7[%c120_92, %c0_93] : memref<200x896xbf16, #tpu.memory_space<vmem>>, vector<8x896xbf16>
    tpu.vector_store %arg7[%c120_92, %c0_93], %127 {strides = array<i32>} : memref<200x896xbf16, #tpu.memory_space<vmem>>, vector<8x896xbf16>,
    %129 = vector.extract_strided_slice %126 {offsets = [0, 1], sizes = [8, 896], strides = [1, 1]} : vector<8x1024xbf16> to vector<8x896xbf16>
    %c128_94 = arith.constant 128 : index
    %c0_95 = arith.constant 0 : index
    %130 = vector.load %arg7[%c128_94, %c0_95] : memref<200x896xbf16, #tpu.memory_space<vmem>>, vector<8x896xbf16>
    tpu.vector_store %arg7[%c128_94, %c0_95], %129 {strides = array<i32>} : memref<200x896xbf16, #tpu.memory_space<vmem>>, vector<8x896xbf16>,
    %131 = vector.extract_strided_slice %126 {offsets = [0, 2], sizes = [8, 896], strides = [1, 1]} : vector<8x1024xbf16> to vector<8x896xbf16>
    %c136_96 = arith.constant 136 : index
    %c0_97 = arith.constant 0 : index
    %132 = vector.load %arg7[%c136_96, %c0_97] : memref<200x896xbf16, #tpu.memory_space<vmem>>, vector<8x896xbf16>
    tpu.vector_store %arg7[%c136_96, %c0_97], %131 {strides = array<i32>} : memref<200x896xbf16, #tpu.memory_space<vmem>>, vector<8x896xbf16>,
    %133 = vector.extract_strided_slice %126 {offsets = [0, 3], sizes = [8, 896], strides = [1, 1]} : vector<8x1024xbf16> to vector<8x896xbf16>
    %c144_98 = arith.constant 144 : index
    %c0_99 = arith.constant 0 : index
    %134 = vector.load %arg7[%c144_98, %c0_99] : memref<200x896xbf16, #tpu.memory_space<vmem>>, vector<8x896xbf16>
    tpu.vector_store %arg7[%c144_98, %c0_99], %133 {strides = array<i32>} : memref<200x896xbf16, #tpu.memory_space<vmem>>, vector<8x896xbf16>,
    %135 = vector.extract_strided_slice %126 {offsets = [0, 4], sizes = [8, 896], strides = [1, 1]} : vector<8x1024xbf16> to vector<8x896xbf16>
    %c152_100 = arith.constant 152 : index
    %c0_101 = arith.constant 0 : index
    %136 = vector.load %arg7[%c152_100, %c0_101] : memref<200x896xbf16, #tpu.memory_space<vmem>>, vector<8x896xbf16>
    tpu.vector_store %arg7[%c152_100, %c0_101], %135 {strides = array<i32>} : memref<200x896xbf16, #tpu.memory_space<vmem>>, vector<8x896xbf16>,
    %c0_102 = arith.constant 0 : index
    %c80_103 = arith.constant 80 : index
    %137 = vector.load %arg8[%c0_102, %c80_103] : memref<8x1152xbf16, #tpu.memory_space<vmem>>, vector<8x1024xbf16>
    %138 = vector.extract_strided_slice %137 {offsets = [0, 0], sizes = [8, 896], strides = [1, 1]} : vector<8x1024xbf16> to vector<8x896xbf16>
    %c160_104 = arith.constant 160 : index
    %c0_105 = arith.constant 0 : index
    %139 = vector.load %arg7[%c160_104, %c0_105] : memref<200x896xbf16, #tpu.memory_space<vmem>>, vector<8x896xbf16>
    tpu.vector_store %arg7[%c160_104, %c0_105], %138 {strides = array<i32>} : memref<200x896xbf16, #tpu.memory_space<vmem>>, vector<8x896xbf16>,
    %140 = vector.extract_strided_slice %137 {offsets = [0, 1], sizes = [8, 896], strides = [1, 1]} : vector<8x1024xbf16> to vector<8x896xbf16>
    %c168_106 = arith.constant 168 : index
    %c0_107 = arith.constant 0 : index
    %141 = vector.load %arg7[%c168_106, %c0_107] : memref<200x896xbf16, #tpu.memory_space<vmem>>, vector<8x896xbf16>
    tpu.vector_store %arg7[%c168_106, %c0_107], %140 {strides = array<i32>} : memref<200x896xbf16, #tpu.memory_space<vmem>>, vector<8x896xbf16>,
    %142 = vector.extract_strided_slice %137 {offsets = [0, 2], sizes = [8, 896], strides = [1, 1]} : vector<8x1024xbf16> to vector<8x896xbf16>
    %c176_108 = arith.constant 176 : index
    %c0_109 = arith.constant 0 : index
    %143 = vector.load %arg7[%c176_108, %c0_109] : memref<200x896xbf16, #tpu.memory_space<vmem>>, vector<8x896xbf16>
    tpu.vector_store %arg7[%c176_108, %c0_109], %142 {strides = array<i32>} : memref<200x896xbf16, #tpu.memory_space<vmem>>, vector<8x896xbf16>,
    %144 = vector.extract_strided_slice %137 {offsets = [0, 3], sizes = [8, 896], strides = [1, 1]} : vector<8x1024xbf16> to vector<8x896xbf16>
    %c184_110 = arith.constant 184 : index
    %c0_111 = arith.constant 0 : index
    %145 = vector.load %arg7[%c184_110, %c0_111] : memref<200x896xbf16, #tpu.memory_space<vmem>>, vector<8x896xbf16>
    tpu.vector_store %arg7[%c184_110, %c0_111], %144 {strides = array<i32>} : memref<200x896xbf16, #tpu.memory_space<vmem>>, vector<8x896xbf16>,
    %146 = vector.extract_strided_slice %137 {offsets = [0, 4], sizes = [8, 896], strides = [1, 1]} : vector<8x1024xbf16> to vector<8x896xbf16>
    %c192_112 = arith.constant 192 : index
    %c0_113 = arith.constant 0 : index
    %147 = vector.load %arg7[%c192_112, %c0_113] : memref<200x896xbf16, #tpu.memory_space<vmem>>, vector<8x896xbf16>
    tpu.vector_store %arg7[%c192_112, %c0_113], %146 {strides = array<i32>} : memref<200x896xbf16, #tpu.memory_space<vmem>>, vector<8x896xbf16>,
    %c0_114 = arith.constant 0 : index
    %c0_115 = arith.constant 0 : index
    %148 = vector.load %arg4[%c0_114, %c0_115] : memref<8x200xbf16, #tpu.memory_space<vmem>>, vector<8x200xbf16>
    %c0_116 = arith.constant 0 : index
    %c0_117 = arith.constant 0 : index
    %149 = vector.load %arg7[%c0_116, %c0_117] : memref<200x896xbf16, #tpu.memory_space<vmem>>, vector<200x896xbf16>
    %cst_118 = arith.constant dense<0.000000e+00> : vector<8x896xf32>
    %150 = tpu.matmul %148, %149, %cst_118 {dimension_numbers = #tpu.dot_dimension_numbers<[1], [0], [0], [1], [0, 0, 1, 1], [], []>} : vector<8x200xbf16>, vector<200x896xbf16>, vector<8x896xf32> -> vector<8x896xf32>
    %c0_119 = arith.constant 0 : index
    %c2 = arith.constant 2 : index
    %151 = vector.load %arg5[%c0_119, %c2] : memref<8x4xf32, #tpu.memory_space<vmem>>, vector<8x1xf32>
    %c0_120 = arith.constant 0 : index
    %c3 = arith.constant 3 : index
    %152 = vector.load %arg5[%c0_120, %c3] : memref<8x4xf32, #tpu.memory_space<vmem>>, vector<8x1xf32>
    %153 = vector.broadcast %1 : vector<1x896xf32> to vector<8x896xf32>
    %154 = arith.mulf %150, %153 : vector<8x896xf32>
    %cst_121 = arith.constant dense<0.000000e+00> : vector<8xf32>
    %155 = vector.multi_reduction <add>, %154, %cst_121 [1] : vector<8x896xf32> to vector<8xf32>
    %156 = vector.shape_cast %155 : vector<8xf32> to vector<8x1xf32>
    %157 = arith.mulf %154, %150 : vector<8x896xf32>
    %cst_122 = arith.constant dense<0.000000e+00> : vector<8xf32>
    %158 = vector.multi_reduction <add>, %157, %cst_122 [1] : vector<8x896xf32> to vector<8xf32>
    %159 = vector.shape_cast %158 : vector<8xf32> to vector<8x1xf32>
    %cst_123 = arith.constant 0.001953125 : f32
    %160 = vector.broadcast %cst_123 : f32 to vector<8x1xf32>
    %161 = arith.mulf %156, %160 : vector<8x1xf32>
    %cst_124 = arith.constant 0.001953125 : f32
    %162 = vector.broadcast %cst_124 : f32 to vector<8x1xf32>
    %163 = arith.mulf %159, %162 : vector<8x1xf32>
    %164 = arith.mulf %161, %161 : vector<8x1xf32>
    %165 = arith.subf %163, %164 : vector<8x1xf32>
    %cst_125 = arith.constant 9.99999974E-6 : f32
    %166 = vector.broadcast %cst_125 : f32 to vector<8x1xf32>
    %167 = arith.addf %165, %166 : vector<8x1xf32>
    %168 = math.rsqrt %167 : vector<8x1xf32>
    %169 = arith.mulf %168, %151 : vector<8x1xf32>
    %170 = arith.mulf %161, %169 : vector<8x1xf32>
    %171 = arith.subf %152, %170 : vector<8x1xf32>
    %172 = vector.broadcast %169 : vector<8x1xf32> to vector<8x896xf32>
    %173 = arith.mulf %150, %172 : vector<8x896xf32>
    %174 = vector.broadcast %171 : vector<8x1xf32> to vector<8x896xf32>
    %175 = arith.addf %173, %174 : vector<8x896xf32>
    %cst_126 = arith.constant 0.000000e+00 : f32
    %176 = vector.broadcast %cst_126 : f32 to vector<8x896xf32>
    %177 = arith.maximumf %175, %176 : vector<8x896xf32>
    %c0_127 = arith.constant 0 : index
    %c0_128 = arith.constant 0 : index
    %178 = vector.load %arg1[%c0_127, %c0_128] : memref<8x896xf32, #tpu.memory_space<vmem>>, vector<8x896xf32>
    %179 = arith.addf %177, %178 : vector<8x896xf32>
    %c0_129 = arith.constant 0 : index
    %c0_130 = arith.constant 0 : index
    %180 = vector.load %arg6[%c0_129, %c0_130] : memref<8x896xf32, #tpu.memory_space<vmem>>, vector<8x896xf32>
    tpu.vector_store %arg6[%c0_129, %c0_130], %179 {strides = array<i32>} : memref<8x896xf32, #tpu.memory_space<vmem>>, vector<8x896xf32>,
    return
  }
}

</mosaic_0001>

<bundles_post_ra>
// kernel: basic_block_pallas.1
= control target key start
LH: loop header
LB: loop body
LE: loop exit
PB: predicated region body
PF: predicated region fallthrough
CT: control target
= control target key end

     0   :  { %s4097_s25 = smov 44   ;;  %s4098_s26 = smov 68   ;;  %vm51_vm0 = vcmask 1043456   ;;  %vm5943_vm1 = vcmask 556032   ;;  %vm5941_vm2 = vcmask 359424   ;;  %vm5947_vm3 = vcmask 687104   ;;  %s5931_s0 = inlined_call_operand.vmem [shape: bf16[8,1152], index: 0, kind: input, shape index: {}]   ;;  %s5932_s3 = inlined_call_operand.vmem [shape: bf16[8,200], index: 3, kind: input, shape index: {}]   ;;  %s5933_s2 = inlined_call_operand.vmem [shape: f32[2,896], index: 2, kind: input, shape index: {}]   ;;  %s5934_s5 = inlined_call_operand.vmem [shape: f32[8,4], index: 5, kind: input, shape index: {}]   ;;  %s5935_s4 = inlined_call_operand.vmem [shape: bf16[8,200], index: 4, kind: input, shape index: {}]   ;;  %s5936_s1 = inlined_call_operand.vmem [shape: f32[8,896], index: 1, kind: input, shape index: {}]   ;;  %s5937_s6 = inlined_call_operand.vmem [shape: f32[8,896], index: 6, kind: output, shape index: {}]  }
   0x1   :  { %v4164_v0 = vld [vmem:[%s5931_s0] sm:$0xff]  ;;  %v4169_v1 = vld [vmem:[%s5931_s0 + $0x8] sm:$0xff]  ;;  %s4099_s27 = smov 84   ;;  %s4100_s28 = smov 46   ;;  %v4194_v2 = vld [vmem:[%s5931_s0 + $0x10] sm:$0xff]  ;;  %vm5940_vm4 = vcmask 375808  }
   0x2   :  { %716 = vrot.lane.b32.xlu0 %v4164_v0, %s4097_s25  ;;  %456 = vrot.lane.b32.xlu2 %v4164_v0, %s4098_s26  ;;  %32 = vst [vmem:[#allocation2 + $0x8] sm:$0xff] %v4169_v1  ;;  %s4101_s29 = smov 45   ;;  %s4102_s8 = smov 86   ;;  %v4248_v3 = vld [vmem:[%s5931_s0 + $0x18] sm:$0xff]  ;;  %vm701_vm5 = vcmask 367616   ;;  %vm5945_vm6 = vcmask 703488  }
   0x3   :  { %420 = vrot.lane.b32.xlu1 %v4164_v0, %s4099_s27  ;;  %31 = vst [vmem:[#allocation2] sm:$0xff] %v4164_v0  ;;  %s4103_s9 = smov 48   ;;  %s4104_s10 = smov 85   ;;  %vm5942_vm7 = vcmask 695296   ;;  %vm617_vm8 = vcmask 392192   ;;  %vm645_vm9 = vcmask 384000  }
   0x4   :  { %33 = vst [vmem:[#allocation2 + $0x10] sm:$0xff] %v4194_v2  ;;  %s4105_s11 = smov 47   ;;  %s4106_s12 = smov 87   ;;  %vm5944_vm10 = vcmask 719872   ;;  %vm5939_vm11 = vcmask 711680   ;;  %vm5938_vm12 = vcmask 531456  }
   0x5   :  { %s4107_s13 = smov 88   ;;  %s4108_s14 = smov 64   ;;  %34 = vst [vmem:[#allocation2 + $0x18] sm:$0xf] %v4248_v3  ;;  %vm581_vm13 = vcmask 523264   ;;  %vm257_vm14 = vcmask 859136  }
   0x6   :  { %s4109_s15 = smov 65   ;;  %s4110_s16 = smov 105   ;;  %vm5946_vm15 = vcmask 850944  }
   0x7   :  { %s4111_s17 = smov 104   ;;  %s4112_s20 = smov 67  }
   0x8   :  { %s4113_s21 = smov 66   ;;  %s4114_s0 = smov 107  }
   0x9   :  { %s4115_s22 = smov 106   ;;  %s4116_s23 = smov 124  }
   0xa   :  { %718 = vrot.lane.b32.xlu0 %v4169_v1, %s4097_s25  ;;  %458 = vrot.lane.b32.xlu2 %v4169_v1, %s4098_s26  ;;  %s4117_s24 = smov 108   ;;  %s4118_s30 = smov 126  }
   0xb   :  { %422 = vrot.lane.b32.xlu1 %v4169_v1, %s4099_s27  ;;  %s4119_s7 = smov 125   ;;  %s5948_s18 = smov 127  }
   0xc   :  { %s5972_s19 = smov 127  }
  0x12   :  { %660 = vrot.lane.b32.xlu0 %v4164_v0, %s4100_s28  ;;  %688 = vrot.lane.b32.xlu2 %v4164_v0, %s4101_s29 }
  0x13   :  { %662 = vrot.lane.b32.xlu1 %v4169_v1, %s4100_s28 }
  0x1a   :  { %690 = vrot.lane.b32.xlu0 %v4169_v1, %s4101_s29  ;;  %366 = vrot.lane.b32.xlu2 %v4169_v1, %s4102_s8 }
  0x1b   :  { %364 = vrot.lane.b32.xlu1 %v4164_v0, %s4102_s8 }
  0x22   :  { %604 = vrot.lane.b32.xlu2 %v4164_v0, %s4103_s9  ;;  %392 = vrot.lane.b32.xlu0 %v4164_v0, %s4104_s10 }
  0x23   :  { %394 = vrot.lane.b32.xlu1 %v4169_v1, %s4104_s10 }
  0x2a   :  { %634 = vrot.lane.b32.xlu2 %v4169_v1, %s4105_s11  ;;  %606 = vrot.lane.b32.xlu0 %v4169_v1, %s4103_s9 }
  0x2b   :  { %632 = vrot.lane.b32.xlu1 %v4164_v0, %s4105_s11 }
  0x32   :  { %336 = vrot.lane.b32.xlu2 %v4164_v0, %s4106_s12  ;;  %308 = vrot.lane.b32.xlu0 %v4164_v0, %s4107_s13 }
  0x33   :  { %310 = vrot.lane.b32.xlu1 %v4169_v1, %s4107_s13 }
  0x3a   :  { %460 = vrot.lane.b32.xlu2 %v4194_v2, %s4098_s26  ;;  %338 = vrot.lane.b32.xlu0 %v4169_v1, %s4106_s12 }
  0x3b   :  { %424 = vrot.lane.b32.xlu1 %v4194_v2, %s4099_s27 }
  0x42   :  { %568 = vrot.lane.b32.xlu2 %v4164_v0, %s4108_s14  ;;  %540 = vrot.lane.b32.xlu0 %v4164_v0, %s4109_s15 }
  0x43   :  { %542 = vrot.lane.b32.xlu1 %v4169_v1, %s4109_s15 }
  0x4a   :  { %570 = vrot.lane.b32.xlu0 %v4169_v1, %s4108_s14  ;;  %244 = vrot.lane.b32.xlu2 %v4164_v0, %s4110_s16 }
  0x4b   :  { %720 = vrot.lane.b32.xlu1 %v4194_v2, %s4097_s25 }
  0x52   :  { %246 = vrot.lane.b32.xlu0 %v4169_v1, %s4110_s16  ;;  %274 = vrot.lane.b32.xlu2 %v4169_v1, %s4111_s17 }
  0x53   :  { %272 = vrot.lane.b32.xlu1 %v4164_v0, %s4111_s17 }
  0x5a   :  { %368 = vrot.lane.b32.xlu0 %v4194_v2, %s4102_s8  ;;  %484 = vrot.lane.b32.xlu2 %v4164_v0, %s4112_s20 }
  0x5b   :  { %396 = vrot.lane.b32.xlu1 %v4194_v2, %s4104_s10 }
  0x5c   :  { %v457_v4 = vpop.permute.xlu2 %456 }
  0x5d   :  { %v464_v5 = vrot.slane %v457_v4, 4 }
  0x62   :  { %486 = vrot.lane.b32.xlu0 %v4169_v1, %s4112_s20  ;;  %514 = vrot.lane.b32.xlu2 %v4169_v1, %s4113_s21 }
  0x63   :  { %512 = vrot.lane.b32.xlu1 %v4164_v0, %s4113_s21 }
  0x64   :  { %v4263_v6 = vpop.permute.xlu2 %458 }
  0x65   :  { %v465_v7 = vrot.slane %v4263_v6, 4 }
  0x67   :  { %v468_v8 = vsel %vm51_vm0, %v464_v5, %v465_v7 }
  0x68   :  { %v470_v9 = vsel %vm5943_vm1, %v457_v4, %v468_v8 }
  0x69   :  { %480 = vst [vmem:[#allocation2 + $0x1a4] sm:$0xff] %v470_v9 }
  0x6a   :  { %188 = vrot.lane.b32.xlu0 %v4164_v0, %s4114_s0  ;;  %216 = vrot.lane.b32.xlu2 %v4164_v0, %s4115_s22 }
  0x6b   :  { %190 = vrot.lane.b32.xlu1 %v4169_v1, %s4114_s0 }
  0x6c   :  { %v4276_v10 = vpop.permute.xlu2 %688 }
  0x6d   :  { %v696_v47 = vrot.slane %v4276_v10, 4 }
  0x70   :  { %v3942_v37 = vld [vmem:[#allocation2 + $0x1a0] sm:$0xf0]  ;;  %v3404_v41 = vld [vmem:[#allocation2 + $0x1a4] sm:$0xf0] }
  0x72   :  { %218 = vrot.lane.b32.xlu0 %v4169_v1, %s4115_s22  ;;  %340 = vrot.lane.b32.xlu2 %v4194_v2, %s4106_s12 }
  0x73   :  { %312 = vrot.lane.b32.xlu1 %v4194_v2, %s4107_s13 }
  0x74   :  { %v717_v11 = vpop.permute.xlu0 %716  ;;  %v4284_v12 = vpop.permute.xlu2 %366 }
  0x75   :  { %v421_v13 = vpop.permute.xlu1 %420  ;;  %v724_v16 = vrot.slane %v717_v11, 4  ;;  %v373_v44 = vrot.slane %v4284_v12, 4 }
  0x76   :  { %v428_v19 = vrot.slane %v421_v13, 4 }
  0x7a   :  { %426 = vrot.lane.b32.xlu0 %v4248_v3, %s4099_s27  ;;  %664 = vrot.lane.b32.xlu2 %v4194_v2, %s4100_s28 }
  0x7b   :  { %462 = vrot.lane.b32.xlu1 %v4248_v3, %s4098_s26 }
  0x7c   :  { %v4292_v14 = vpop.permute.xlu0 %718  ;;  %v4294_v15 = vpop.permute.xlu2 %604 }
  0x7d   :  { %v725_v17 = vrot.slane %v4292_v14, 4  ;;  %v4297_v18 = vpop.permute.xlu1 %422 }
  0x7e   :  { %v429_v20 = vrot.slane %v4297_v18, 4 }
  0x7f   :  { %v728_v21 = vsel %vm51_vm0, %v724_v16, %v725_v17 }
  0x80   :  { %v730_v22 = vsel %vm5941_vm2, %v717_v11, %v728_v21  ;;  %v432_v23 = vsel %vm51_vm0, %v428_v19, %v429_v20  ;;  %v612_v19 = vrot.slane %v4294_v15, 4 }
  0x81   :  { %v434_v24 = vsel %vm5947_vm3, %v421_v13, %v432_v23  ;;  %v1119_v25 = vunpack.c.l.b16 %v730_v22  ;;  %v1120_v26 = vunpack.c.h.b16 %v730_v22 }
  0x82   :  { %444 = vst [vmem:[#allocation2 + $0x188] sm:$0xff] %v434_v24  ;;  %692 = vrot.lane.b32.xlu0 %v4194_v2, %s4101_s29  ;;  %126 = vrot.lane.b32.xlu2 %v4169_v1, %s4116_s23 }
  0x83   :  { %124 = vrot.lane.b32.xlu1 %v4164_v0, %s4116_s23  ;;  %v1210_v27 = vpack.c.b16 %v1119_v25, %v1119_v25  ;;  %v1211_v28 = vpack.c.b16 %v1120_v26, %v1120_v26 }
  0x84   :  { %v661_v29 = vpop.permute.xlu0 %660  ;;  %v4314_v30 = vpop.permute.xlu2 %634 }
  0x85   :  { %v668_v31 = vrot.slane %v661_v29, 4  ;;  %v4316_v32 = vpop.permute.xlu1 %662  ;;  %v1307_v33 = vsel %vm51_vm0, %v1210_v27, 0  ;;  %v1310_v34 = vsel %vm51_vm0, %v1211_v28, 0 }
  0x86   :  { %v669_v35 = vrot.slane %v4316_v32, 4  ;;  %1343 = vmatpush.bf16.msra.mxu1 %v1307_v33  ;;  %1369 = vmatpush.bf16.msra.mxu3 %v1310_v34 }
  0x88   :  { %v672_v36 = vsel %vm51_vm0, %v668_v31, %v669_v35 }
  0x89   :  { %v674_v38 = vsel %vm5940_vm4, %v661_v29, %v672_v36  ;;  %v3402_v39 = vld [vmem:[#allocation2 + $0x188] sm:$0xf]  ;;  %v3939_v40 = vld [vmem:[#allocation2 + $0x18c] sm:$0xf] }
  0x8a   :  { %684 = vst [vmem:[#allocation2 + $0x268] sm:$0xff] %v674_v38  ;;  %160 = vrot.lane.b32.xlu0 %v4164_v0, %s4117_s24  ;;  %248 = vrot.lane.b32.xlu2 %v4194_v2, %s4110_s16  ;;  %v3403_v42 = vor.u32 %v3942_v37, %v3402_v39  ;;  %v3407_v43 = vor.u32 %v3939_v40, %v3404_v41 }
  0x8b   :  { %162 = vrot.lane.b32.xlu1 %v4169_v1, %s4117_s24 }
  0x8c   :  { %1327 = vmatpush.bf16.msra.mxu0 %v3403_v42  ;;  %1353 = vmatpush.bf16.msra.mxu2 %v3407_v43  ;;  %v4332_v45 = vpop.permute.xlu0 %690  ;;  %v4334_v46 = vpop.permute.xlu2 %336 }
  0x8d   :  { %v697_v48 = vrot.slane %v4332_v45, 4  ;;  %v365_v49 = vpop.permute.xlu1 %364 }
  0x8e   :  { %v372_v50 = vrot.slane %v365_v49, 4 }
  0x8f   :  { %v700_v51 = vsel %vm51_vm0, %v696_v47, %v697_v48 }
  0x90   :  { %v702_v52 = vsel %vm701_vm5, %v4276_v10, %v700_v51  ;;  %v376_v53 = vsel %vm51_vm0, %v372_v50, %v373_v44 }
  0x91   :  { %712 = vst [vmem:[#allocation2 + $0x284] sm:$0xff] %v702_v52  ;;  %v378_v54 = vsel %vm5945_vm6, %v365_v49, %v376_v53  ;;  %v3514_v62 = vld [vmem:[#allocation2 + $0x268] sm:$0xf]  ;;  %v3967_v8 = vld [vmem:[#allocation2 + $0x26c] sm:$0xf] }
  0x92   :  { %388 = vst [vmem:[#allocation2 + $0x150] sm:$0xff] %v378_v54  ;;  %276 = vrot.lane.b32.xlu0 %v4194_v2, %s4111_s17  ;;  %398 = vrot.lane.b32.xlu2 %v4248_v3, %s4104_s10 }
  0x93   :  { %370 = vrot.lane.b32.xlu1 %v4248_v3, %s4102_s8 }
  0x94   :  { %v4353_v55 = vpop.permute.xlu2 %460  ;;  %v393_v56 = vpop.permute.xlu0 %392 }
  0x95   :  { %v466_v57 = vrot.slane %v4353_v55, 4  ;;  %v400_v58 = vrot.slane %v393_v56, 4  ;;  %v4356_v59 = vpop.permute.xlu1 %394 }
  0x96   :  { %v401_v60 = vrot.slane %v4356_v59, 4 }
  0x97   :  { %v471_v61 = vsel %vm51_vm0, %v465_v7, %v466_v57 }
  0x98   :  { %v472_v63 = vsel %vm5943_vm1, %v4263_v6, %v471_v61  ;;  %v404_v4 = vsel %vm51_vm0, %v400_v58, %v401_v60  ;;  %v3970_v5 = vld [vmem:[#allocation2 + $0x280] sm:$0xf0]  ;;  %v3516_v9 = vld [vmem:[#allocation2 + $0x284] sm:$0xf0]  ;;  %v641_v6 = vrot.slane %v4314_v30, 4 }
  0x99   :  { %481 = vst [vmem:[#allocation2 + $0x1ac] sm:$0xff] %v472_v63  ;;  %v406_v10 = vsel %vm5942_vm7, %v393_v56, %v404_v4  ;;  %v3515_v11 = vor.u32 %v3970_v5, %v3514_v62  ;;  %v3519_v13 = vor.u32 %v3967_v8, %v3516_v9  ;;  %v3374_v27 = vld [vmem:[#allocation2 + $0x150] sm:$0xf]  ;;  %v3932_v28 = vld [vmem:[#allocation2 + $0x154] sm:$0xf]  ;;  %v344_v56 = vrot.slane %v4334_v46, 4 }
  0x9a   :  { %416 = vst [vmem:[#allocation2 + $0x16c] sm:$0xff] %v406_v10  ;;  %608 = vrot.lane.b32.xlu0 %v4194_v2, %s4103_s9  ;;  %68 = vrot.lane.b32.xlu2 %v4164_v0, %s4118_s30 }
  0x9b   :  { %636 = vrot.lane.b32.xlu1 %v4194_v2, %s4105_s11  ;;  %1344 = vmatpush.bf16.msra.mxu1 %v3515_v11 }
  0x9c   :  { %1370 = vmatpush.bf16.msra.mxu3 %v3519_v13  ;;  %v4377_v7 = vpop.permute.xlu2 %568  ;;  %v4379_v16 = vpop.permute.xlu0 %606 }
  0x9d   :  { %v613_v21 = vrot.slane %v4379_v16, 4  ;;  %v633_v22 = vpop.permute.xlu1 %632 }
  0x9e   :  { %v640_v23 = vrot.slane %v633_v22, 4 }
  0x9f   :  { %v616_v24 = vsel %vm51_vm0, %v612_v19, %v613_v21 }
  0xa0   :  { %v618_v25 = vsel %vm617_vm8, %v4294_v15, %v616_v24  ;;  %v644_v26 = vsel %vm51_vm0, %v640_v23, %v641_v6 }
  0xa1   :  { %628 = vst [vmem:[#allocation2 + $0x230] sm:$0xff] %v618_v25  ;;  %v646_v29 = vsel %vm645_vm9, %v633_v22, %v644_v26  ;;  %v3935_v31 = vld [vmem:[#allocation2 + $0x168] sm:$0xf0]  ;;  %v3376_v33 = vld [vmem:[#allocation2 + $0x16c] sm:$0xf0] }
  0xa2   :  { %656 = vst [vmem:[#allocation2 + $0x24c] sm:$0xff] %v646_v29  ;;  %70 = vrot.lane.b32.xlu0 %v4169_v1, %s4118_s30  ;;  %98 = vrot.lane.b32.xlu2 %v4169_v1, %s4119_s7  ;;  %v3375_v15 = vor.u32 %v3935_v31, %v3374_v27  ;;  %v3379_v34 = vor.u32 %v3932_v28, %v3376_v33  ;;  %v576_v29 = vrot.slane %v4377_v7, 4 }
  0xa3   :  { %96 = vrot.lane.b32.xlu1 %v4164_v0, %s4119_s7 }
  0xa4   :  { %1328 = vmatpush.bf16.msra.mxu0 %v3375_v15  ;;  %1354 = vmatpush.bf16.msra.mxu2 %v3379_v34  ;;  %v309_v36 = vpop.permute.xlu0 %308  ;;  %v4398_v37 = vpop.permute.xlu2 %244 }
  0xa5   :  { %v316_v38 = vrot.slane %v309_v36, 4  ;;  %v4400_v39 = vpop.permute.xlu1 %310 }
  0xa6   :  { %v317_v40 = vrot.slane %v4400_v39, 4 }
  0xa8   :  { %v320_v41 = vsel %vm51_vm0, %v316_v38, %v317_v40  ;;  %v3486_v42 = vld [vmem:[#allocation2 + $0x230] sm:$0xf]  ;;  %v3960_v43 = vld [vmem:[#allocation2 + $0x234] sm:$0xf]  ;;  %v252_v38 = vrot.slane %v4398_v37, 4 }
  0xa9   :  { %v322_v47 = vsel %vm5944_vm10, %v309_v36, %v320_v41  ;;  %v3963_v49 = vld [vmem:[#allocation2 + $0x248] sm:$0xf0]  ;;  %v3488_v50 = vld [vmem:[#allocation2 + $0x24c] sm:$0xf0] }
  0xaa   :  { %332 = vst [vmem:[#allocation2 + $0x118] sm:$0xff] %v322_v47  ;;  %192 = vrot.lane.b32.xlu0 %v4194_v2, %s4114_s0  ;;  %314 = vrot.lane.b32.xlu2 %v4248_v3, %s4107_s13  ;;  %v3487_v51 = vor.u32 %v3963_v49, %v3486_v42  ;;  %v3491_v52 = vor.u32 %v3960_v43, %v3488_v50 }
  0xab   :  { %220 = vrot.lane.b32.xlu1 %v4194_v2, %s4115_s22 }
  0xac   :  { %1345 = vmatpush.bf16.msra.mxu1 %v3487_v51  ;;  %1371 = vmatpush.bf16.msra.mxu3 %v3491_v52  ;;  %v4413_v53 = vpop.permute.xlu0 %338  ;;  %v4415_v54 = vpop.permute.xlu2 %274 }
  0xad   :  { %v345_v58 = vrot.slane %v4413_v53, 4  ;;  %v4419_v61 = vpop.permute.xlu1 %424  ;;  %v281_v15 = vrot.slane %v4415_v54, 4 }
  0xae   :  { %v430_v62 = vrot.slane %v4419_v61, 4 }
  0xaf   :  { %v348_v63 = vsel %vm51_vm0, %v344_v56, %v345_v58 }
  0xb0   :  { %v350_v4 = vsel %vm5939_vm11, %v4334_v46, %v348_v63  ;;  %v435_v5 = vsel %vm51_vm0, %v429_v20, %v430_v62 }
  0xb1   :  { %360 = vst [vmem:[#allocation2 + $0x134] sm:$0xff] %v350_v4  ;;  %v436_v8 = vsel %vm5947_vm3, %v4297_v18, %v435_v5  ;;  %v3346_v18 = vld [vmem:[#allocation2 + $0x118] sm:$0xf]  ;;  %v3925_v22 = vld [vmem:[#allocation2 + $0x11c] sm:$0xf] }
  0xb2   :  { %445 = vst [vmem:[#allocation2 + $0x190] sm:$0xff] %v436_v8  ;;  %342 = vrot.lane.b32.xlu0 %v4248_v3, %s4106_s12  ;;  %572 = vrot.lane.b32.xlu2 %v4194_v2, %s4108_s14 }
  0xb3   :  { %544 = vrot.lane.b32.xlu1 %v4194_v2, %s4109_s15 }
  0xb4   :  { %v541_v46 = vpop.permute.xlu0 %540  ;;  %v4440_v9 = vpop.permute.xlu2 %484 }
  0xb5   :  { %v548_v10 = vrot.slane %v541_v46, 4  ;;  %v4442_v11 = vpop.permute.xlu1 %542 }
  0xb6   :  { %v549_v20 = vrot.slane %v4442_v11, 4 }
  0xb8   :  { %v552_v13 = vsel %vm51_vm0, %v548_v10, %v549_v20  ;;  %v3928_v19 = vld [vmem:[#allocation2 + $0x130] sm:$0xf0]  ;;  %v3348_v23 = vld [vmem:[#allocation2 + $0x134] sm:$0xf0] }
  0xb9   :  { %v554_v24 = vsel %vm5938_vm12, %v541_v46, %v552_v13  ;;  %v3347_v25 = vor.u32 %v3928_v19, %v3346_v18  ;;  %v3351_v26 = vor.u32 %v3925_v22, %v3348_v23  ;;  %vm497_vm12 = vcmask 547840  }
  0xba   :  { %564 = vst [vmem:[#allocation2 + $0x1f8] sm:$0xff] %v554_v24  ;;  %39 = vrot.lane.b32.xlu0 %v4164_v0, %s5948_s18  ;;  %128 = vrot.lane.b32.xlu2 %v4194_v2, %s4116_s23 }
  0xbb   :  { %41 = vrot.lane.b32.xlu1 %v4169_v1, %s5948_s18  ;;  %1329 = vmatpush.bf16.msra.mxu0 %v3347_v25 }
  0xbc   :  { %1355 = vmatpush.bf16.msra.mxu2 %v3351_v26  ;;  %v4455_v27 = vpop.permute.xlu0 %570  ;;  %v4457_v28 = vpop.permute.xlu2 %514 }
  0xbd   :  { %v577_v31 = vrot.slane %v4455_v27, 4  ;;  %v4461_v33 = vpop.permute.xlu1 %720 }
  0xbf   :  { %v580_v0 = vsel %vm51_vm0, %v576_v29, %v577_v31 }
  0xc0   :  { %v582_v1 = vsel %vm581_vm13, %v4377_v7, %v580_v0 }
  0xc1   :  { %592 = vst [vmem:[#allocation2 + $0x214] sm:$0xff] %v582_v1  ;;  %v3458_v47 = vld [vmem:[#allocation2 + $0x1f8] sm:$0xf]  ;;  %v3953_v52 = vld [vmem:[#allocation2 + $0x1fc] sm:$0xf]  ;;  %v726_v1 = vrot.slane %v4461_v33, 4 }
  0xc2   :  { %164 = vrot.lane.b32.xlu0 %v4194_v2, %s4117_s24  ;;  %278 = vrot.lane.b32.xlu2 %v4248_v3, %s4111_s17 }
  0xc3   :  { %250 = vrot.lane.b32.xlu1 %v4248_v3, %s4110_s16 }
  0xc4   :  { %v4475_v34 = vpop.permute.xlu0 %246  ;;  %v4477_v36 = vpop.permute.xlu2 %216 }
  0xc5   :  { %v253_v7 = vrot.slane %v4475_v34, 4  ;;  %v273_v41 = vpop.permute.xlu1 %272 }
  0xc6   :  { %v280_v42 = vrot.slane %v273_v41, 4 }
  0xc7   :  { %v256_v43 = vsel %vm51_vm0, %v252_v38, %v253_v7 }
  0xc8   :  { %v258_v49 = vsel %vm257_vm14, %v4398_v37, %v256_v43  ;;  %v284_v50 = vsel %vm51_vm0, %v280_v42, %v281_v15  ;;  %v3956_v51 = vld [vmem:[#allocation2 + $0x210] sm:$0xf0]  ;;  %v3460_v56 = vld [vmem:[#allocation2 + $0x214] sm:$0xf0] }
  0xc9   :  { %268 = vst [vmem:[#allocation2 + $0xe0] sm:$0xff] %v258_v49  ;;  %v286_v63 = vsel %vm5946_vm15, %v273_v41, %v284_v50  ;;  %v3459_v4 = vor.u32 %v3956_v51, %v3458_v47  ;;  %v3463_v5 = vor.u32 %v3953_v52, %v3460_v56  ;;  %v492_v41 = vrot.slane %v4440_v9, 4 }
  0xca   :  { %296 = vst [vmem:[#allocation2 + $0xfc] sm:$0xff] %v286_v63  ;;  %488 = vrot.lane.b32.xlu0 %v4194_v2, %s4112_s20  ;;  %72 = vrot.lane.b32.xlu2 %v4194_v2, %s4118_s30  ;;  %v731_v49 = vsel %vm51_vm0, %v725_v17, %v726_v1 }
  0xcb   :  { %516 = vrot.lane.b32.xlu1 %v4194_v2, %s4113_s21  ;;  %1346 = vmatpush.bf16.msra.mxu1 %v3459_v4  ;;  %v4563_v4 = vsel %vm5941_vm2, %v4292_v14, %v731_v49  ;;  %vm229_vm2 = vcmask 867328  }
  0xcc   :  { %1372 = vmatpush.bf16.msra.mxu3 %v3463_v5  ;;  %v4496_v37 = vpop.permute.xlu0 %368  ;;  %v4498_v8 = vpop.permute.xlu2 %340  ;;  %v1121_v14 = vunpack.c.l.b16 %v4563_v4 }
  0xcd   :  { %v374_v46 = vrot.slane %v4496_v37, 4  ;;  %v4501_v10 = vpop.permute.xlu1 %396  ;;  %v346_v18 = vrot.slane %v4498_v8, 4 }
  0xce   :  { %v402_v13 = vrot.slane %v4501_v10, 4 }
  0xcf   :  { %v379_v19 = vsel %vm51_vm0, %v373_v44, %v374_v46  ;;  %v351_v22 = vsel %vm51_vm0, %v345_v58, %v346_v18 }
  0xd0   :  { %v380_v23 = vsel %vm5945_vm6, %v4284_v12, %v379_v19  ;;  %v407_v24 = vsel %vm51_vm0, %v401_v60, %v402_v13  ;;  %v352_v25 = vsel %vm5939_vm11, %v4413_v53, %v351_v22  ;;  %v3318_v26 = vld [vmem:[#allocation2 + $0xe0] sm:$0xf]  ;;  %v3918_v44 = vld [vmem:[#allocation2 + $0xe4] sm:$0xf]  ;;  %v521_v53 = vrot.slane %v4457_v28, 4 }
  0xd1   :  { %389 = vst [vmem:[#allocation2 + $0x158] sm:$0xff] %v380_v23  ;;  %v408_v29 = vsel %vm5942_vm7, %v4356_v59, %v407_v24  ;;  %v3921_v0 = vld [vmem:[#allocation2 + $0xf8] sm:$0xf0]  ;;  %v3320_v58 = vld [vmem:[#allocation2 + $0xfc] sm:$0xf0]  ;;  %vm525_vm11 = vcmask 539648  }
  0xd2   :  { %417 = vst [vmem:[#allocation2 + $0x174] sm:$0xff] %v408_v29  ;;  %100 = vrot.lane.b32.xlu0 %v4194_v2, %s4119_s7  ;;  %194 = vrot.lane.b32.xlu2 %v4248_v3, %s4114_s0  ;;  %v3319_v12 = vor.u32 %v3921_v0, %v3318_v26  ;;  %v3323_v60 = vor.u32 %v3918_v44, %v3320_v58  ;;  %v3410_v26 = vld [vmem:[#allocation2 + $0x190] sm:$0xf] }
  0xd3   :  { %361 = vst [vmem:[#allocation2 + $0x13c] sm:$0xff] %v352_v25  ;;  %722 = vrot.lane.b32.xlu1 %v4248_v3, %s4097_s25  ;;  %v1212_v44 = vpack.c.b16 %v1121_v14, %v1121_v14 }
  0xd4   :  { %1330 = vmatpush.bf16.msra.mxu0 %v3319_v12  ;;  %1356 = vmatpush.bf16.msra.mxu2 %v3323_v60  ;;  %v4534_v59 = vpop.permute.xlu0 %486  ;;  %v4536_v38 = vpop.permute.xlu2 %664  ;;  %v3943_v60 = vld [vmem:[#allocation2 + $0x1a8] sm:$0xf0] }
  0xd5   :  { %v493_v42 = vrot.slane %v4534_v59, 4  ;;  %v513_v43 = vpop.permute.xlu1 %512  ;;  %v670_v47 = vrot.slane %v4536_v38, 4  ;;  %v1313_v49 = vsel %vm51_vm0, %v1212_v44, 0 }
  0xd6   :  { %v520_v50 = vrot.slane %v513_v43, 4 }
  0xd7   :  { %v496_v51 = vsel %vm51_vm0, %v492_v41, %v493_v42  ;;  %v675_v52 = vsel %vm51_vm0, %v669_v35, %v670_v47  ;;  %v3411_v41 = vor.u32 %v3943_v60, %v3410_v26 }
  0xd8   :  { %v498_v56 = vsel %vm497_vm12, %v4440_v9, %v496_v51  ;;  %v524_v63 = vsel %vm51_vm0, %v520_v50, %v521_v53  ;;  %v676_v17 = vsel %vm5940_vm4, %v4316_v32, %v675_v52  ;;  %vm5951_vm4 = vcmask 875520   ;;  %v3382_v51 = vld [vmem:[#allocation2 + $0x158] sm:$0xf] }
  0xd9   :  { %508 = vst [vmem:[#allocation2 + $0x1c0] sm:$0xff] %v498_v56  ;;  %v526_v5 = vsel %vm525_vm11, %v513_v43, %v524_v63  ;;  %v3936_v52 = vld [vmem:[#allocation2 + $0x170] sm:$0xf0]  ;;  %v224_v56 = vrot.slane %v4477_v36, 4 }
  0xda   :  { %536 = vst [vmem:[#allocation2 + $0x1dc] sm:$0xff] %v526_v5  ;;  %222 = vrot.lane.b32.xlu0 %v4248_v3, %s4115_s22  ;;  %130 = vrot.lane.b32.xlu2 %v4248_v3, %s4116_s23 }
  0xdb   :  { %685 = vst [vmem:[#allocation2 + $0x270] sm:$0xff] %v676_v17  ;;  %43 = vrot.lane.b32.xlu1 %v4194_v2, %s5948_s18 }
  0xdc   :  { %v189_v35 = vpop.permute.xlu0 %188  ;;  %v4572_v32 = vpop.permute.xlu2 %126 }
  0xdd   :  { %v196_v9 = vrot.slane %v189_v35, 4  ;;  %v4575_v19 = vpop.permute.xlu1 %190 }
  0xde   :  { %v197_v22 = vrot.slane %v4575_v19, 4 }
  0xe0   :  { %v200_v23 = vsel %vm51_vm0, %v196_v9, %v197_v22  ;;  %v3430_v24 = vld [vmem:[#allocation2 + $0x1c0] sm:$0xf]  ;;  %v3946_v25 = vld [vmem:[#allocation2 + $0x1c4] sm:$0xf] }
  0xe1   :  { %v202_v2 = vsel %vm5951_vm4, %v189_v35, %v200_v23  ;;  %v3949_v29 = vld [vmem:[#allocation2 + $0x1d8] sm:$0xf0]  ;;  %v3432_v0 = vld [vmem:[#allocation2 + $0x1dc] sm:$0xf0]  ;;  %v3383_v23 = vor.u32 %v3936_v52, %v3382_v51 }
  0xe2   :  { %212 = vst [vmem:[#allocation2 + $0xa8] sm:$0xff] %v202_v2  ;;  %166 = vrot.lane.b32.xlu0 %v4248_v3, %s4117_s24  ;;  %694 = vrot.lane.b32.xlu2 %v4248_v3, %s4101_s29  ;;  %v3431_v58 = vor.u32 %v3949_v29, %v3430_v24  ;;  %v3435_v12 = vor.u32 %v3946_v25, %v3432_v0 }
  0xe3   :  { %666 = vrot.lane.b32.xlu1 %v4248_v3, %s4100_s28 }
  0xe4   :  { %1347 = vmatpush.bf16.msra.mxu1 %v3431_v58  ;;  %1373 = vmatpush.bf16.msra.mxu3 %v3435_v12  ;;  %v4588_v43 = vpop.permute.xlu0 %218  ;;  %v4591_v50 = vpop.permute.xlu2 %248 }
  0xe5   :  { %v225_v63 = vrot.slane %v4588_v43, 4  ;;  %v4595_v17 = vpop.permute.xlu1 %312  ;;  %v254_v5 = vrot.slane %v4591_v50, 4 }
  0xe6   :  { %v318_v35 = vrot.slane %v4595_v17, 4 }
  0xe7   :  { %v228_v14 = vsel %vm51_vm0, %v224_v56, %v225_v63  ;;  %v259_v9 = vsel %vm51_vm0, %v253_v7, %v254_v5 }
  0xe8   :  { %1379 = vmatpush.bf16.msrb.mxu1 %v3411_v41  ;;  %1395 = vmatpush.bf16.msrb.mxu3 %v1313_v49  ;;  %v230_v24 = vsel %vm229_vm2, %v4477_v36, %v228_v14  ;;  %v323_v25 = vsel %vm51_vm0, %v317_v40, %v318_v35  ;;  %v260_v26 = vsel %vm257_vm14, %v4475_v34, %v259_v9 }
  0xe9   :  { %240 = vst [vmem:[#allocation2 + $0xc4] sm:$0xff] %v230_v24  ;;  %v324_v44 = vsel %vm5944_vm10, %v4400_v39, %v323_v25  ;;  %v3290_v12 = vld [vmem:[#allocation2 + $0xa8] sm:$0xf]  ;;  %v3911_v60 = vld [vmem:[#allocation2 + $0xac] sm:$0xf] }
  0xea   :  { %333 = vst [vmem:[#allocation2 + $0x120] sm:$0xff] %v324_v44  ;;  %74 = vrot.lane.b32.xlu0 %v4248_v3, %s4118_s30  ;;  %610 = vrot.lane.b32.xlu2 %v4248_v3, %s4103_s9 }
  0xeb   :  { %269 = vst [vmem:[#allocation2 + $0xe8] sm:$0xff] %v260_v26  ;;  %102 = vrot.lane.b32.xlu1 %v4248_v3, %s4119_s7 }
  0xec   :  { %1380 = vmatpush.bf16.msrb.mxu1 %v3383_v23  ;;  %v427_v40 = vpop.permute.xlu0 %426  ;;  %v399_v36 = vpop.permute.xlu2 %398 }
  0xed   :  { %v431_v7 = vrot.slane %v427_v40, 4  ;;  %v463_v34 = vpop.permute.xlu1 %462  ;;  %v403_v2 = vrot.slane %v399_v36, 4 }
  0xee   :  { %v467_v29 = vrot.slane %v463_v34, 4 }
  0xef   :  { %v437_v39 = vsel %vm51_vm0, %v430_v62, %v431_v7  ;;  %v439_v0 = vsel %vm5947_vm3, %v427_v40, %v431_v7  ;;  %v409_v58 = vsel %vm51_vm0, %v402_v13, %v403_v2  ;;  %v411_v24 = vsel %vm5942_vm7, %v399_v36, %v403_v2 }
  0xf0   :  { %v438_v41 = vsel %vm5947_vm3, %v4419_v61, %v437_v39  ;;  %447 = vst [vmem:[#allocation2 + $0x1a0] sm:$0xf] %v439_v0  ;;  %v473_v49 = vsel %vm51_vm0, %v466_v57, %v467_v29  ;;  %v475_v51 = vsel %vm5943_vm1, %v463_v34, %v467_v29  ;;  %v3914_v52 = vld [vmem:[#allocation2 + $0xc0] sm:$0xf0]  ;;  %v3292_v62 = vld [vmem:[#allocation2 + $0xc4] sm:$0xf0]  ;;  %v410_v13 = vsel %vm5942_vm7, %v4501_v10, %v409_v58 }
  0xf1   :  { %446 = vst [vmem:[#allocation2 + $0x198] sm:$0xff] %v438_v41  ;;  %v474_v56 = vsel %vm5943_vm1, %v4353_v55, %v473_v49  ;;  %v3291_v14 = vor.u32 %v3914_v52, %v3290_v12  ;;  %v3295_v9 = vor.u32 %v3911_v60, %v3292_v62  ;;  %v3354_v23 = vld [vmem:[#allocation2 + $0x120] sm:$0xf]  ;;  %v3929_v61 = vld [vmem:[#allocation2 + $0x138] sm:$0xf0]  ;;  %v133_v55 = vrot.slane %v4572_v32, 4 }
  0xf2   :  { %482 = vst [vmem:[#allocation2 + $0x1b4] sm:$0xff] %v474_v56  ;;  %638 = vrot.lane.b32.xlu0 %v4248_v3, %s4105_s11  ;;  %546 = vrot.lane.b32.xlu2 %v4248_v3, %s4109_s15  ;;  %v3355_v57 = vor.u32 %v3929_v61, %v3354_v23  ;;  %vm5950_vm7 = vcmask 1014784   ;;  %vm173_vm1 = vcmask 883712   ;;  %v3522_v12 = vld [vmem:[#allocation2 + $0x270] sm:$0xf] }
  0xf3   :  { %483 = vst [vmem:[#allocation2 + $0x1bc] sm:$0xf] %v475_v51  ;;  %45 = vrot.lane.b32.xlu1 %v4248_v3, %s5948_s18  ;;  %1331 = vmatpush.bf16.msra.mxu0 %v3291_v14  ;;  %s4122_s18 = smov 1  }
  0xf4   :  { %418 = vst [vmem:[#allocation2 + $0x17c] sm:$0xff] %v410_v13  ;;  %1357 = vmatpush.bf16.msra.mxu2 %v3295_v9  ;;  %1381 = vmatpush.bf16.msrb.mxu1 %v3355_v57  ;;  %v4649_v10 = vpop.permute.xlu0 %692  ;;  %v4651_v25 = vpop.permute.xlu2 %68 }
  0xf5   :  { %419 = vst [vmem:[#allocation2 + $0x184] sm:$0xf] %v411_v24  ;;  %v698_v26 = vrot.slane %v4649_v10, 4  ;;  %v125_v44 = vpop.permute.xlu1 %124 }
  0xf6   :  { %v132_v40 = vrot.slane %v125_v44, 4 }
  0xf7   :  { %v703_v36 = vsel %vm51_vm0, %v697_v48, %v698_v26 }
  0xf8   :  { %v704_v7 = vsel %vm701_vm5, %v4332_v45, %v703_v36  ;;  %v136_v34 = vsel %vm51_vm0, %v132_v40, %v133_v55 }
  0xf9   :  { %713 = vst [vmem:[#allocation2 + $0x28c] sm:$0xff] %v704_v7  ;;  %v138_v2 = vsel %vm5950_vm7, %v125_v44, %v136_v34 }
  0xfa   :  { %148 = vst [vmem:[#allocation2 + $0x70] sm:$0xff] %v138_v2  ;;  %574 = vrot.lane.b32.xlu0 %v4248_v3, %s4108_s14  ;;  %518 = vrot.lane.b32.xlu2 %v4248_v3, %s4113_s21 }
  0xfb   :  { %490 = vrot.lane.b32.xlu1 %v4248_v3, %s4112_s20 }
  0xfc   :  { %v161_v48 = vpop.permute.xlu0 %160  ;;  %v4671_v29 = vpop.permute.xlu2 %98 }
  0xfd   :  { %v168_v45 = vrot.slane %v161_v48, 4  ;;  %v4673_v39 = vpop.permute.xlu1 %162 }
  0xfe   :  { %v169_v0 = vrot.slane %v4673_v39, 4 }
 0x100   :  { %v172_v58 = vsel %vm51_vm0, %v168_v45, %v169_v0  ;;  %v3971_v60 = vld [vmem:[#allocation2 + $0x288] sm:$0xf0] }
 0x101   :  { %v174_v41 = vsel %vm173_vm1, %v161_v48, %v172_v58  ;;  %v3523_v49 = vor.u32 %v3971_v60, %v3522_v12  ;;  %v3262_v44 = vld [vmem:[#allocation2 + $0x70] sm:$0xf]  ;;  %v3904_v40 = vld [vmem:[#allocation2 + $0x74] sm:$0xf] }
 0x102   :  { %184 = vst [vmem:[#allocation2 + $0x8c] sm:$0xff] %v174_v41 }
 0x103   :  { %1396 = vmatpush.bf16.msrb.mxu3 %v3523_v49 }
 0x104   :  { %v4680_v3 = vpop.permute.xlu0 %276  ;;  %v315_v51 = vpop.permute.xlu2 %314 }
 0x105   :  { %v282_v52 = vrot.slane %v4680_v3, 4  ;;  %v319_v62 = vrot.slane %v315_v51, 4  ;;  %v371_v56 = vpop.permute.xlu1 %370 }
 0x106   :  { %v375_v13 = vrot.slane %v371_v56, 4 }
 0x107   :  { %v287_v14 = vsel %vm51_vm0, %v281_v15, %v282_v52  ;;  %v325_v9 = vsel %vm51_vm0, %v318_v35, %v319_v62  ;;  %v327_v23 = vsel %vm5944_vm10, %v315_v51, %v319_v62  ;;  %v3326_v51 = vld [vmem:[#allocation2 + $0xe8] sm:$0xf] }
 0x108   :  { %v288_v61 = vsel %vm5946_vm15, %v4415_v54, %v287_v14  ;;  %v326_v24 = vsel %vm5944_vm10, %v4595_v17, %v325_v9  ;;  %335 = vst [vmem:[#allocation2 + $0x130] sm:$0xf] %v327_v23  ;;  %v381_v57 = vsel %vm51_vm0, %v374_v46, %v375_v13  ;;  %v383_v35 = vsel %vm5945_vm6, %v371_v56, %v375_v13 }
 0x109   :  { %297 = vst [vmem:[#allocation2 + $0x104] sm:$0xff] %v288_v61  ;;  %v382_v15 = vsel %vm5945_vm6, %v4496_v37, %v381_v57  ;;  %v3907_v36 = vld [vmem:[#allocation2 + $0x88] sm:$0xf0]  ;;  %v3264_v7 = vld [vmem:[#allocation2 + $0x8c] sm:$0xf0]  ;;  %v76_v13 = vrot.slane %v4651_v25, 4 }
 0x10a   :  { %334 = vst [vmem:[#allocation2 + $0x128] sm:$0xff] %v326_v24  ;;  %v3263_v54 = vor.u32 %v3907_v36, %v3262_v44  ;;  %v3267_v34 = vor.u32 %v3904_v40, %v3264_v7  ;;  %vm81_vm10 = vcmask 1031168   ;;  %vm109_vm6 = vcmask 1022976  }
 0x10b   :  { %390 = vst [vmem:[#allocation2 + $0x160] sm:$0xff] %v382_v15 }
 0x10c   :  { %391 = vst [vmem:[#allocation2 + $0x168] sm:$0xf] %v383_v35  ;;  %1332 = vmatpush.bf16.msra.mxu0 %v3263_v54  ;;  %1358 = vmatpush.bf16.msra.mxu2 %v3267_v34  ;;  %v4702_v17 = vpop.permute.xlu0 %608  ;;  %v4704_v46 = vpop.permute.xlu2 %572 }
 0x10d   :  { %v614_v2 = vrot.slane %v4702_v17, 4  ;;  %v578_v48 = vrot.slane %v4704_v46, 4  ;;  %v4708_v37 = vpop.permute.xlu1 %636 }
 0x10e   :  { %v642_v45 = vrot.slane %v4708_v37, 4 }
 0x10f   :  { %v619_v58 = vsel %vm51_vm0, %v613_v21, %v614_v2  ;;  %v583_v12 = vsel %vm51_vm0, %v577_v31, %v578_v48 }
 0x110   :  { %v620_v60 = vsel %vm617_vm8, %v4379_v16, %v619_v58  ;;  %v584_v41 = vsel %vm581_vm13, %v4455_v27, %v583_v12  ;;  %v647_v49 = vsel %vm51_vm0, %v641_v6, %v642_v45  ;;  %v3922_v21 = vld [vmem:[#allocation2 + $0x100] sm:$0xf0]  ;;  %v105_v16 = vrot.slane %v4671_v29, 4 }
 0x111   :  { %629 = vst [vmem:[#allocation2 + $0x238] sm:$0xff] %v620_v60  ;;  %v648_v62 = vsel %vm645_vm9, %v4314_v30, %v647_v49  ;;  %v3327_v56 = vor.u32 %v3922_v21, %v3326_v51 }
 0x112   :  { %593 = vst [vmem:[#allocation2 + $0x21c] sm:$0xff] %v584_v41 }
 0x113   :  { %657 = vst [vmem:[#allocation2 + $0x254] sm:$0xff] %v648_v62  ;;  %1382 = vmatpush.bf16.msrb.mxu1 %v3327_v56 }
 0x114   :  { %v71_v31 = vpop.permute.xlu0 %70  ;;  %v4733_v27 = vpop.permute.xlu2 %128 }
 0x115   :  { %v77_v14 = vrot.slane %v71_v31, 4  ;;  %v134_v6 = vrot.slane %v4733_v27, 4  ;;  %v97_v9 = vpop.permute.xlu1 %96 }
 0x116   :  { %v104_v23 = vrot.slane %v97_v9, 4 }
 0x117   :  { %v80_v30 = vsel %vm51_vm0, %v76_v13, %v77_v14  ;;  %v139_v61 = vsel %vm51_vm0, %v133_v55, %v134_v6 }
 0x118   :  { %v82_v24 = vsel %vm81_vm10, %v4651_v25, %v80_v30  ;;  %v140_v57 = vsel %vm5950_vm7, %v4572_v32, %v139_v61  ;;  %v108_v44 = vsel %vm51_vm0, %v104_v23, %v105_v16  ;;  %v3494_v40 = vld [vmem:[#allocation2 + $0x238] sm:$0xf] }
 0x119   :  { %92 = vst [vmem:[#allocation2 + $0x38] sm:$0xff] %v82_v24  ;;  %v110_v15 = vsel %vm109_vm6, %v97_v9, %v108_v44 }
 0x11a   :  { %149 = vst [vmem:[#allocation2 + $0x78] sm:$0xff] %v140_v57  ;;  %v3964_v35 = vld [vmem:[#allocation2 + $0x250] sm:$0xf0] }
 0x11b   :  { %120 = vst [vmem:[#allocation2 + $0x54] sm:$0xff] %v110_v15  ;;  %v3495_v36 = vor.u32 %v3964_v35, %v3494_v40 }
 0x11c   :  { %v4751_v7 = vpop.permute.xlu0 %192  ;;  %v279_v55 = vpop.permute.xlu2 %278 }
 0x11d   :  { %1397 = vmatpush.bf16.msrb.mxu3 %v3495_v36  ;;  %v198_v25 = vrot.slane %v4751_v7, 4  ;;  %v283_v54 = vrot.slane %v279_v55, 4  ;;  %v4754_v32 = vpop.permute.xlu1 %220 }
 0x11e   :  { %v226_v34 = vrot.slane %v4754_v32, 4 }
 0x11f   :  { %v203_v58 = vsel %vm51_vm0, %v197_v22, %v198_v25  ;;  %v289_v12 = vsel %vm51_vm0, %v282_v52, %v283_v54  ;;  %v291_v60 = vsel %vm5946_vm15, %v279_v55, %v283_v54 }
 0x120   :  { %v204_v41 = vsel %vm5951_vm4, %v4575_v19, %v203_v58  ;;  %v290_v49 = vsel %vm5946_vm15, %v4680_v3, %v289_v12  ;;  %299 = vst [vmem:[#allocation2 + $0x114] sm:$0xf] %v291_v60  ;;  %v231_v51 = vsel %vm51_vm0, %v225_v63, %v226_v34  ;;  %v3234_v22 = vld [vmem:[#allocation2 + $0x38] sm:$0xf]  ;;  %v3897_v21 = vld [vmem:[#allocation2 + $0x3c] sm:$0xf] }
 0x121   :  { %213 = vst [vmem:[#allocation2 + $0xb0] sm:$0xff] %v204_v41  ;;  %v232_v52 = vsel %vm229_vm2, %v4588_v43, %v231_v51  ;;  %vm5958_vm15 = vcmask 711680  }
 0x122   :  { %298 = vst [vmem:[#allocation2 + $0x10c] sm:$0xff] %v290_v49  ;;  %v3900_v62 = vld [vmem:[#allocation2 + $0x50] sm:$0xf0]  ;;  %v3236_v56 = vld [vmem:[#allocation2 + $0x54] sm:$0xf0]  ;;  %vm5959_vm3 = vmmov %vm5958_vm15 }
 0x123   :  { %241 = vst [vmem:[#allocation2 + $0xcc] sm:$0xff] %v232_v52  ;;  %v3235_v19 = vor.u32 %v3900_v62, %v3234_v22  ;;  %v3239_v13 = vor.u32 %v3897_v21, %v3236_v56  ;;  %v3957_v52 = vld [vmem:[#allocation2 + $0x218] sm:$0xf0] }
 0x124   :  { %v343_v3 = vpop.permute.xlu0 %342  ;;  %v4775_v9 = vpop.permute.xlu2 %72 }
 0x125   :  { %1333 = vmatpush.bf16.msra.mxu0 %v3235_v19  ;;  %1359 = vmatpush.bf16.msra.mxu2 %v3239_v13  ;;  %v347_v23 = vrot.slane %v343_v3, 4  ;;  %v78_v63 = vrot.slane %v4775_v9, 4  ;;  %v4778_v30 = vpop.permute.xlu1 %544  ;;  %v1122_v13 = vunpack.c.h.b16 %v4563_v4  ;;  %v3890_v4 = vld [vmem:[#allocation2 + $0x4] sm:$0xf] }
 0x126   :  { %v550_v61 = vrot.slane %v4778_v30, 4 }
 0x127   :  { %v353_v43 = vsel %vm51_vm0, %v346_v18, %v347_v23  ;;  %v355_v24 = vsel %vm5958_vm15, %v343_v3, %v347_v23  ;;  %v83_v57 = vsel %vm51_vm0, %v77_v14, %v78_v63  ;;  %vm5960_vm15 = vcmask 531456  }
 0x128   :  { %v354_v44 = vsel %vm5959_vm3, %v4498_v8, %v353_v43  ;;  %363 = vst [vmem:[#allocation2 + $0x14c] sm:$0xf] %v355_v24  ;;  %v84_v40 = vsel %vm81_vm10, %v71_v31, %v83_v57  ;;  %v555_v15 = vsel %vm51_vm0, %v549_v20, %v550_v61  ;;  %v3298_v35 = vld [vmem:[#allocation2 + $0xb0] sm:$0xf]  ;;  %v744_v8 = vld [vmem:[%s5932_s3] sm:$0xff]  ;;  %vm5952_vm3 = vcmask 588800  }
 0x129   :  { %362 = vst [vmem:[#allocation2 + $0x144] sm:$0xff] %v354_v44  ;;  %v556_v18 = vsel %vm5960_vm15, %v4442_v11, %v555_v15  ;;  %v847_v31 = vunpack.c.h.b16 %v744_v8  ;;  %vm53_vm15 = vcmask 1039360   ;;  %v846_v15 = vunpack.c.l.b16 %v744_v8 }
 0x12a   :  { %93 = vst [vmem:[#allocation2 + $0x40] sm:$0xff] %v84_v40  ;;  %v3915_v36 = vld [vmem:[#allocation2 + $0xc8] sm:$0xf0]  ;;  %v3206_v40 = vld [vmem:[#allocation2] sm:$0xf] }
 0x12b   :  { %565 = vst [vmem:[#allocation2 + $0x200] sm:$0xff] %v556_v18  ;;  %v3299_v14 = vor.u32 %v3915_v36, %v3298_v35  ;;  %v4803_v60 = vpack.c.b16 %v847_v31, %v847_v31  ;;  %v3940_v36 = vld [vmem:[#allocation2 + $0x194] sm:$0xf] }
 0x12c   :  { %v40_v55 = vpop.permute.xlu0 %39  ;;  %v195_v54 = vpop.permute.xlu2 %194 }
 0x12d   :  { %1383 = vmatpush.bf16.msrb.mxu1 %v3299_v14  ;;  %v47_v58 = vrot.slane %v40_v55, 4  ;;  %v199_v12 = vrot.slane %v195_v54, 4  ;;  %v4801_v20 = vpop.permute.xlu1 %41  ;;  %3541 = vmatmul.msk.bf16.vlgmr.msra.gmra.mxu3 %vm5952_vm3, %v4803_v60  ;;  %v1213_v14 = vpack.c.b16 %v1122_v13, %v1122_v13 }
 0x12e   :  { %v48_v11 = vrot.slane %v4801_v20, 4  ;;  %3540 = vmatmul.msk.bf16.vlgmr.msra.gmra.mxu1 %vm5952_vm3, %v4803_v60 }
 0x12f   :  { %v205_v41 = vsel %vm51_vm0, %v198_v25, %v199_v12  ;;  %v207_v49 = vsel %vm5951_vm4, %v195_v54, %v199_v12 }
 0x130   :  { %v206_v51 = vsel %vm5951_vm4, %v4751_v7, %v205_v41  ;;  %215 = vst [vmem:[#allocation2 + $0xc0] sm:$0xf] %v207_v49  ;;  %v52_v22 = vsel %vm51_vm0, %v47_v58, %v48_v11  ;;  %v3412_v58 = vld [vmem:[#allocation2 + $0x1ac] sm:$0xf0]  ;;  %v3384_v41 = vld [vmem:[#allocation2 + $0x174] sm:$0xf0] }
 0x131   :  { %214 = vst [vmem:[#allocation2 + $0xb8] sm:$0xff] %v206_v51  ;;  %v54_v21 = vsel %vm53_vm15, %v40_v55, %v52_v22  ;;  %v3415_v12 = vor.u32 %v3940_v36, %v3412_v58  ;;  %v3524_v49 = vld [vmem:[#allocation2 + $0x28c] sm:$0xf0]  ;;  %v1316_v22 = vsel %vm51_vm0, %v1213_v14, 0  ;;  %v3328_v14 = vld [vmem:[#allocation2 + $0x104] sm:$0xf0] }
 0x132   :  { %64 = vst [vmem:[#allocation2 + $0x1c] sm:$0xff] %v54_v21  ;;  %v3466_v25 = vld [vmem:[#allocation2 + $0x200] sm:$0xf] }
 0x133   :  { %v3467_v62 = vor.u32 %v3957_v52, %v3466_v25 }
 0x134   :  { %v4818_v56 = vpop.permute.xlu0 %164  ;;  %v131_v19 = vpop.permute.xlu2 %130 }
 0x135   :  { %1398 = vmatpush.bf16.msrb.mxu3 %v3467_v62  ;;  %v170_v7 = vrot.slane %v4818_v56, 4  ;;  %v135_v3 = vrot.slane %v131_v19, 4  ;;  %v251_v23 = vpop.permute.xlu1 %250  ;;  %v3968_v62 = vld [vmem:[#allocation2 + $0x274] sm:$0xf] }
 0x136   :  { %v255_v43 = vrot.slane %v251_v23, 4 }
 0x137   :  { %v175_v24 = vsel %vm51_vm0, %v169_v0, %v170_v7  ;;  %v141_v57 = vsel %vm51_vm0, %v134_v6, %v135_v3  ;;  %v143_v44 = vsel %vm5950_vm7, %v131_v19, %v135_v3  ;;  %v3527_v3 = vor.u32 %v3968_v62, %v3524_v49  ;;  %v3912_v62 = vld [vmem:[#allocation2 + $0xb4] sm:$0xf] }
 0x138   :  { %v176_v35 = vsel %vm173_vm1, %v4673_v39, %v175_v24  ;;  %v142_v18 = vsel %vm5950_vm7, %v4733_v27, %v141_v57  ;;  %151 = vst [vmem:[#allocation2 + $0x88] sm:$0xf] %v143_v44  ;;  %v261_v0 = vsel %vm51_vm0, %v254_v5, %v255_v43  ;;  %v263_v31 = vsel %vm257_vm14, %v251_v23, %v255_v43  ;;  %v3933_v27 = vld [vmem:[#allocation2 + $0x15c] sm:$0xf]  ;;  %v3926_v57 = vld [vmem:[#allocation2 + $0x124] sm:$0xf] }
 0x139   :  { %185 = vst [vmem:[#allocation2 + $0x94] sm:$0xff] %v176_v35  ;;  %v262_v6 = vsel %vm257_vm14, %v4591_v50, %v261_v0  ;;  %v3893_v8 = vld [vmem:[#allocation2 + $0x18] sm:$0xf0]  ;;  %v3208_v55 = vld [vmem:[#allocation2 + $0x1c] sm:$0xf0]  ;;  %v4841_v5 = vpack.c.b16 %v846_v15, %v846_v15  ;;  %v3387_v13 = vor.u32 %v3933_v27, %v3384_v41  ;;  %vm5961_vm7 = vcmask 359424  }
 0x13a   :  { %150 = vst [vmem:[#allocation2 + $0x80] sm:$0xff] %v142_v18  ;;  %v3207_v39 = vor.u32 %v3893_v8, %v3206_v40  ;;  %v3211_v54 = vor.u32 %v3890_v4, %v3208_v55  ;;  %v3961_v44 = vld [vmem:[#allocation2 + $0x23c] sm:$0xf]  ;;  %v3496_v40 = vld [vmem:[#allocation2 + $0x254] sm:$0xf0] }
 0x13b   :  { %270 = vst [vmem:[#allocation2 + $0xf0] sm:$0xff] %v262_v6  ;;  %v3499_v36 = vor.u32 %v3961_v44, %v3496_v40  ;;  %v3468_v27 = vld [vmem:[#allocation2 + $0x21c] sm:$0xf0] }
 0x13c   :  { %271 = vst [vmem:[#allocation2 + $0xf8] sm:$0xf] %v263_v31  ;;  %1334 = vmatpush.bf16.msra.mxu0 %v3207_v39  ;;  %1360 = vmatpush.bf16.msra.mxu2 %v3211_v54  ;;  %v4843_v51 = vpop.permute.xlu0 %488  ;;  %v695_v50 = vpop.permute.xlu2 %694  ;;  %v3390_v44 = vld [vmem:[#allocation2 + $0x160] sm:$0xf] }
 0x13d   :  { %v494_v21 = vrot.slane %v4843_v51, 4  ;;  %v699_v25 = vrot.slane %v695_v50, 4  ;;  %v4847_v52 = vpop.permute.xlu1 %516 }
 0x13e   :  { %v522_v19 = vrot.slane %v4847_v52, 4 }
 0x13f   :  { %v499_v23 = vsel %vm51_vm0, %v493_v42, %v494_v21  ;;  %v705_v43 = vsel %vm51_vm0, %v698_v26, %v699_v25  ;;  %v707_v24 = vsel %vm701_vm5, %v695_v50, %v699_v25  ;;  %1361 = vmatmul.bf16.vlgmr.msra.gmra.mxu2 %v4841_v5  ;;  %1335 = vmatmul.bf16.vlgmr.msra.gmra.mxu0 %v4841_v5  ;;  %v3270_v26 = vld [vmem:[#allocation2 + $0x78] sm:$0xf]  ;;  %v3944_v25 = vld [vmem:[#allocation2 + $0x1b0] sm:$0xf0] }
 0x140   :  { %1405 = vmatpush.bf16.msrb.mxu0 %v3415_v12  ;;  %1421 = vmatpush.bf16.msrb.mxu2 %v1316_v22  ;;  %v500_v4 = vsel %vm497_vm12, %v4534_v59, %v499_v23  ;;  %v706_v15 = vsel %vm701_vm5, %v4649_v10, %v705_v43  ;;  %715 = vst [vmem:[#allocation2 + $0x29c] sm:$0xf] %v707_v24  ;;  %v3908_v35 = vld [vmem:[#allocation2 + $0x90] sm:$0xf0]  ;;  %v3356_v59 = vld [vmem:[#allocation2 + $0x13c] sm:$0xf0] }
 0x141   :  { %v527_v42 = vsel %vm51_vm0, %v521_v53, %v522_v19  ;;  %509 = vst [vmem:[#allocation2 + $0x1c8] sm:$0xff] %v500_v4  ;;  %v3271_v0 = vor.u32 %v3908_v35, %v3270_v26  ;;  %v3359_v10 = vor.u32 %v3926_v57, %v3356_v59  ;;  %v3954_v53 = vld [vmem:[#allocation2 + $0x204] sm:$0xf]  ;;  %v3418_v22 = vld [vmem:[#allocation2 + $0x198] sm:$0xf] }
 0x142   :  { %v528_v18 = vsel %vm525_vm11, %v4457_v28, %v527_v42  ;;  %714 = vst [vmem:[#allocation2 + $0x294] sm:$0xff] %v706_v15  ;;  %v3919_v28 = vld [vmem:[#allocation2 + $0xec] sm:$0xf]  ;;  %v3471_v50 = vor.u32 %v3954_v53, %v3468_v27  ;;  %v3941_v57 = vld [vmem:[#allocation2 + $0x19c] sm:$0xf] }
 0x143   :  { %537 = vst [vmem:[#allocation2 + $0x1e4] sm:$0xff] %v528_v18  ;;  %1384 = vmatpush.bf16.msrb.mxu1 %v3271_v0  ;;  %v3331_v58 = vor.u32 %v3919_v28, %v3328_v14  ;;  %v3272_v26 = vld [vmem:[#allocation2 + $0x94] sm:$0xf0]  ;;  %v3419_v0 = vor.u32 %v3944_v25, %v3418_v22  ;;  %v3937_v59 = vld [vmem:[#allocation2 + $0x178] sm:$0xf0] }
 0x144   :  { %1406 = vmatpush.bf16.msrb.mxu0 %v3387_v13  ;;  %1422 = vmatpush.bf16.msrb.mxu2 %v3527_v3  ;;  %v4872_v6 = vpop.permute.xlu0 %100  ;;  %v611_v31 = vpop.permute.xlu2 %610  ;;  %v3300_v13 = vld [vmem:[#allocation2 + $0xcc] sm:$0xf0]  ;;  %v3905_v53 = vld [vmem:[#allocation2 + $0x7c] sm:$0xf] }
 0x145   :  { %v106_v8 = vrot.slane %v4872_v6, 4  ;;  %v615_v55 = vrot.slane %v611_v31, 4  ;;  %v723_v39 = vpop.permute.xlu1 %722  ;;  %v3275_v27 = vor.u32 %v3905_v53, %v3272_v26 }
 0x146   :  { %v727_v54 = vrot.slane %v723_v39, 4 }
 0x147   :  { %v111_v12 = vsel %vm51_vm0, %v105_v16, %v106_v8  ;;  %v621_v41 = vsel %vm51_vm0, %v614_v2, %v615_v55  ;;  %v623_v49 = vsel %vm617_vm8, %v611_v31, %v615_v55  ;;  %v3420_v2 = vld [vmem:[#allocation2 + $0x1b4] sm:$0xf0]  ;;  %v3391_v55 = vor.u32 %v3937_v59, %v3390_v44  ;;  %v3927_v44 = vld [vmem:[#allocation2 + $0x12c] sm:$0xf] }
 0x148   :  { %1407 = vmatpush.bf16.msrb.mxu0 %v3359_v10  ;;  %1423 = vmatpush.bf16.msrb.mxu2 %v3499_v36  ;;  %v112_v3 = vsel %vm109_vm6, %v4671_v29, %v111_v12  ;;  %v622_v23 = vsel %vm617_vm8, %v4702_v17, %v621_v41  ;;  %631 = vst [vmem:[#allocation2 + $0x248] sm:$0xf] %v623_v49  ;;  %v3438_v43 = vld [vmem:[#allocation2 + $0x1c8] sm:$0xf]  ;;  %v3947_v24 = vld [vmem:[#allocation2 + $0x1cc] sm:$0xf] }
 0x149   :  { %v735_v16 = vsel %vm5961_vm7, %v723_v39, %v727_v54  ;;  %121 = vst [vmem:[#allocation2 + $0x5c] sm:$0xff] %v112_v3  ;;  %v3303_v29 = vor.u32 %v3912_v62, %v3300_v13  ;;  %v3934_v17 = vld [vmem:[#allocation2 + $0x164] sm:$0xf]  ;;  %v3423_v31 = vor.u32 %v3941_v57, %v3420_v2  ;;  %v3392_v39 = vld [vmem:[#allocation2 + $0x17c] sm:$0xf0]  ;;  %v733_v28 = vsel %vm51_vm0, %v726_v1, %v727_v54 }
 0x14a   :  { %630 = vst [vmem:[#allocation2 + $0x240] sm:$0xff] %v622_v23  ;;  %v3950_v40 = vld [vmem:[#allocation2 + $0x1e0] sm:$0xf0]  ;;  %v3440_v4 = vld [vmem:[#allocation2 + $0x1e4] sm:$0xf0]  ;;  %v3395_v12 = vor.u32 %v3934_v17, %v3392_v39  ;;  %vm5962_vm7 = vcmask 531456  }
 0x14b   :  { %743 = vst [vmem:[#allocation2 + $0x2b8] sm:$0xf] %v735_v16  ;;  %v3439_v15 = vor.u32 %v3950_v40, %v3438_v43  ;;  %v3443_v42 = vor.u32 %v3947_v24, %v3440_v4  ;;  %v3242_v1 = vld [vmem:[#allocation2 + $0x40] sm:$0xf]  ;;  %v3898_v54 = vld [vmem:[#allocation2 + $0x44] sm:$0xf]  ;;  %vm5963_vm4 = vmmov %vm5962_vm7 }
 0x14c   :  { %1408 = vmatpush.bf16.msrb.mxu0 %v3331_v58  ;;  %1424 = vmatpush.bf16.msrb.mxu2 %v3471_v50  ;;  %v223_v35 = vpop.permute.xlu0 %222  ;;  %v547_v18 = vpop.permute.xlu2 %546  ;;  %v3930_v23 = vld [vmem:[#allocation2 + $0x140] sm:$0xf0]  ;;  %v3362_v43 = vld [vmem:[#allocation2 + $0x128] sm:$0xf]  ;;  %v3334_v24 = vld [vmem:[#allocation2 + $0xf0] sm:$0xf] }
 0x14d   :  { %1399 = vmatpush.bf16.msrb.mxu3 %v3439_v15  ;;  %v227_v10 = vrot.slane %v223_v35, 4  ;;  %v551_v36 = vrot.slane %v547_v18, 4  ;;  %v4889_v14 = vpop.permute.xlu1 %43  ;;  %v3363_v2 = vor.u32 %v3930_v23, %v3362_v43  ;;  %v3906_v43 = vld [vmem:[#allocation2 + $0x84] sm:$0xf] }
 0x14e   :  { %v49_v58 = vrot.slane %v4889_v14, 4 }
 0x14f   :  { %v233_v41 = vsel %vm51_vm0, %v226_v34, %v227_v10  ;;  %v235_v49 = vsel %vm229_vm2, %v223_v35, %v227_v10  ;;  %v557_v50 = vsel %vm51_vm0, %v550_v61, %v551_v36  ;;  %v559_v22 = vsel %vm5962_vm7, %v547_v18, %v551_v36 }
 0x150   :  { %1409 = vmatpush.bf16.msrb.mxu0 %v3303_v29  ;;  %1425 = vmatpush.bf16.msrb.mxu2 %v3443_v42  ;;  %v234_v25 = vsel %vm229_vm2, %v4754_v32, %v233_v41  ;;  %243 = vst [vmem:[#allocation2 + $0xdc] sm:$0xf] %v235_v49  ;;  %v558_v62 = vsel %vm5963_vm4, %v4778_v30, %v557_v50  ;;  %v3901_v13 = vld [vmem:[#allocation2 + $0x58] sm:$0xf0]  ;;  %v3244_v61 = vld [vmem:[#allocation2 + $0x5c] sm:$0xf0] }
 0x151   :  { %1431 = vmatpush.bf16.msra.mxu3 %v3419_v0  ;;  %v55_v34 = vsel %vm51_vm0, %v48_v11, %v49_v58  ;;  %242 = vst [vmem:[#allocation2 + $0xd4] sm:$0xff] %v234_v25  ;;  %v3243_v32 = vor.u32 %v3901_v13, %v3242_v1  ;;  %v3247_v16 = vor.u32 %v3898_v54, %v3244_v61  ;;  %v3364_v30 = vld [vmem:[#allocation2 + $0x144] sm:$0xf0]  ;;  %vm5964_vm4 = vcmask 359424   ;;  %v3923_v42 = vld [vmem:[#allocation2 + $0x108] sm:$0xf0] }
 0x152   :  { %3542 = vmatmul.msk.bf16.vlgmr.msrb.gmra.mxu3 %vm5952_vm3, %v4803_v60  ;;  %v56_v3 = vsel %vm53_vm15, %v4801_v20, %v55_v34  ;;  %566 = vst [vmem:[#allocation2 + $0x208] sm:$0xff] %v558_v62  ;;  %v734_v11 = vsel %vm5964_vm4, %v4461_v33, %v733_v28  ;;  %v3367_v29 = vor.u32 %v3927_v44, %v3364_v30  ;;  %v3920_v33 = vld [vmem:[#allocation2 + $0xf4] sm:$0xf]  ;;  %vm5965_vm7 = vcmask 375808   ;;  %v3913_v13 = vld [vmem:[#allocation2 + $0xbc] sm:$0xf] }
 0x153   :  { %3543 = vmatmul.msk.bf16.vlgmr.msrb.gmra.mxu2 %vm5952_vm3, %v4803_v60  ;;  %567 = vst [vmem:[#allocation2 + $0x210] sm:$0xf] %v559_v22  ;;  %1385 = vmatpush.bf16.msrb.mxu1 %v3243_v32  ;;  %v3335_v17 = vor.u32 %v3923_v42, %v3334_v24  ;;  %v1123_v35 = vunpack.c.l.b16 %v734_v11  ;;  %v1124_v10 = vunpack.c.h.b16 %v734_v11  ;;  %vm5966_vm4 = vmmov %vm5965_vm7  ;;  %v3278_v11 = vld [vmem:[#allocation2 + $0x80] sm:$0xf] }
 0x154   :  { %1457 = vmatpush.bf16.msra.mxu2 %v3423_v31  ;;  %1410 = vmatpush.bf16.msrb.mxu0 %v3275_v27  ;;  %65 = vst [vmem:[#allocation2 + $0x24] sm:$0xff] %v56_v3  ;;  %v167_v20 = vpop.permute.xlu0 %166  ;;  %v519_v57 = vpop.permute.xlu2 %518  ;;  %v3214_v27 = vld [vmem:[#allocation2 + $0x8] sm:$0xf] }
 0x155   :  { %1432 = vmatpush.bf16.msra.mxu3 %v3391_v55  ;;  %v171_v40 = vrot.slane %v167_v20, 4  ;;  %v523_v4 = vrot.slane %v519_v57, 4  ;;  %v667_v15 = vpop.permute.xlu1 %666  ;;  %v3336_v55 = vld [vmem:[#allocation2 + $0x10c] sm:$0xf0]  ;;  %v1214_v41 = vpack.c.b16 %v1123_v35, %v1123_v35  ;;  %v1215_v1 = vpack.c.b16 %v1124_v10, %v1124_v10 }
 0x156   :  { %v671_v26 = vrot.slane %v667_v15, 4  ;;  %v3339_v28 = vor.u32 %v3920_v33, %v3336_v55 }
 0x157   :  { %v177_v18 = vsel %vm51_vm0, %v170_v7, %v171_v40  ;;  %v179_v0 = vsel %vm173_vm1, %v167_v20, %v171_v40  ;;  %v529_v59 = vsel %vm51_vm0, %v522_v19, %v523_v4  ;;  %v531_v53 = vsel %vm525_vm11, %v519_v57, %v523_v4 }
 0x158   :  { %1458 = vmatpush.bf16.msra.mxu2 %v3395_v12  ;;  %1411 = vmatpush.bf16.msrb.mxu0 %v3247_v16  ;;  %v178_v36 = vsel %vm173_vm1, %v4818_v56, %v177_v18  ;;  %187 = vst [vmem:[#allocation2 + $0xa4] sm:$0xf] %v179_v0  ;;  %v530_v31 = vsel %vm525_vm11, %v4847_v52, %v529_v59  ;;  %v3916_v39 = vld [vmem:[#allocation2 + $0xd0] sm:$0xf0]  ;;  %v3891_v12 = vld [vmem:[#allocation2 + $0xc] sm:$0xf] }
 0x159   :  { %1433 = vmatpush.bf16.msra.mxu3 %v3363_v2  ;;  %v677_v7 = vsel %vm51_vm0, %v670_v47, %v671_v26  ;;  %186 = vst [vmem:[#allocation2 + $0x9c] sm:$0xff] %v178_v36  ;;  %v679_v56 = vsel %vm5966_vm4, %v667_v15, %v671_v26  ;;  %v3306_v52 = vld [vmem:[#allocation2 + $0xb8] sm:$0xf]  ;;  %v1319_v61 = vsel %vm51_vm0, %v1214_v41, 0  ;;  %v1322_v30 = vsel %vm51_vm0, %v1215_v1, 0 }
 0x15a   :  { %v678_v19 = vsel %vm5965_vm7, %v4536_v38, %v677_v7  ;;  %538 = vst [vmem:[#allocation2 + $0x1ec] sm:$0xff] %v530_v31  ;;  %v3308_v49 = vld [vmem:[#allocation2 + $0xd4] sm:$0xf0]  ;;  %v3307_v22 = vor.u32 %v3916_v39, %v3306_v52  ;;  %v3502_v52 = vld [vmem:[#allocation2 + $0x240] sm:$0xf] }
 0x15b   :  { %539 = vst [vmem:[#allocation2 + $0x1f4] sm:$0xf] %v531_v53  ;;  %v3894_v50 = vld [vmem:[#allocation2 + $0x20] sm:$0xf0]  ;;  %v3216_v47 = vld [vmem:[#allocation2 + $0x24] sm:$0xf0]  ;;  %v3311_v32 = vor.u32 %v3913_v13, %v3308_v49 }
 0x15c   :  { %1459 = vmatpush.bf16.msra.mxu2 %v3367_v29  ;;  %686 = vst [vmem:[#allocation2 + $0x278] sm:$0xff] %v678_v19  ;;  %v3215_v54 = vor.u32 %v3894_v50, %v3214_v27  ;;  %v3219_v25 = vor.u32 %v3891_v12, %v3216_v47  ;;  %v75_v38 = vpop.permute.xlu0 %74  ;;  %v3532_v15 = vld [vmem:[#allocation2 + $0x294] sm:$0xf0]  ;;  %v3222_v49 = vld [vmem:[#allocation2 + $0x10] sm:$0xf] }
 0x15d   :  { %1434 = vmatpush.bf16.msra.mxu3 %v3335_v17  ;;  %687 = vst [vmem:[#allocation2 + $0x280] sm:$0xf] %v679_v56  ;;  %v79_v62 = vrot.slane %v75_v38, 4  ;;  %v103_v34 = vpop.permute.xlu1 %102  ;;  %v844_v59 = vld [vmem:[#allocation2 + $0x2b8] sm:$0xf] }
 0x15e   :  { %1386 = vmatpush.bf16.msrb.mxu1 %v3215_v54  ;;  %1412 = vmatpush.bf16.msrb.mxu0 %v3219_v25  ;;  %v107_v3 = vrot.slane %v103_v34, 4  ;;  %v1125_v27 = vunpack.c.l.b16 %v844_v59  ;;  %v3892_v50 = vld [vmem:[#allocation2 + $0x14] sm:$0xf]  ;;  %v3962_v47 = vld [vmem:[#allocation2 + $0x244] sm:$0xf] }
 0x15f   :  { %v85_v23 = vsel %vm51_vm0, %v78_v63, %v79_v62  ;;  %v87_v16 = vsel %vm81_vm10, %v75_v38, %v79_v62 }
 0x160   :  { %1460 = vmatpush.bf16.msra.mxu2 %v3339_v28  ;;  %v86_v24 = vsel %vm81_vm10, %v4775_v9, %v85_v23  ;;  %95 = vst [vmem:[#allocation2 + $0x50] sm:$0xf] %v87_v16  ;;  %v113_v20 = vsel %vm51_vm0, %v106_v8, %v107_v3  ;;  %v115_v57 = vsel %vm109_vm6, %v103_v34, %v107_v3  ;;  %v3909_v63 = vld [vmem:[#allocation2 + $0x98] sm:$0xf0]  ;;  %v3280_v2 = vld [vmem:[#allocation2 + $0x9c] sm:$0xf0] }
 0x161   :  { %1435 = vmatpush.bf16.msra.mxu3 %v3307_v22  ;;  %94 = vst [vmem:[#allocation2 + $0x48] sm:$0xff] %v86_v24  ;;  %v114_v44 = vsel %vm109_vm6, %v4872_v6, %v113_v20  ;;  %v3279_v40 = vor.u32 %v3909_v63, %v3278_v11  ;;  %v3283_v4 = vor.u32 %v3906_v43, %v3280_v2  ;;  %v3972_v9 = vld [vmem:[#allocation2 + $0x290] sm:$0xf0]  ;;  %v3973_v16 = vld [vmem:[#allocation2 + $0x298] sm:$0xf0] }
 0x162   :  { %1447 = vmatpush.bf16.msra.mxu1 %v1319_v61  ;;  %1473 = vmatpush.bf16.msra.mxu0 %v1322_v30  ;;  %122 = vst [vmem:[#allocation2 + $0x64] sm:$0xff] %v114_v44  ;;  %v1216_v62 = vpack.c.b16 %v1125_v27, %v1125_v27  ;;  %v3474_v11 = vld [vmem:[#allocation2 + $0x208] sm:$0xf] }
 0x163   :  { %1387 = vmatmul.bf16.vlgmr.msrb.gmra.mxu1 %v4841_v5  ;;  %1413 = vmatmul.bf16.vlgmr.msrb.gmra.mxu0 %v4841_v5  ;;  %123 = vst [vmem:[#allocation2 + $0x6c] sm:$0xf] %v115_v57  ;;  %v3530_v8 = vld [vmem:[#allocation2 + $0x278] sm:$0xf]  ;;  %v3969_v29 = vld [vmem:[#allocation2 + $0x27c] sm:$0xf] }
 0x164   :  { %1461 = vmatpush.bf16.msra.mxu2 %v3311_v32  ;;  %v3531_v42 = vor.u32 %v3972_v9, %v3530_v8  ;;  %v3535_v26 = vor.u32 %v3969_v29, %v3532_v15  ;;  %v639_v17 = vpop.permute.xlu0 %638  ;;  %v3538_v23 = vld [vmem:[#allocation2 + $0x280] sm:$0xf]  ;;  %v3510_v2 = vld [vmem:[#allocation2 + $0x248] sm:$0xf]  ;;  %v3945_v15 = vld [vmem:[#allocation2 + $0x1b8] sm:$0xf0] }
 0x165   :  { %1436 = vmatpush.bf16.msra.mxu3 %v3279_v40  ;;  %v643_v33 = vrot.slane %v639_v17, 4  ;;  %v46_v35 = vpop.permute.xlu1 %45  ;;  %v3539_v30 = vor.u32 %v3973_v16, %v3538_v23  ;;  %v3426_v9 = vld [vmem:[#allocation2 + $0x1a0] sm:$0xf]  ;;  %v3951_v8 = vld [vmem:[#allocation2 + $0x1e8] sm:$0xf0] }
 0x166   :  { %1448 = vmatpush.bf16.msra.mxu1 %v3531_v42  ;;  %1474 = vmatpush.bf16.msra.mxu0 %v3535_v26  ;;  %v50_v6 = vrot.slane %v46_v35, 4  ;;  %v3448_v29 = vld [vmem:[#allocation2 + $0x1ec] sm:$0xf0] }
 0x167   :  { %v649_v18 = vsel %vm51_vm0, %v642_v45, %v643_v33  ;;  %v651_v0 = vsel %vm645_vm9, %v639_v17, %v643_v33  ;;  %v3427_v33 = vor.u32 %v3945_v15, %v3426_v9 }
 0x168   :  { %1462 = vmatpush.bf16.msra.mxu2 %v3283_v4  ;;  %v650_v10 = vsel %vm645_vm9, %v4708_v37, %v649_v18  ;;  %659 = vst [vmem:[#allocation2 + $0x264] sm:$0xf] %v651_v0  ;;  %v57_v36 = vsel %vm51_vm0, %v49_v58, %v50_v6  ;;  %v59_v31 = vsel %vm53_vm15, %v46_v35, %v50_v6  ;;  %v3250_v53 = vld [vmem:[#allocation2 + $0x48] sm:$0xf]  ;;  %v3899_v7 = vld [vmem:[#allocation2 + $0x4c] sm:$0xf] }
 0x169   :  { %658 = vst [vmem:[#allocation2 + $0x25c] sm:$0xff] %v650_v10  ;;  %v58_v55 = vsel %vm53_vm15, %v4889_v14, %v57_v36  ;;  %v3902_v45 = vld [vmem:[#allocation2 + $0x60] sm:$0xf0]  ;;  %v3252_v39 = vld [vmem:[#allocation2 + $0x64] sm:$0xf0] }
 0x16a   :  { %66 = vst [vmem:[#allocation2 + $0x2c] sm:$0xff] %v58_v55  ;;  %v3251_v19 = vor.u32 %v3902_v45, %v3250_v53  ;;  %v3255_v28 = vor.u32 %v3899_v7, %v3252_v39  ;;  %v3482_v35 = vld [vmem:[#allocation2 + $0x210] sm:$0xf]  ;;  %v3398_v18 = vld [vmem:[#allocation2 + $0x168] sm:$0xf] }
 0x16b   :  { %67 = vst [vmem:[#allocation2 + $0x34] sm:$0xf] %v59_v31  ;;  %v3938_v0 = vld [vmem:[#allocation2 + $0x180] sm:$0xf0]  ;;  %v3952_v10 = vld [vmem:[#allocation2 + $0x1f0] sm:$0xf0] }
 0x16c   :  { %1437 = vmatpush.bf16.msra.mxu3 %v3251_v19  ;;  %1463 = vmatpush.bf16.msra.mxu2 %v3255_v28  ;;  %v575_v37 = vpop.permute.xlu0 %574  ;;  %v3399_v36 = vor.u32 %v3938_v0, %v3398_v18  ;;  %v3931_v53 = vld [vmem:[#allocation2 + $0x148] sm:$0xf0]  ;;  %v3370_v7 = vld [vmem:[#allocation2 + $0x130] sm:$0xf]  ;;  %v3342_v45 = vld [vmem:[#allocation2 + $0xf8] sm:$0xf] }
 0x16d   :  { %v579_v12 = vrot.slane %v575_v37, 4  ;;  %v491_v58 = vpop.permute.xlu1 %490  ;;  %v3371_v55 = vor.u32 %v3931_v53, %v3370_v7  ;;  %v3924_v39 = vld [vmem:[#allocation2 + $0x110] sm:$0xf0]  ;;  %v3917_v28 = vld [vmem:[#allocation2 + $0xd8] sm:$0xf0] }
 0x16e   :  { %v495_v56 = vrot.slane %v491_v58, 4  ;;  %v3343_v19 = vor.u32 %v3924_v39, %v3342_v45 }
 0x16f   :  { %v585_v41 = vsel %vm51_vm0, %v578_v48, %v579_v12  ;;  %v587_v14 = vsel %vm581_vm13, %v575_v37, %v579_v12  ;;  %v3966_v20 = vld [vmem:[#allocation2 + $0x260] sm:$0xf0]  ;;  %v3314_v37 = vld [vmem:[#allocation2 + $0xc0] sm:$0xf] }
 0x170   :  { %v586_v22 = vsel %vm581_vm13, %v4704_v46, %v585_v41  ;;  %595 = vst [vmem:[#allocation2 + $0x22c] sm:$0xf] %v587_v14  ;;  %v501_v1 = vsel %vm51_vm0, %v494_v21, %v495_v56  ;;  %v503_v54 = vsel %vm497_vm12, %v491_v58, %v495_v56  ;;  %v3965_v25 = vld [vmem:[#allocation2 + $0x258] sm:$0xf0]  ;;  %v3504_v38 = vld [vmem:[#allocation2 + $0x25c] sm:$0xf0]  ;;  %v3511_v4 = vor.u32 %v3966_v20, %v3510_v2 }
 0x171   :  { %594 = vst [vmem:[#allocation2 + $0x224] sm:$0xff] %v586_v22  ;;  %v502_v48 = vsel %vm497_vm12, %v4843_v51, %v501_v1  ;;  %v3895_v34 = vld [vmem:[#allocation2 + $0x28] sm:$0xf0]  ;;  %v3503_v13 = vor.u32 %v3965_v25, %v3502_v52  ;;  %v3224_v61 = vld [vmem:[#allocation2 + $0x2c] sm:$0xf0]  ;;  %v3507_v3 = vor.u32 %v3962_v47, %v3504_v38  ;;  %v1325_v21 = vsel %vm51_vm0, %v1216_v62, 0 }
 0x172   :  { %510 = vst [vmem:[#allocation2 + $0x1d0] sm:$0xff] %v502_v48  ;;  %v3223_v46 = vor.u32 %v3895_v34, %v3222_v49  ;;  %v3227_v32 = vor.u32 %v3892_v50, %v3224_v61  ;;  %v3955_v51 = vld [vmem:[#allocation2 + $0x20c] sm:$0xf]  ;;  %v3315_v27 = vor.u32 %v3917_v28, %v3314_v37  ;;  %v3910_v12 = vld [vmem:[#allocation2 + $0xa0] sm:$0xf0] }
 0x173   :  { %511 = vst [vmem:[#allocation2 + $0x1d8] sm:$0xf] %v503_v54  ;;  %1449 = vmatpush.bf16.msra.mxu1 %v3503_v13  ;;  %1475 = vmatpush.bf16.msra.mxu0 %v3507_v3  ;;  %v3286_v58 = vld [vmem:[#allocation2 + $0x88] sm:$0xf]  ;;  %v3258_v52 = vld [vmem:[#allocation2 + $0x50] sm:$0xf] }
 0x174   :  { %1438 = vmatpush.bf16.msra.mxu3 %v3223_v46  ;;  %1464 = vmatpush.bf16.msra.mxu2 %v3227_v32  ;;  %v3287_v56 = vor.u32 %v3910_v12, %v3286_v58  ;;  %v3903_v41 = vld [vmem:[#allocation2 + $0x68] sm:$0xf0]  ;;  %v3230_v49 = vld [vmem:[#allocation2 + $0x18] sm:$0xf]  ;;  %v3896_v50 = vld [vmem:[#allocation2 + $0x30] sm:$0xf0] }
 0x175   :  { %v3259_v14 = vor.u32 %v3903_v41, %v3258_v52  ;;  %v3231_v47 = vor.u32 %v3896_v50, %v3230_v49 }
 0x177   :  { %1439 = vmatmul.bf16.vlgmr.msra.gmra.mxu3 %v4841_v5  ;;  %1465 = vmatmul.bf16.vlgmr.msra.gmra.mxu2 %v4841_v5  ;;  %v3959_v42 = vld [vmem:[#allocation2 + $0x228] sm:$0xf0] }
 0x178   :  { %1499 = vmatpush.bf16.msrb.mxu3 %v1325_v21  ;;  %v3958_v43 = vld [vmem:[#allocation2 + $0x220] sm:$0xf0]  ;;  %v3476_v24 = vld [vmem:[#allocation2 + $0x224] sm:$0xf0]  ;;  %v3483_v6 = vor.u32 %v3959_v42, %v3482_v35 }
 0x179   :  { %v3475_v57 = vor.u32 %v3958_v43, %v3474_v11  ;;  %v3479_v63 = vor.u32 %v3955_v51, %v3476_v24  ;;  %v3446_v44 = vld [vmem:[#allocation2 + $0x1d0] sm:$0xf]  ;;  %v3948_v40 = vld [vmem:[#allocation2 + $0x1d4] sm:$0xf] }
 0x17a   :  { %v3447_v26 = vor.u32 %v3951_v8, %v3446_v44  ;;  %v3451_v17 = vor.u32 %v3948_v40, %v3448_v29  ;;  %v3454_v59 = vld [vmem:[#allocation2 + $0x1d8] sm:$0xf] }
 0x17b   :  { %1450 = vmatpush.bf16.msra.mxu1 %v3475_v57  ;;  %1476 = vmatpush.bf16.msra.mxu0 %v3479_v63  ;;  %v3455_v31 = vor.u32 %v3952_v10, %v3454_v59  ;;  %v4995_v57 = vld [vmem:[%s5933_s2] ss:$2 sm:$0xff] }
 0x17c   :  { %1500 = vmatpush.bf16.msrb.mxu3 %v3539_v30  ;;  %v1511_v63 = vperm.slane %v4995_v57, 0  ;;  %v1512_v2 = vperm.slane %v4995_v57, 1  ;;  %v1513_v8 = vperm.slane %v4995_v57, 2  ;;  %v1514_v35 = vperm.slane %v4995_v57, 3 }
 0x17d   :  { %v1515_v0 = vperm.slane %v4995_v57, 4  ;;  %v1516_v45 = vperm.slane %v4995_v57, 5  ;;  %v1517_v58 = vperm.slane %v4995_v57, 6 }
 0x17f   :  { %1451 = vmatpush.bf16.msra.mxu1 %v3447_v26  ;;  %1477 = vmatpush.bf16.msra.mxu0 %v3451_v17 }
 0x180   :  { %1501 = vmatpush.bf16.msrb.mxu3 %v3511_v4 }
 0x182   :  { %3544 = vmatmul.msk.bf16.vlgmr.msra.gmra.mxu1 %vm5952_vm3, %v4803_v60  ;;  %3545 = vmatmul.msk.bf16.vlgmr.msra.gmra.mxu0 %vm5952_vm3, %v4803_v60 }
 0x183   :  { %1483 = vmatpush.bf16.msrb.mxu1 %v3427_v33 }
 0x184   :  { %1502 = vmatpush.bf16.msrb.mxu3 %v3483_v6 }
 0x187   :  { %1484 = vmatpush.bf16.msrb.mxu1 %v3399_v36 }
 0x188   :  { %1503 = vmatpush.bf16.msrb.mxu3 %v3455_v31 }
 0x18b   :  { %1485 = vmatpush.bf16.msrb.mxu1 %v3371_v55  ;;  %3546 = vmatmul.msk.bf16.vlgmr.msrb.gmra.mxu3 %vm5952_vm3, %v4803_v60 }
 0x18f   :  { %1486 = vmatpush.bf16.msrb.mxu1 %v3343_v19 }
 0x193   :  { %1487 = vmatpush.bf16.msrb.mxu1 %v3315_v27 }
 0x197   :  { %1488 = vmatpush.bf16.msrb.mxu1 %v3287_v56 }
 0x19b   :  { %1489 = vmatpush.bf16.msrb.mxu1 %v3259_v14 }
 0x19f   :  { %1490 = vmatpush.bf16.msrb.mxu1 %v3231_v47 }
 0x1a2   :  { %1491 = vmatmul.bf16.vlgmr.msrb.gmra.mxu1 %v4841_v5 }
 0x1ab   :  { %v1349_v60 = vpop.f32.mrf.mxu1 }
 0x1b0   :  { %v1375_v22 = vpop.f32.mrf.mxu3 }
 0x1b3   :  { %v1351_v1 = vpop.f32.mrf.mxu1 }
 0x1b8   :  { %v1377_v54 = vpop.f32.mrf.mxu3 }
 0x1bc   :  { %v1336_v25 = vpop.f32.mrf.mxu0 }
 0x1bd   :  { %v4988_v38 = vadd.f32 %v1349_v60, %v1336_v25 }
 0x1bf   :  { %v1525_v4 = vmul.f32 %v1511_v63, %v4988_v38 }
 0x1c1   :  { %v1540_v42 = vmul.f32 %v1525_v4, %v4988_v38 }
 0x1c2   :  { %v1362_v62 = vpop.f32.mrf.mxu2 }
 0x1c3   :  { %v4990_v48 = vadd.f32 %v1375_v22, %v1362_v62  ;;  %v4121_v62 = vmov 0  }
 0x1c4   :  { %v1338_v34 = vpop.f32.mrf.mxu0  ;;  %4087 = vset.pattern.permute.xlu2 %v4121_v62  ;;  %1623 = vst [vmem:[#allocation3 + $0x1c] sm:$0xff] %v4121_v62 }
 0x1c5   :  { %v1526_v9 = vmul.f32 %v1512_v2, %v4990_v48 }
 0x1c7   :  { %v1541_v26 = vmul.f32 %v1526_v9, %v4990_v48  ;;  %v1532_v6 = vadd.f32 %v1526_v9, %v1525_v4 }
 0x1c9   :  { %v1547_v59 = vadd.f32 %v1541_v26, %v1540_v42 }
 0x1ca   :  { %v1364_v13 = vpop.f32.mrf.mxu2 }
 0x1d5   :  { %v1401_v61 = vpop.f32.mrf.mxu3 }
 0x1d6   :  { %v1427_v3 = vpop.f32.mrf.mxu2 }
 0x1dd   :  { %v1403_v46 = vpop.f32.mrf.mxu3 }
 0x1de   :  { %v1429_v32 = vpop.f32.mrf.mxu2 }
 0x1e0   :  { %v1388_v21 = vpop.f32.mrf.mxu1  ;;  %v1414_v23 = vpop.f32.mrf.mxu0 }
 0x1e1   :  { %v5005_v15 = vadd.f32 %v1401_v61, %v1388_v21  ;;  %v5013_v33 = vadd.f32 %v1427_v3, %v1414_v23 }
 0x1e3   :  { %v1527_v17 = vmul.f32 %v1513_v8, %v5005_v15  ;;  %v1528_v36 = vmul.f32 %v1514_v35, %v5013_v33 }
 0x1e5   :  { %v1542_v10 = vmul.f32 %v1527_v17, %v5005_v15  ;;  %v1533_v53 = vadd.f32 %v1532_v6, %v1527_v17  ;;  %v1543_v19 = vmul.f32 %v1528_v36, %v5013_v33 }
 0x1e7   :  { %v1548_v39 = vadd.f32 %v1547_v59, %v1542_v10  ;;  %v1534_v28 = vadd.f32 %v1533_v53, %v1528_v36 }
 0x1e8   :  { %v1390_v16 = vpop.f32.mrf.mxu1  ;;  %v1416_v5 = vpop.f32.mrf.mxu0 }
 0x1e9   :  { %v1549_v12 = vadd.f32 %v1548_v39, %v1543_v19 }
 0x1fa   :  { %v1440_v30 = vpop.f32.mrf.mxu3  ;;  %v1466_v11 = vpop.f32.mrf.mxu2 }
 0x1ff   :  { %v1453_v51 = vpop.f32.mrf.mxu1  ;;  %v1479_v43 = vpop.f32.mrf.mxu0 }
 0x200   :  { %v5016_v18 = vadd.f32 %v1453_v51, %v1440_v30  ;;  %v1480_v55 = vadd.f32 %v1479_v43, %v1466_v11  ;;  %v1509_v51 = vld [vmem:[%s5934_s5] sm:$0xff] }
 0x202   :  { %v1442_v24 = vpop.f32.mrf.mxu3  ;;  %v1468_v20 = vpop.f32.mrf.mxu2  ;;  %v1529_v7 = vmul.f32 %v1515_v0, %v5016_v18  ;;  %v1530_v27 = vmul.f32 %v1516_v45, %v1480_v55 }
 0x204   :  { %v1544_v37 = vmul.f32 %v1529_v7, %v5016_v18  ;;  %v1535_v56 = vadd.f32 %v1534_v28, %v1529_v7  ;;  %v1545_v41 = vmul.f32 %v1530_v27, %v1480_v55 }
 0x206   :  { %v1550_v49 = vadd.f32 %v1549_v12, %v1544_v37  ;;  %v1536_v47 = vadd.f32 %v1535_v56, %v1530_v27 }
 0x207   :  { %v1455_v44 = vpop.f32.mrf.mxu1  ;;  %v1481_v40 = vpop.f32.mrf.mxu0 }
 0x208   :  { %v1551_v1 = vadd.f32 %v1550_v49, %v1545_v41  ;;  %v4123_v40 = vmov 1  }
 0x20e   :  { %v1505_v29 = vpop.f32.mrf.mxu3 }
 0x216   :  { %v1507_v31 = vpop.f32.mrf.mxu3 }
 0x21f   :  { %v1492_v52 = vpop.f32.mrf.mxu1 }
 0x220   :  { %v1506_v14 = vadd.f32 %v1505_v29, %v1492_v52 }
 0x222   :  { %v1531_v50 = vmul.f32 %v1517_v58, %v1506_v14 }
 0x224   :  { %v1537_v60 = vadd.f32 %v1536_v47, %v1531_v50  ;;  %v1546_v22 = vmul.f32 %v1531_v50, %v1506_v14 }
 0x226   :  { %1538 = vadd.xlane.f32.xlu0 %v1537_v60  ;;  %v1552_v54 = vadd.f32 %v1551_v1, %v1546_v22 }
 0x227   :  { %v1494_v25 = vpop.f32.mrf.mxu1 }
 0x228   :  { %1553 = vadd.xlane.f32.xlu1 %v1552_v54 }
 0x299   :  { %v1539_v34 = vpop.xlane.xlu0 %1538 }
 0x29a   :  { %v1555_v13 = vmul.f32 0.001953125, %v1539_v34 }
 0x29b   :  { %v1554_v61 = vpop.xlane.xlu1 %1553 }
 0x29c   :  { %v1557_v3 = vmul.f32 %v1555_v13, %v1555_v13  ;;  %v1556_v46 = vmul.f32 0.001953125, %v1554_v61 }
 0x29e   :  { %v1558_v32 = vsub.f32 %v1556_v46, %v1557_v3 }
 0x2a0   :  { %v1559_v21 = vadd.f32 1e-05, %v1558_v32 }
 0x2a2   :  { %4092 = vrsqrt.f32 %v1559_v21  ;;  %vm1566_vm4 = vweird.f32 %v1559_v21 }
 0x2a8   :  { %v4093_v23 = vpop.eup %4092 }
 0x2a9   :  { %v1561_v16 = vmul.f32 %v4093_v23, %v1559_v21  ;;  %vm1567_vm7 = vweird.f32 %v4093_v23 }
 0x2aa   :  { %vm1568_vm3 = vmor %vm1566_vm4, %vm1567_vm7  ;;  %vm5968_vm7 = vcmask 556032   ;;  %vm5969_vm4 = vcmask 359424  }
 0x2ab   :  { %v1562_v5 = vmul.f32 %v4093_v23, %v1561_v16 }
 0x2ad   :  { %v1563_v30 = vmul.f32 0.5, %v1562_v5 }
 0x2af   :  { %v1564_v11 = vsub.f32 1.5, %v1563_v30 }
 0x2b1   :  { %v1565_v43 = vmul.f32 %v4093_v23, %v1564_v11 }
 0x2b3   :  { %v1569_v24 = vsel %vm1568_vm3, %v4093_v23, %v1565_v43  ;;  %vm5967_vm3 = vcmask 687104  }
 0x2b4   :  { %v1570_v20 = vmul.f32 %v1569_v24, %v1509_v51 }
 0x2b6   :  { %1579 = vperm.xlu2 %4087, %v1570_v20   ;;  %v1571_v44 = vmul.f32 %v1570_v20, %v1555_v13 }
 0x2be   :  { %1573 = vrot.lane.b32.xlu2 %v1571_v44, %s4122_s18 }
 0x2bf   :  { %4088 = vset.pattern.permute.xlu2 %v4123_v40 }
 0x310   :  { %v1580_v4 = vpop.permute.xlu2 %1579 }
 0x311   :  { %v1582_v42 = vmul.f32 %v1580_v4, %v4988_v38  ;;  %v1583_v26 = vmul.f32 %v1580_v4, %v4990_v48  ;;  %v1584_v17 = vmul.f32 %v1580_v4, %v5005_v15  ;;  %v1585_v6 = vmul.f32 %v1580_v4, %v5013_v33 }
 0x312   :  { %v1586_v59 = vmul.f32 %v1580_v4, %v5016_v18  ;;  %v1587_v10 = vmul.f32 %v1580_v4, %v1480_v55  ;;  %v1588_v36 = vmul.f32 %v1580_v4, %v1506_v14 }
 0x318   :  { %v1574_v9 = vpop.permute.xlu2 %1573 }
 0x319   :  { %v1576_v29 = vsub.f32 %v1509_v51, %v1574_v9 }
 0x31b   :  { %1591 = vperm.xlu2 %4088, %v1576_v29  }
 0x375   :  { %v1592_v31 = vpop.permute.xlu2 %1591 }
 0x376   :  { %v1594_v53 = vadd.f32 %v1592_v31, %v1582_v42  ;;  %v1595_v7 = vadd.f32 %v1592_v31, %v1583_v26  ;;  %v1596_v39 = vadd.f32 %v1592_v31, %v1584_v17  ;;  %v1597_v19 = vadd.f32 %v1592_v31, %v1585_v6 }
 0x377   :  { %v1598_v28 = vadd.f32 %v1592_v31, %v1586_v59  ;;  %v1599_v37 = vadd.f32 %v1592_v31, %v1587_v10  ;;  %v1600_v27 = vadd.f32 %v1592_v31, %v1588_v36 }
 0x378   :  { %v1601_v12 = vmax.f32 %v1594_v53, 0.0  ;;  %v1602_v38 = vmax.f32 %v1595_v7, 0.0  ;;  %v1603_v56 = vmax.f32 %v1596_v39, 0.0  ;;  %v1604_v48 = vmax.f32 %v1597_v19, 0.0 }
 0x379   :  { %v1605_v52 = vmax.f32 %v1598_v28, 0.0  ;;  %v1606_v15 = vmax.f32 %v1599_v37, 0.0  ;;  %v1607_v41 = vmax.f32 %v1600_v27, 0.0 }
 0x37a   :  { %v1608_v33 = vmul.f32 %v1601_v12, %v1511_v63  ;;  %v1609_v18 = vmul.f32 %v1602_v38, %v1512_v2  ;;  %v1610_v55 = vmul.f32 %v1603_v56, %v1513_v8  ;;  %v1611_v14 = vmul.f32 %v1604_v48, %v1514_v35 }
 0x37b   :  { %v1612_v49 = vmul.f32 %v1605_v52, %v1515_v0  ;;  %v1613_v50 = vmul.f32 %v1606_v15, %v1516_v45  ;;  %v1614_v47 = vmul.f32 %v1607_v41, %v1517_v58 }
 0x37c   :  { %v5057_v60 = vpack.c.bf16 %v1609_v18, %v1608_v33  ;;  %v5059_v63 = vpack.c.bf16 %v1611_v14, %v1610_v55 }
 0x37d   :  { %v5061_v2 = vpack.c.bf16 %v1613_v50, %v1612_v49  ;;  %v1618_v22 = vpack.c.bf16 %v1614_v47, %v1614_v47 }
 0x37e   :  { %2040 = vrot.lane.b32.xlu0 %v5059_v63, %s4098_s26  ;;  %2289 = vrot.lane.b32.xlu1 %v5057_v60, %s4097_s25  ;;  %1628 = vst [vmem:[#allocation2] sm:$0xff] %v5057_v60 }
 0x37f   :  { %2003 = vrot.lane.b32.xlu2 %v5057_v60, %s4099_s27  ;;  %1622 = vst [vmem:[#allocation3 + $0x18] sm:$0xf] %v1618_v22 }
 0x380   :  { %1629 = vst [vmem:[#allocation2 + $0x8] sm:$0xff] %v5059_v63 }
 0x381   :  { %1630 = vst [vmem:[#allocation2 + $0x10] sm:$0xff] %v5061_v2 }
 0x386   :  { %1951 = vrot.lane.b32.xlu0 %v5059_v63, %s4102_s8  ;;  %1978 = vrot.lane.b32.xlu1 %v5059_v63, %s4104_s10  ;;  %v5078_v57 = vld [vmem:[#allocation3 + $0x18] sm:$0xff] }
 0x387   :  { %2005 = vrot.lane.b32.xlu2 %v5059_v63, %s4099_s27  ;;  %1631 = vst [vmem:[#allocation2 + $0x18] sm:$0xf] %v5078_v57 }
 0x38e   :  { %1922 = vrot.lane.b32.xlu1 %v5057_v60, %s4106_s12  ;;  %1895 = vrot.lane.b32.xlu0 %v5057_v60, %s4107_s13 }
 0x38f   :  { %2038 = vrot.lane.b32.xlu2 %v5057_v60, %s4098_s26 }
 0x396   :  { %2042 = vrot.lane.b32.xlu1 %v5061_v2, %s4098_s26  ;;  %1924 = vrot.lane.b32.xlu0 %v5059_v63, %s4106_s12 }
 0x397   :  { %2291 = vrot.lane.b32.xlu2 %v5059_v63, %s4097_s25 }
 0x39e   :  { %2262 = vrot.lane.b32.xlu1 %v5057_v60, %s4101_s29  ;;  %2235 = vrot.lane.b32.xlu0 %v5057_v60, %s4100_s28 }
 0x39f   :  { %1949 = vrot.lane.b32.xlu2 %v5057_v60, %s4102_s8 }
 0x3a6   :  { %1835 = vrot.lane.b32.xlu1 %v5059_v63, %s4110_s16  ;;  %2264 = vrot.lane.b32.xlu0 %v5059_v63, %s4101_s29 }
 0x3a7   :  { %1976 = vrot.lane.b32.xlu2 %v5057_v60, %s4104_s10 }
 0x3ae   :  { %1953 = vrot.lane.b32.xlu1 %v5061_v2, %s4102_s8  ;;  %1860 = vrot.lane.b32.xlu0 %v5057_v60, %s4111_s17 }
 0x3af   :  { %1897 = vrot.lane.b32.xlu2 %v5059_v63, %s4107_s13 }
 0x3b6   :  { %2183 = vrot.lane.b32.xlu1 %v5059_v63, %s4103_s9  ;;  %1980 = vrot.lane.b32.xlu0 %v5061_v2, %s4104_s10 }
 0x3b7   :  { %2007 = vrot.lane.b32.xlu2 %v5061_v2, %s4099_s27 }
 0x3be   :  { %1779 = vrot.lane.b32.xlu1 %v5057_v60, %s4114_s0  ;;  %2208 = vrot.lane.b32.xlu0 %v5057_v60, %s4105_s11 }
 0x3bf   :  { %2237 = vrot.lane.b32.xlu2 %v5059_v63, %s4100_s28 }
 0x3c6   :  { %1808 = vrot.lane.b32.xlu1 %v5059_v63, %s4115_s22  ;;  %1781 = vrot.lane.b32.xlu0 %v5059_v63, %s4114_s0 }
 0x3c7   :  { %1833 = vrot.lane.b32.xlu2 %v5057_v60, %s4110_s16 }
 0x3ce   :  { %2119 = vrot.lane.b32.xlu1 %v5057_v60, %s4109_s15  ;;  %1899 = vrot.lane.b32.xlu0 %v5061_v2, %s4107_s13 }
 0x3cf   :  { %1862 = vrot.lane.b32.xlu2 %v5059_v63, %s4111_s17 }
 0x3d6   :  { %2148 = vrot.lane.b32.xlu1 %v5059_v63, %s4108_s14  ;;  %2121 = vrot.lane.b32.xlu0 %v5059_v63, %s4109_s15 }
 0x3d7   :  { %2181 = vrot.lane.b32.xlu2 %v5057_v60, %s4103_s9 }
 0x3d9   :  { %v2004_v8 = vpop.permute.xlu2 %2003 }
 0x3da   :  { %v2011_v0 = vrot.slane %v2004_v8, 4 }
 0x3de   :  { %1752 = vrot.lane.b32.xlu1 %v5057_v60, %s4117_s24  ;;  %1717 = vrot.lane.b32.xlu0 %v5057_v60, %s4116_s23 }
 0x3df   :  { %2210 = vrot.lane.b32.xlu2 %v5059_v63, %s4105_s11 }
 0x3e1   :  { %v5147_v35 = vpop.permute.xlu2 %2005 }
 0x3e2   :  { %v2012_v45 = vrot.slane %v5147_v35, 4 }
 0x3e4   :  { %v2015_v58 = vsel %vm51_vm0, %v2011_v0, %v2012_v45 }
 0x3e5   :  { %v2016_v1 = vsel %vm5967_vm3, %v2004_v8, %v2015_v58  ;;  %vm5970_vm3 = vcmask 703488  }
 0x3e6   :  { %2026 = vst [vmem:[#allocation2 + $0x188] sm:$0xff] %v2016_v1  ;;  %1864 = vrot.lane.b32.xlu1 %v5061_v2, %s4111_s17  ;;  %1754 = vrot.lane.b32.xlu0 %v5059_v63, %s4117_s24 }
 0x3e7   :  { %1806 = vrot.lane.b32.xlu2 %v5057_v60, %s4115_s22 }
 0x3e9   :  { %v2039_v54 = vpop.permute.xlu2 %2038 }
 0x3ea   :  { %v2046_v34 = vrot.slane %v2039_v54, 4 }
 0x3ed   :  { %v3745_v29 = vld [vmem:[#allocation2 + $0x188] sm:$0xf]  ;;  %v4023_v17 = vld [vmem:[#allocation2 + $0x18c] sm:$0xf] }
 0x3ee   :  { %2092 = vrot.lane.b32.xlu1 %v5057_v60, %s4113_s21  ;;  %2065 = vrot.lane.b32.xlu0 %v5057_v60, %s4112_s20 }
 0x3ef   :  { %1926 = vrot.lane.b32.xlu2 %v5061_v2, %s4106_s12 }
 0x3f0   :  { %v5166_v25 = vpop.permute.xlu0 %2040  ;;  %v2290_v62 = vpop.permute.xlu1 %2289 }
 0x3f1   :  { %v2047_v13 = vrot.slane %v5166_v25, 4  ;;  %v2297_v61 = vrot.slane %v2290_v62, 4  ;;  %v5169_v3 = vpop.permute.xlu2 %2291 }
 0x3f2   :  { %v2298_v46 = vrot.slane %v5169_v3, 4 }
 0x3f3   :  { %v2050_v32 = vsel %vm51_vm0, %v2046_v34, %v2047_v13 }
 0x3f4   :  { %v2051_v21 = vsel %vm5968_vm7, %v2039_v54, %v2050_v32  ;;  %v2301_v23 = vsel %vm51_vm0, %v2297_v61, %v2298_v46  ;;  %vm5971_vm7 = vcmask 695296  }
 0x3f5   :  { %2061 = vst [vmem:[#allocation2 + $0x1a4] sm:$0xff] %v2051_v21  ;;  %v2302_v16 = vsel %vm5969_vm4, %v2290_v62, %v2301_v23  ;;  %vm5973_vm4 = vcmask 556032  }
 0x3f6   :  { %1665 = vrot.lane.b32.xlu1 %v5059_v63, %s4118_s30  ;;  %2094 = vrot.lane.b32.xlu0 %v5059_v63, %s4113_s21  ;;  %v2691_v5 = vunpack.c.l.b16 %v2302_v16  ;;  %v2692_v30 = vunpack.c.h.b16 %v2302_v16 }
 0x3f7   :  { %2146 = vrot.lane.b32.xlu2 %v5057_v60, %s4108_s14 }
 0x3f8   :  { %v5184_v11 = vpop.permute.xlu0 %1951  ;;  %v5186_v51 = vpop.permute.xlu1 %1978  ;;  %v2782_v43 = vpack.c.b16 %v2691_v5, %v2691_v5  ;;  %v2783_v24 = vpack.c.b16 %v2692_v30, %v2692_v30 }
 0x3f9   :  { %v1958_v20 = vrot.slane %v5184_v11, 4  ;;  %v1950_v44 = vpop.permute.xlu2 %1949  ;;  %v1985_v39 = vrot.slane %v5186_v51, 4 }
 0x3fa   :  { %v1957_v40 = vrot.slane %v1950_v44, 4  ;;  %v2877_v4 = vsel %vm51_vm0, %v2782_v43, 0  ;;  %v2880_v9 = vsel %vm51_vm0, %v2783_v24, 0 }
 0x3fb   :  { %2913 = vmatpush.bf16.msrb.mxu2 %v2877_v4  ;;  %2939 = vmatpush.bf16.msra.mxu1 %v2880_v9 }
 0x3fc   :  { %v1961_v42 = vsel %vm51_vm0, %v1957_v40, %v1958_v20  ;;  %v4026_v26 = vld [vmem:[#allocation2 + $0x1a0] sm:$0xf0]  ;;  %v3747_v6 = vld [vmem:[#allocation2 + $0x1a4] sm:$0xf0] }
 0x3fd   :  { %v1962_v59 = vsel %vm5970_vm3, %v1950_v44, %v1961_v42  ;;  %v3746_v10 = vor.u32 %v4026_v26, %v3745_v29  ;;  %v3750_v36 = vor.u32 %v4023_v17, %v3747_v6  ;;  %vm5974_vm3 = vcmask 711680  }
 0x3fe   :  { %1972 = vst [vmem:[#allocation2 + $0x150] sm:$0xff] %v1962_v59  ;;  %2293 = vrot.lane.b32.xlu1 %v5061_v2, %s4097_s25  ;;  %1690 = vrot.lane.b32.xlu0 %v5057_v60, %s4119_s7 }
 0x3ff   :  { %1719 = vrot.lane.b32.xlu2 %v5059_v63, %s4116_s23  ;;  %2897 = vmatpush.bf16.msrb.mxu0 %v3746_v10 }
 0x400   :  { %2923 = vmatpush.bf16.msra.mxu3 %v3750_v36  ;;  %v1923_v31 = vpop.permute.xlu1 %1922  ;;  %v1896_v53 = vpop.permute.xlu0 %1895 }
 0x401   :  { %v1977_v7 = vpop.permute.xlu2 %1976  ;;  %v1930_v38 = vrot.slane %v1923_v31, 4  ;;  %v1903_v15 = vrot.slane %v1896_v53, 4 }
 0x402   :  { %v1984_v19 = vrot.slane %v1977_v7, 4 }
 0x404   :  { %v1988_v28 = vsel %vm51_vm0, %v1984_v19, %v1985_v39 }
 0x405   :  { %v1989_v37 = vsel %vm5971_vm7, %v1977_v7, %v1988_v28  ;;  %v3717_v50 = vld [vmem:[#allocation2 + $0x150] sm:$0xf]  ;;  %v4016_v47 = vld [vmem:[#allocation2 + $0x154] sm:$0xf]  ;;  %vm5975_vm7 = vcmask 719872  }
 0x406   :  { %1999 = vst [vmem:[#allocation2 + $0x16c] sm:$0xff] %v1989_v37  ;;  %1636 = vrot.lane.b32.xlu1 %v5057_v60, %s5972_s19  ;;  %1783 = vrot.lane.b32.xlu0 %v5061_v2, %s4114_s0 }
 0x407   :  { %1837 = vrot.lane.b32.xlu2 %v5061_v2, %s4110_s16 }
 0x408   :  { %v5212_v27 = vpop.permute.xlu1 %2042  ;;  %v5214_v12 = vpop.permute.xlu0 %1924 }
 0x409   :  { %v2048_v56 = vrot.slane %v5212_v27, 4  ;;  %v1931_v48 = vrot.slane %v5214_v12, 4  ;;  %v5218_v52 = vpop.permute.xlu2 %1897 }
 0x40a   :  { %v1904_v41 = vrot.slane %v5218_v52, 4 }
 0x40b   :  { %v2052_v33 = vsel %vm51_vm0, %v2047_v13, %v2048_v56  ;;  %v1934_v18 = vsel %vm51_vm0, %v1930_v38, %v1931_v48 }
 0x40c   :  { %v2053_v55 = vsel %vm5973_vm4, %v5166_v25, %v2052_v33  ;;  %v1935_v14 = vsel %vm5974_vm3, %v1923_v31, %v1934_v18  ;;  %v1907_v49 = vsel %vm51_vm0, %v1903_v15, %v1904_v41  ;;  %vm5976_vm4 = vcmask 687104  }
 0x40d   :  { %2062 = vst [vmem:[#allocation2 + $0x1ac] sm:$0xff] %v2053_v55  ;;  %v1908_v22 = vsel %vm5975_vm7, %v1896_v53, %v1907_v49  ;;  %v4019_v8 = vld [vmem:[#allocation2 + $0x168] sm:$0xf0]  ;;  %v3719_v0 = vld [vmem:[#allocation2 + $0x16c] sm:$0xf0]  ;;  %vm5977_vm3 = vcmask 375808  }
 0x40e   :  { %1945 = vst [vmem:[#allocation2 + $0x134] sm:$0xff] %v1935_v14  ;;  %1756 = vrot.lane.b32.xlu1 %v5061_v2, %s4117_s24  ;;  %1638 = vrot.lane.b32.xlu0 %v5059_v63, %s5972_s19  ;;  %v3718_v58 = vor.u32 %v4019_v8, %v3717_v50  ;;  %v3722_v1 = vor.u32 %v4016_v47, %v3719_v0  ;;  %vm5978_vm7 = vcmask 703488  }
 0x40f   :  { %1918 = vst [vmem:[#allocation2 + $0x118] sm:$0xff] %v1908_v22  ;;  %2067 = vrot.lane.b32.xlu2 %v5059_v63, %s4112_s20 }
 0x410   :  { %2898 = vmatpush.bf16.msrb.mxu0 %v3718_v58  ;;  %2924 = vmatpush.bf16.msra.mxu3 %v3722_v1  ;;  %v2263_v54 = vpop.permute.xlu1 %2262  ;;  %v2236_v25 = vpop.permute.xlu0 %2235 }
 0x411   :  { %v5240_v62 = vpop.permute.xlu2 %2007  ;;  %v2243_v40 = vrot.slane %v2236_v25, 4 }
 0x412   :  { %v2013_v34 = vrot.slane %v5240_v62, 4 }
 0x414   :  { %v2017_v13 = vsel %vm51_vm0, %v2012_v45, %v2013_v34 }
 0x415   :  { %v2018_v61 = vsel %vm5976_vm4, %v5147_v35, %v2017_v13  ;;  %v4012_v32 = vld [vmem:[#allocation2 + $0x130] sm:$0xf0]  ;;  %v3691_v21 = vld [vmem:[#allocation2 + $0x134] sm:$0xf0]  ;;  %v2270_v35 = vrot.slane %v2263_v54, 4  ;;  %vm5979_vm4 = vcmask 695296  }
 0x416   :  { %2027 = vst [vmem:[#allocation2 + $0x190] sm:$0xff] %v2018_v61  ;;  %2239 = vrot.lane.b32.xlu1 %v5061_v2, %s4100_s28  ;;  %2009 = vrot.lane.b32.xlu0 %v5078_v57, %s4099_s27  ;;  %v3689_v23 = vld [vmem:[#allocation2 + $0x118] sm:$0xf]  ;;  %v4009_v16 = vld [vmem:[#allocation2 + $0x11c] sm:$0xf] }
 0x417   :  { %1663 = vrot.lane.b32.xlu2 %v5057_v60, %s4118_s30  ;;  %v3690_v5 = vor.u32 %v4012_v32, %v3689_v23  ;;  %v3694_v30 = vor.u32 %v4009_v16, %v3691_v21 }
 0x418   :  { %v5256_v45 = vpop.permute.xlu1 %1835  ;;  %v5258_v43 = vpop.permute.xlu0 %2264 }
 0x419   :  { %2899 = vmatpush.bf16.msrb.mxu0 %v3690_v5  ;;  %2925 = vmatpush.bf16.msra.mxu3 %v3694_v30  ;;  %v2271_v24 = vrot.slane %v5258_v43, 4  ;;  %v5261_v44 = vpop.permute.xlu2 %2237  ;;  %v1842_v10 = vrot.slane %v5256_v45, 4 }
 0x41a   :  { %v2244_v4 = vrot.slane %v5261_v44, 4 }
 0x41b   :  { %v2274_v60 = vsel %vm51_vm0, %v2270_v35, %v2271_v24 }
 0x41c   :  { %v2275_v9 = vsel %vm701_vm5, %v2263_v54, %v2274_v60  ;;  %v2247_v29 = vsel %vm51_vm0, %v2243_v40, %v2244_v4 }
 0x41d   :  { %2285 = vst [vmem:[#allocation2 + $0x284] sm:$0xff] %v2275_v9  ;;  %v2248_v42 = vsel %vm5977_vm3, %v2236_v25, %v2247_v29  ;;  %vm5980_vm3 = vcmask 850944  }
 0x41e   :  { %2258 = vst [vmem:[#allocation2 + $0x268] sm:$0xff] %v2248_v42  ;;  %1694 = vrot.lane.b32.xlu1 %v5061_v2, %s4119_s7  ;;  %2266 = vrot.lane.b32.xlu0 %v5061_v2, %s4101_s29 }
 0x41f   :  { %1692 = vrot.lane.b32.xlu2 %v5059_v63, %s4119_s7 }
 0x420   :  { %v5278_v26 = vpop.permute.xlu1 %1953  ;;  %v1861_v17 = vpop.permute.xlu0 %1860 }
 0x421   :  { %v1959_v6 = vrot.slane %v5278_v26, 4  ;;  %v1834_v59 = vpop.permute.xlu2 %1833  ;;  %v1868_v14 = vrot.slane %v1861_v17, 4 }
 0x422   :  { %v1841_v36 = vrot.slane %v1834_v59, 4 }
 0x423   :  { %v1963_v31 = vsel %vm51_vm0, %v1958_v20, %v1959_v6 }
 0x424   :  { %v1964_v53 = vsel %vm5978_vm7, %v5184_v11, %v1963_v31  ;;  %v1845_v63 = vsel %vm51_vm0, %v1841_v36, %v1842_v10  ;;  %v4054_v7 = vld [vmem:[#allocation2 + $0x280] sm:$0xf0]  ;;  %v3859_v19 = vld [vmem:[#allocation2 + $0x284] sm:$0xf0]  ;;  %vm5981_vm7 = vcmask 875520  }
 0x425   :  { %1973 = vst [vmem:[#allocation2 + $0x158] sm:$0xff] %v1964_v53  ;;  %v1846_v28 = vsel %vm257_vm14, %v1834_v59, %v1845_v63  ;;  %v3857_v37 = vld [vmem:[#allocation2 + $0x268] sm:$0xf]  ;;  %v4051_v38 = vld [vmem:[#allocation2 + $0x26c] sm:$0xf] }
 0x426   :  { %1856 = vst [vmem:[#allocation2 + $0xe0] sm:$0xff] %v1846_v28  ;;  %1982 = vrot.lane.b32.xlu1 %v5078_v57, %s4104_s10  ;;  %2295 = vrot.lane.b32.xlu0 %v5078_v57, %s4097_s25  ;;  %v3858_v20 = vor.u32 %v4054_v7, %v3857_v37  ;;  %v3862_v11 = vor.u32 %v4051_v38, %v3859_v19 }
 0x427   :  { %1810 = vrot.lane.b32.xlu2 %v5061_v2, %s4115_s22 }
 0x428   :  { %2914 = vmatpush.bf16.msrb.mxu2 %v3858_v20  ;;  %2940 = vmatpush.bf16.msra.mxu1 %v3862_v11  ;;  %v5299_v15 = vpop.permute.xlu1 %2183  ;;  %v5301_v33 = vpop.permute.xlu0 %1980 }
 0x429   :  { %v1986_v18 = vrot.slane %v5301_v33, 4  ;;  %v5304_v55 = vpop.permute.xlu2 %1862  ;;  %v2190_v58 = vrot.slane %v5299_v15, 4 }
 0x42a   :  { %v1869_v49 = vrot.slane %v5304_v55, 4 }
 0x42b   :  { %v1990_v50 = vsel %vm51_vm0, %v1985_v39, %v1986_v18 }
 0x42c   :  { %v1991_v47 = vsel %vm5979_vm4, %v5186_v51, %v1990_v50  ;;  %v1872_v22 = vsel %vm51_vm0, %v1868_v14, %v1869_v49  ;;  %vm5982_vm4 = vcmask 719872  }
 0x42d   :  { %2000 = vst [vmem:[#allocation2 + $0x174] sm:$0xff] %v1991_v47  ;;  %v1873_v8 = vsel %vm5980_vm3, %v1861_v17, %v1872_v22  ;;  %v3661_v25 = vld [vmem:[#allocation2 + $0xe0] sm:$0xf]  ;;  %v4002_v32 = vld [vmem:[#allocation2 + $0xe4] sm:$0xf]  ;;  %vm5983_vm3 = vcmask 531456  }
 0x42e   :  { %1883 = vst [vmem:[#allocation2 + $0xfc] sm:$0xff] %v1873_v8  ;;  %1640 = vrot.lane.b32.xlu1 %v5061_v2, %s5972_s19  ;;  %2185 = vrot.lane.b32.xlu0 %v5061_v2, %s4103_s9 }
 0x42f   :  { %1721 = vrot.lane.b32.xlu2 %v5061_v2, %s4116_s23 }
 0x430   :  { %v1780_v39 = vpop.permute.xlu1 %1779  ;;  %v2209_v0 = vpop.permute.xlu0 %2208 }
 0x431   :  { %v2182_v51 = vpop.permute.xlu2 %2181  ;;  %v1787_v35 = vrot.slane %v1780_v39, 4  ;;  %v2216_v9 = vrot.slane %v2209_v0, 4 }
 0x432   :  { %v2189_v1 = vrot.slane %v2182_v51, 4 }
 0x434   :  { %v2193_v54 = vsel %vm51_vm0, %v2189_v1, %v2190_v58 }
 0x435   :  { %v2194_v13 = vsel %vm617_vm8, %v2182_v51, %v2193_v54  ;;  %v4005_v61 = vld [vmem:[#allocation2 + $0xf8] sm:$0xf0]  ;;  %v3663_v21 = vld [vmem:[#allocation2 + $0xfc] sm:$0xf0] }
 0x436   :  { %2204 = vst [vmem:[#allocation2 + $0x230] sm:$0xff] %v2194_v13  ;;  %2123 = vrot.lane.b32.xlu1 %v5061_v2, %s4109_s15  ;;  %1901 = vrot.lane.b32.xlu0 %v5078_v57, %s4107_s13  ;;  %v3662_v23 = vor.u32 %v4005_v61, %v3661_v25  ;;  %v3666_v16 = vor.u32 %v4002_v32, %v3663_v21 }
 0x437   :  { %2044 = vrot.lane.b32.xlu2 %v5078_v57, %s4098_s26 }
 0x438   :  { %2900 = vmatpush.bf16.msrb.mxu0 %v3662_v23  ;;  %2926 = vmatpush.bf16.msra.mxu3 %v3666_v16  ;;  %v5335_v5 = vpop.permute.xlu1 %1808  ;;  %v5337_v30 = vpop.permute.xlu0 %1781 }
 0x439   :  { %v1788_v40 = vrot.slane %v5337_v30, 4  ;;  %v5340_v60 = vpop.permute.xlu2 %2210  ;;  %v1815_v19 = vrot.slane %v5335_v5, 4 }
 0x43a   :  { %v2217_v29 = vrot.slane %v5340_v60, 4 }
 0x43b   :  { %v1791_v42 = vsel %vm51_vm0, %v1787_v35, %v1788_v40 }
 0x43c   :  { %v1792_v17 = vsel %vm5981_vm7, %v1780_v39, %v1791_v42  ;;  %v2220_v59 = vsel %vm51_vm0, %v2216_v9, %v2217_v29  ;;  %vm5984_vm7 = vcmask 711680  }
 0x43d   :  { %1802 = vst [vmem:[#allocation2 + $0xa8] sm:$0xff] %v1792_v17  ;;  %v2221_v36 = vsel %vm645_vm9, %v2209_v0, %v2220_v59  ;;  %v3829_v11 = vld [vmem:[#allocation2 + $0x230] sm:$0xf]  ;;  %v4044_v14 = vld [vmem:[#allocation2 + $0x234] sm:$0xf] }
 0x43e   :  { %2231 = vst [vmem:[#allocation2 + $0x24c] sm:$0xff] %v2221_v36  ;;  %2268 = vrot.lane.b32.xlu1 %v5078_v57, %s4101_s29  ;;  %2150 = vrot.lane.b32.xlu0 %v5061_v2, %s4108_s14 }
 0x43f   :  { %1667 = vrot.lane.b32.xlu2 %v5061_v2, %s4118_s30 }
 0x440   :  { %v2120_v31 = vpop.permute.xlu1 %2119  ;;  %v5357_v53 = vpop.permute.xlu0 %1899 }
 0x441   :  { %v1905_v63 = vrot.slane %v5357_v53, 4  ;;  %v1807_v7 = vpop.permute.xlu2 %1806  ;;  %v2127_v0 = vrot.slane %v2120_v31, 4 }
 0x442   :  { %v1814_v28 = vrot.slane %v1807_v7, 4 }
 0x443   :  { %v1909_v37 = vsel %vm51_vm0, %v1904_v41, %v1905_v63 }
 0x444   :  { %v1910_v38 = vsel %vm5982_vm4, %v5218_v52, %v1909_v37  ;;  %v1818_v20 = vsel %vm51_vm0, %v1814_v28, %v1815_v19  ;;  %v3633_v32 = vld [vmem:[#allocation2 + $0xa8] sm:$0xf]  ;;  %v3995_v21 = vld [vmem:[#allocation2 + $0xac] sm:$0xf]  ;;  %vm5985_vm4 = vcmask 850944  }
 0x445   :  { %1919 = vst [vmem:[#allocation2 + $0x120] sm:$0xff] %v1910_v38  ;;  %v1819_v50 = vsel %vm229_vm2, %v1807_v7, %v1818_v20  ;;  %v4047_v47 = vld [vmem:[#allocation2 + $0x248] sm:$0xf0]  ;;  %v3831_v22 = vld [vmem:[#allocation2 + $0x24c] sm:$0xf0] }
 0x446   :  { %1829 = vst [vmem:[#allocation2 + $0xc4] sm:$0xff] %v1819_v50  ;;  %2069 = vrot.lane.b32.xlu1 %v5061_v2, %s4112_s20  ;;  %1839 = vrot.lane.b32.xlu0 %v5078_v57, %s4110_s16  ;;  %v3830_v41 = vor.u32 %v4047_v47, %v3829_v11  ;;  %v3834_v52 = vor.u32 %v4044_v14, %v3831_v22 }
 0x447   :  { %1955 = vrot.lane.b32.xlu2 %v5078_v57, %s4102_s8 }
 0x448   :  { %2915 = vmatpush.bf16.msrb.mxu2 %v3830_v41  ;;  %2941 = vmatpush.bf16.msra.mxu1 %v3834_v52  ;;  %v5378_v8 = vpop.permute.xlu1 %2148  ;;  %v5380_v39 = vpop.permute.xlu0 %2121 }
 0x449   :  { %v2128_v51 = vrot.slane %v5380_v39, 4  ;;  %v5383_v1 = vpop.permute.xlu2 %1926 }
 0x44a   :  { %v1932_v54 = vrot.slane %v5383_v1, 4 }
 0x44b   :  { %v2131_v25 = vsel %vm51_vm0, %v2127_v0, %v2128_v51 }
 0x44c   :  { %v2132_v13 = vsel %vm5983_vm3, %v2120_v31, %v2131_v25  ;;  %v1936_v61 = vsel %vm51_vm0, %v1931_v48, %v1932_v54  ;;  %vm5986_vm3 = vcmask 1014784  }
 0x44d   :  { %2142 = vst [vmem:[#allocation2 + $0x1f8] sm:$0xff] %v2132_v13  ;;  %v1937_v23 = vsel %vm5984_vm7, %v5214_v12, %v1936_v61  ;;  %v3998_v16 = vld [vmem:[#allocation2 + $0xc0] sm:$0xf0]  ;;  %v3635_v35 = vld [vmem:[#allocation2 + $0xc4] sm:$0xf0]  ;;  %v2155_v12 = vrot.slane %v5378_v8, 4 }
 0x44e   :  { %1946 = vst [vmem:[#allocation2 + $0x13c] sm:$0xff] %v1937_v23  ;;  %2214 = vrot.lane.b32.xlu1 %v5078_v57, %s4105_s11  ;;  %2096 = vrot.lane.b32.xlu0 %v5061_v2, %s4113_s21  ;;  %v3634_v9 = vor.u32 %v3998_v16, %v3633_v32  ;;  %v3638_v42 = vor.u32 %v3995_v21, %v3635_v35  ;;  %vm5987_vm7 = vcmask 359424  }
 0x44f   :  { %2212 = vrot.lane.b32.xlu2 %v5061_v2, %s4105_s11 }
 0x450   :  { %2901 = vmatpush.bf16.msrb.mxu0 %v3634_v9  ;;  %2927 = vmatpush.bf16.msra.mxu3 %v3638_v42  ;;  %v1753_v48 = vpop.permute.xlu1 %1752  ;;  %v1718_v17 = vpop.permute.xlu0 %1717 }
 0x451   :  { %v2147_v59 = vpop.permute.xlu2 %2146  ;;  %v1760_v37 = vrot.slane %v1753_v48, 4  ;;  %v1725_v14 = vrot.slane %v1718_v17, 4 }
 0x452   :  { %v2154_v36 = vrot.slane %v2147_v59, 4 }
 0x454   :  { %v2158_v31 = vsel %vm51_vm0, %v2154_v36, %v2155_v12  ;;  %v3801_v25 = vld [vmem:[#allocation2 + $0x1f8] sm:$0xf]  ;;  %v4037_v13 = vld [vmem:[#allocation2 + $0x1fc] sm:$0xf] }
 0x455   :  { %v2159_v7 = vsel %vm581_vm13, %v2147_v59, %v2158_v31 }
 0x456   :  { %2169 = vst [vmem:[#allocation2 + $0x214] sm:$0xff] %v2159_v7  ;;  %2125 = vrot.lane.b32.xlu1 %v5078_v57, %s4109_s15  ;;  %1785 = vrot.lane.b32.xlu0 %v5078_v57, %s4114_s0 }
 0x457   :  { %1928 = vrot.lane.b32.xlu2 %v5078_v57, %s4106_s12 }
 0x458   :  { %v5414_v2 = vpop.permute.xlu1 %1864  ;;  %v5416_v28 = vpop.permute.xlu0 %1754 }
 0x459   :  { %v5953_v38 = vrot.slane %v5414_v2, 4  ;;  %v5419_v20 = vpop.permute.xlu2 %1719  ;;  %v1761_v11 = vrot.slane %v5416_v28, 4 }
 0x45a   :  { %v1726_v50 = vrot.slane %v5419_v20, 4 }
 0x45b   :  { %v1874_v47 = vsel %vm51_vm0, %v1869_v49, %v5953_v38  ;;  %v1764_v22 = vsel %vm51_vm0, %v1760_v37, %v1761_v11  ;;  %v4020_v38 = vld [vmem:[#allocation2 + $0x170] sm:$0xf0] }
 0x45c   :  { %v1875_v41 = vsel %vm5985_vm4, %v5304_v55, %v1874_v47  ;;  %v1729_v52 = vsel %vm51_vm0, %v1725_v14, %v1726_v50  ;;  %v1765_v0 = vsel %vm173_vm1, %v1753_v48, %v1764_v22  ;;  %vm5988_vm4 = vcmask 875520  }
 0x45d   :  { %1884 = vst [vmem:[#allocation2 + $0x104] sm:$0xff] %v1875_v41  ;;  %v1730_v61 = vsel %vm5986_vm3, %v1718_v17, %v1729_v52  ;;  %v4040_v32 = vld [vmem:[#allocation2 + $0x210] sm:$0xf0]  ;;  %v3803_v49 = vld [vmem:[#allocation2 + $0x214] sm:$0xf0]  ;;  %vm5989_vm3 = vcmask 687104  }
 0x45e   :  { %1740 = vst [vmem:[#allocation2 + $0x70] sm:$0xff] %v1730_v61  ;;  %1758 = vrot.lane.b32.xlu1 %v5078_v57, %s4117_s24  ;;  %2152 = vrot.lane.b32.xlu0 %v5078_v57, %s4108_s14  ;;  %v3802_v55 = vor.u32 %v4040_v32, %v3801_v25  ;;  %v3806_v21 = vor.u32 %v4037_v13, %v3803_v49 }
 0x45f   :  { %1775 = vst [vmem:[#allocation2 + $0x8c] sm:$0xff] %v1765_v0  ;;  %2241 = vrot.lane.b32.xlu2 %v5078_v57, %s4100_s28 }
 0x460   :  { %2916 = vmatpush.bf16.msrb.mxu2 %v3802_v55  ;;  %2942 = vmatpush.bf16.msra.mxu1 %v3806_v21  ;;  %v2093_v23 = vpop.permute.xlu1 %2092  ;;  %v2066_v16 = vpop.permute.xlu0 %2065 }
 0x461   :  { %v5444_v35 = vpop.permute.xlu2 %1837  ;;  %v2073_v41 = vrot.slane %v2066_v16, 4 }
 0x462   :  { %v5955_v9 = vrot.slane %v5444_v35, 4 }
 0x464   :  { %v1847_v42 = vsel %vm51_vm0, %v1842_v10, %v5955_v9  ;;  %v4010_v9 = vld [vmem:[#allocation2 + $0x124] sm:$0xf] }
 0x465   :  { %v1848_v48 = vsel %vm257_vm14, %v5256_v45, %v1847_v42  ;;  %v3605_v17 = vld [vmem:[#allocation2 + $0x70] sm:$0xf]  ;;  %v3988_v59 = vld [vmem:[#allocation2 + $0x74] sm:$0xf]  ;;  %v2100_v45 = vrot.slane %v2093_v23, 4 }
 0x466   :  { %1857 = vst [vmem:[#allocation2 + $0xe8] sm:$0xff] %v1848_v48  ;;  %1669 = vrot.lane.b32.xlu1 %v5078_v57, %s4118_s30  ;;  %2071 = vrot.lane.b32.xlu0 %v5078_v57, %s4112_s20  ;;  %v3991_v36 = vld [vmem:[#allocation2 + $0x88] sm:$0xf0]  ;;  %v3607_v31 = vld [vmem:[#allocation2 + $0x8c] sm:$0xf0] }
 0x467   :  { %1866 = vrot.lane.b32.xlu2 %v5078_v57, %s4111_s17  ;;  %v3606_v7 = vor.u32 %v3991_v36, %v3605_v17  ;;  %v3610_v37 = vor.u32 %v3988_v59, %v3607_v31 }
 0x468   :  { %v5460_v10 = vpop.permute.xlu1 %1665  ;;  %v5462_v14 = vpop.permute.xlu0 %2094 }
 0x469   :  { %2902 = vmatpush.bf16.msrb.mxu0 %v3606_v7  ;;  %2928 = vmatpush.bf16.msra.mxu3 %v3610_v37  ;;  %v5464_v47 = vpop.permute.xlu2 %2067  ;;  %v5954_v22 = vrot.slane %v5462_v14, 4  ;;  %v1672_v42 = vrot.slane %v5460_v10, 4  ;;  %v4024_v7 = vld [vmem:[#allocation2 + $0x194] sm:$0xf] }
 0x46a   :  { %v5957_v52 = vrot.slane %v5464_v47, 4 }
 0x46b   :  { %v2104_v0 = vsel %vm51_vm0, %v2100_v45, %v5954_v22  ;;  %v3727_v22 = vld [vmem:[#allocation2 + $0x174] sm:$0xf0] }
 0x46c   :  { %v2077_v25 = vsel %vm51_vm0, %v2073_v41, %v5957_v52  ;;  %v2105_v13 = vsel %vm525_vm11, %v2093_v23, %v2104_v0 }
 0x46d   :  { %v2078_v61 = vsel %vm497_vm12, %v2066_v16, %v2077_v25  ;;  %2115 = vst [vmem:[#allocation2 + $0x1dc] sm:$0xff] %v2105_v13  ;;  %v3753_v16 = vld [vmem:[#allocation2 + $0x190] sm:$0xf] }
 0x46e   :  { %2088 = vst [vmem:[#allocation2 + $0x1c0] sm:$0xff] %v2078_v61  ;;  %1696 = vrot.lane.b32.xlu0 %v5078_v57, %s4119_s7  ;;  %v3755_v13 = vld [vmem:[#allocation2 + $0x1ac] sm:$0xf0] }
 0x46f   :  { %2187 = vrot.lane.b32.xlu2 %v5078_v57, %s4103_s9  ;;  %v3758_v61 = vor.u32 %v4024_v7, %v3755_v13  ;;  %v3699_v13 = vld [vmem:[#allocation2 + $0x13c] sm:$0xf0] }
 0x470   :  { %v5480_v32 = vpop.permute.xlu1 %2293  ;;  %v1691_v49 = vpop.permute.xlu0 %1690 }
 0x471   :  { %v2299_v55 = vrot.slane %v5480_v32, 4  ;;  %v1664_v21 = vpop.permute.xlu2 %1663 }
 0x472   :  { %v1671_v48 = vrot.slane %v1664_v21, 4 }
 0x473   :  { %v2303_v23 = vsel %vm51_vm0, %v2298_v46, %v2299_v55  ;;  %v4027_v46 = vld [vmem:[#allocation2 + $0x1a8] sm:$0xf0] }
 0x474   :  { %v5491_v17 = vsel %vm5987_vm7, %v5169_v3, %v2303_v23  ;;  %v1675_v59 = vsel %vm51_vm0, %v1671_v48, %v1672_v42  ;;  %v4033_v36 = vld [vmem:[#allocation2 + $0x1d8] sm:$0xf0]  ;;  %v3775_v31 = vld [vmem:[#allocation2 + $0x1dc] sm:$0xf0]  ;;  %v3754_v3 = vor.u32 %v4027_v46, %v3753_v16  ;;  %vm5990_vm7 = vcmask 375808  }
 0x475   :  { %v1676_v37 = vsel %vm81_vm10, %v1664_v21, %v1675_v59  ;;  %v3773_v45 = vld [vmem:[#allocation2 + $0x1c0] sm:$0xf]  ;;  %v4030_v41 = vld [vmem:[#allocation2 + $0x1c4] sm:$0xf]  ;;  %v4013_v46 = vld [vmem:[#allocation2 + $0x138] sm:$0xf0] }
 0x476   :  { %1686 = vst [vmem:[#allocation2 + $0x38] sm:$0xff] %v1676_v37  ;;  %v3774_v0 = vor.u32 %v4033_v36, %v3773_v45  ;;  %v3778_v25 = vor.u32 %v4030_v41, %v3775_v31  ;;  %v1698_v36 = vrot.slane %v1691_v49, 4  ;;  %v3725_v37 = vld [vmem:[#allocation2 + $0x158] sm:$0xf]  ;;  %v4017_v45 = vld [vmem:[#allocation2 + $0x15c] sm:$0xf] }
 0x477   :  { %1812 = vrot.lane.b32.xlu2 %v5078_v57, %s4115_s22  ;;  %v3726_v7 = vor.u32 %v4020_v38, %v3725_v37  ;;  %v3730_v41 = vor.u32 %v4017_v45, %v3727_v22  ;;  %v3702_v38 = vor.u32 %v4010_v9, %v3699_v13  ;;  %v4003_v37 = vld [vmem:[#allocation2 + $0xec] sm:$0xf] }
 0x478   :  { %2917 = vmatpush.bf16.msrb.mxu2 %v3774_v0  ;;  %2943 = vmatpush.bf16.msra.mxu1 %v3778_v25  ;;  %v1637_v48 = vpop.permute.xlu1 %1636  ;;  %v5499_v23 = vpop.permute.xlu0 %1783 }
 0x479   :  { %v5501_v21 = vpop.permute.xlu2 %1692  ;;  %v5956_v59 = vrot.slane %v5499_v23, 4  ;;  %v1644_v45 = vrot.slane %v1637_v48, 4 }
 0x47a   :  { %v1699_v31 = vrot.slane %v5501_v21, 4 }
 0x47b   :  { %v1793_v16 = vsel %vm51_vm0, %v1788_v40, %v5956_v59 }
 0x47c   :  { %2949 = vmatpush.bf16.msra.mxu2 %v3754_v3  ;;  %2975 = vmatpush.bf16.msrb.mxu1 %v3758_v61  ;;  %v1702_v0 = vsel %vm51_vm0, %v1698_v36, %v1699_v31  ;;  %v1794_v25 = vsel %vm5988_vm4, %v5337_v30, %v1793_v16  ;;  %v3697_v61 = vld [vmem:[#allocation2 + $0x120] sm:$0xf]  ;;  %v3669_v30 = vld [vmem:[#allocation2 + $0xe8] sm:$0xf]  ;;  %vm5991_vm4 = vmmov %vm5989_vm3 }
 0x47d   :  { %v1703_v3 = vsel %vm109_vm6, %v1691_v49, %v1702_v0  ;;  %1803 = vst [vmem:[#allocation2 + $0xb0] sm:$0xff] %v1794_v25  ;;  %v3698_v40 = vor.u32 %v4013_v46, %v3697_v61  ;;  %v4006_v0 = vld [vmem:[#allocation2 + $0x100] sm:$0xf0]  ;;  %v3671_v25 = vld [vmem:[#allocation2 + $0x104] sm:$0xf0] }
 0x47e   :  { %1713 = vst [vmem:[#allocation2 + $0x54] sm:$0xff] %v1703_v3  ;;  %v3670_v13 = vor.u32 %v4006_v0, %v3669_v30  ;;  %v3674_v3 = vor.u32 %v4003_v37, %v3671_v25  ;;  %v3577_v59 = vld [vmem:[#allocation2 + $0x38] sm:$0xf]  ;;  %v3981_v52 = vld [vmem:[#allocation2 + $0x3c] sm:$0xf] }
 0x47f   :  { %1723 = vrot.lane.b32.xlu2 %v5078_v57, %s4116_s23 }
 0x480   :  { %2950 = vmatpush.bf16.msra.mxu2 %v3726_v7  ;;  %2976 = vmatpush.bf16.msrb.mxu1 %v3730_v41  ;;  %v5518_v22 = vpop.permute.xlu1 %1756  ;;  %v5520_v36 = vpop.permute.xlu0 %1638 }
 0x481   :  { %v1762_v49 = vrot.slane %v5518_v22, 4  ;;  %v5523_v16 = vpop.permute.xlu2 %1810  ;;  %v1645_v7 = vrot.slane %v5520_v36, 4 }
 0x482   :  { %v1816_v41 = vrot.slane %v5523_v16, 4 }
 0x483   :  { %v1766_v9 = vsel %vm51_vm0, %v1761_v11, %v1762_v49  ;;  %v1648_v46 = vsel %vm51_vm0, %v1644_v45, %v1645_v7 }
 0x484   :  { %2951 = vmatpush.bf16.msra.mxu2 %v3698_v40  ;;  %2977 = vmatpush.bf16.msrb.mxu1 %v3702_v38  ;;  %v1767_v61 = vsel %vm173_vm1, %v5416_v28, %v1766_v9  ;;  %v1820_v40 = vsel %vm51_vm0, %v1815_v19, %v1816_v41  ;;  %v1649_v38 = vsel %vm53_vm15, %v1637_v48, %v1648_v46  ;;  %v2693_v9 = vunpack.c.l.b16 %v5491_v17 }
 0x485   :  { %1776 = vst [vmem:[#allocation2 + $0x94] sm:$0xff] %v1767_v61  ;;  %v1821_v11 = vsel %vm229_vm2, %v5335_v5, %v1820_v40  ;;  %v3984_v30 = vld [vmem:[#allocation2 + $0x50] sm:$0xf0]  ;;  %v3579_v37 = vld [vmem:[#allocation2 + $0x54] sm:$0xf0]  ;;  %v2694_v46 = vunpack.c.h.b16 %v5491_v17 }
 0x486   :  { %1830 = vst [vmem:[#allocation2 + $0xcc] sm:$0xff] %v1821_v11  ;;  %v3578_v28 = vor.u32 %v3984_v30, %v3577_v59  ;;  %v3582_v45 = vor.u32 %v3981_v52, %v3579_v37  ;;  %v3641_v11 = vld [vmem:[#allocation2 + $0xb0] sm:$0xf]  ;;  %v3996_v30 = vld [vmem:[#allocation2 + $0xb4] sm:$0xf] }
 0x487   :  { %1659 = vst [vmem:[#allocation2 + $0x1c] sm:$0xff] %v1649_v38  ;;  %2098 = vrot.lane.b32.xlu2 %v5078_v57, %s4113_s21  ;;  %v3974_v38 = vld [vmem:[#allocation2 + $0x4] sm:$0xf] }
 0x488   :  { %2952 = vmatpush.bf16.msra.mxu2 %v3670_v13  ;;  %2978 = vmatpush.bf16.msrb.mxu1 %v3674_v3  ;;  %v5547_v19 = vpop.permute.xlu1 %2239  ;;  %v2010_v48 = vpop.permute.xlu0 %2009 }
 0x489   :  { %2903 = vmatpush.bf16.msrb.mxu0 %v3578_v28  ;;  %2929 = vmatpush.bf16.msra.mxu3 %v3582_v45  ;;  %v2245_v0 = vrot.slane %v5547_v19, 4  ;;  %v5550_v25 = vpop.permute.xlu2 %1721  ;;  %v2014_v5 = vrot.slane %v2010_v48, 4  ;;  %v2784_v28 = vpack.c.b16 %v2693_v9, %v2693_v9  ;;  %v2785_v45 = vpack.c.b16 %v2694_v46, %v2694_v46 }
 0x48a   :  { %v1727_v52 = vrot.slane %v5550_v25, 4 }
 0x48b   :  { %v2249_v59 = vsel %vm51_vm0, %v2244_v4, %v2245_v0  ;;  %v2019_v13 = vsel %vm51_vm0, %v2013_v34, %v2014_v5  ;;  %v2021_v3 = vsel %vm5989_vm3, %v2010_v48, %v2014_v5  ;;  %v3549_v4 = vld [vmem:[#allocation2] sm:$0xf]  ;;  %vm5992_vm3 = vcmask 1014784  }
 0x48c   :  { %v2250_v61 = vsel %vm5990_vm7, %v5261_v44, %v2249_v59  ;;  %v1731_v17 = vsel %vm51_vm0, %v1726_v50, %v1727_v52  ;;  %v2020_v40 = vsel %vm5991_vm4, %v5240_v62, %v2019_v13  ;;  %2029 = vst [vmem:[#allocation2 + $0x1a0] sm:$0xf] %v2021_v3  ;;  %vm5993_vm7 = vcmask 556032  }
 0x48d   :  { %2259 = vst [vmem:[#allocation2 + $0x270] sm:$0xff] %v2250_v61  ;;  %v1732_v34 = vsel %vm5992_vm3, %v5419_v20, %v1731_v17  ;;  %v3999_v37 = vld [vmem:[#allocation2 + $0xc8] sm:$0xf0]  ;;  %v3643_v44 = vld [vmem:[#allocation2 + $0xcc] sm:$0xf0]  ;;  %v2883_v17 = vsel %vm51_vm0, %v2784_v28, 0  ;;  %vm5994_vm4 = vmmov %vm5993_vm7 }
 0x48e   :  { %1741 = vst [vmem:[#allocation2 + $0x78] sm:$0xff] %v1732_v34  ;;  %v3977_v48 = vld [vmem:[#allocation2 + $0x18] sm:$0xf0]  ;;  %v3551_v5 = vld [vmem:[#allocation2 + $0x1c] sm:$0xf0]  ;;  %v3642_v50 = vor.u32 %v3999_v37, %v3641_v11  ;;  %v3646_v59 = vor.u32 %v3996_v30, %v3643_v44  ;;  %vm5995_vm3 = vcmask 588800  }
 0x48f   :  { %2028 = vst [vmem:[#allocation2 + $0x198] sm:$0xff] %v2020_v40  ;;  %1642 = vrot.lane.b32.xlu2 %v5078_v57, %s5972_s19  ;;  %v3550_v62 = vor.u32 %v3977_v48, %v3549_v4  ;;  %v3554_v13 = vor.u32 %v3974_v38, %v3551_v5  ;;  %v2886_v40 = vsel %vm51_vm0, %v2785_v45, 0  ;;  %v5588_v57 = vld [vmem:[%s5935_s4] sm:$0xff]  ;;  %v3992_v28 = vld [vmem:[#allocation2 + $0x90] sm:$0xf0] }
 0x490   :  { %2953 = vmatpush.bf16.msra.mxu2 %v3642_v50  ;;  %2979 = vmatpush.bf16.msrb.mxu1 %v3646_v59  ;;  %v5577_v3 = vpop.permute.xlu1 %1694  ;;  %v5579_v20 = vpop.permute.xlu0 %2266  ;;  %v2419_v38 = vunpack.c.h.b16 %v5588_v57  ;;  %v3615_v45 = vld [vmem:[#allocation2 + $0x94] sm:$0xf0] }
 0x491   :  { %2904 = vmatpush.bf16.msrb.mxu0 %v3550_v62  ;;  %2930 = vmatpush.bf16.msra.mxu3 %v3554_v13  ;;  %v1700_v9 = vrot.slane %v5577_v3, 4  ;;  %v2045_v46 = vpop.permute.xlu2 %2044  ;;  %v2272_v61 = vrot.slane %v5579_v20, 4 }
 0x492   :  { %v2049_v4 = vrot.slane %v2045_v46, 4  ;;  %v5611_v50 = vpack.c.b16 %v2419_v38, %v2419_v38 }
 0x493   :  { %v1704_v11 = vsel %vm51_vm0, %v1699_v31, %v1700_v9  ;;  %v2276_v30 = vsel %vm51_vm0, %v2271_v24, %v2272_v61 }
 0x494   :  { %v1705_v34 = vsel %vm109_vm6, %v5501_v21, %v1704_v11  ;;  %v2054_v37 = vsel %vm51_vm0, %v2048_v56, %v2049_v4  ;;  %v2056_v44 = vsel %vm5993_vm7, %v2045_v46, %v2049_v4  ;;  %v2277_v48 = vsel %vm701_vm5, %v5258_v43, %v2276_v30  ;;  %3883 = vmatmul.msk.bf16.vlgmr.msrb.gmra.mxu2 %vm5995_vm3, %v5611_v50  ;;  %vm5996_vm7 = vmmov %vm5995_vm3 }
 0x495   :  { %2965 = vmatpush.bf16.msra.mxu0 %v2883_v17  ;;  %2991 = vmatpush.bf16.msrb.mxu3 %v2886_v40  ;;  %1714 = vst [vmem:[#allocation2 + $0x5c] sm:$0xff] %v1705_v34  ;;  %v2055_v31 = vsel %vm5994_vm4, %v5212_v27, %v2054_v37  ;;  %v3613_v5 = vld [vmem:[#allocation2 + $0x78] sm:$0xf]  ;;  %v3989_v24 = vld [vmem:[#allocation2 + $0x7c] sm:$0xf]  ;;  %vm5997_vm4 = vcmask 695296  }
 0x496   :  { %2063 = vst [vmem:[#allocation2 + $0x1b4] sm:$0xff] %v2055_v31  ;;  %v3614_v21 = vor.u32 %v3992_v28, %v3613_v5  ;;  %v3618_v59 = vor.u32 %v3989_v24, %v3615_v45  ;;  %3884 = vmatmul.msk.bf16.vlgmr.msra.gmra.mxu1 %vm5996_vm7, %v5611_v50  ;;  %vm5998_vm3 = vmmov %vm5997_vm4  ;;  %vm5999_vm7 = vcmask 359424   ;;  %v4052_v37 = vld [vmem:[#allocation2 + $0x274] sm:$0xf] }
 0x497   :  { %2064 = vst [vmem:[#allocation2 + $0x1bc] sm:$0xf] %v2056_v44 }
 0x498   :  { %2286 = vst [vmem:[#allocation2 + $0x28c] sm:$0xff] %v2277_v48  ;;  %2954 = vmatpush.bf16.msra.mxu2 %v3614_v21  ;;  %2980 = vmatpush.bf16.msrb.mxu1 %v3618_v59  ;;  %v1983_v27 = vpop.permute.xlu1 %1982  ;;  %v2296_v56 = vpop.permute.xlu0 %2295 }
 0x499   :  { %v1987_v43 = vrot.slane %v1983_v27, 4  ;;  %v5617_v62 = vpop.permute.xlu2 %1667  ;;  %v2300_v13 = vrot.slane %v2296_v56, 4 }
 0x49a   :  { %v1673_v46 = vrot.slane %v5617_v62, 4 }
 0x49b   :  { %v1992_v17 = vsel %vm51_vm0, %v1986_v18, %v1987_v43  ;;  %v1994_v40 = vsel %vm5997_vm4, %v1983_v27, %v1987_v43  ;;  %v2305_v4 = vsel %vm51_vm0, %v2299_v55, %v2300_v13  ;;  %vm6000_vm4 = vmmov %vm5999_vm7  ;;  %v3865_v55 = vld [vmem:[#allocation2 + $0x270] sm:$0xf] }
 0x49c   :  { %v1993_v38 = vsel %vm5998_vm3, %v5301_v33, %v1992_v17  ;;  %2002 = vst [vmem:[#allocation2 + $0x184] sm:$0xf] %v1994_v40  ;;  %v1677_v11 = vsel %vm51_vm0, %v1672_v42, %v1673_v46  ;;  %v2306_v30 = vsel %vm5999_vm7, %v5480_v32, %v2305_v4  ;;  %v2307_v34 = vsel %vm6000_vm4, %v2296_v56, %v2300_v13  ;;  %v3985_v43 = vld [vmem:[#allocation2 + $0x58] sm:$0xf0]  ;;  %v3587_v13 = vld [vmem:[#allocation2 + $0x5c] sm:$0xf0] }
 0x49d   :  { %2001 = vst [vmem:[#allocation2 + $0x17c] sm:$0xff] %v1993_v38  ;;  %v1678_v18 = vsel %vm81_vm10, %v5460_v10, %v1677_v11  ;;  %vm6001_vm3 = vcmask 703488   ;;  %v2695_v38 = vunpack.c.l.b16 %v2306_v30  ;;  %v2696_v11 = vunpack.c.h.b16 %v2306_v30 }
 0x49e   :  { %1687 = vst [vmem:[#allocation2 + $0x40] sm:$0xff] %v1678_v18  ;;  %vm6002_vm7 = vmmov %vm6001_vm3  ;;  %vm6003_vm4 = vcmask 719872  }
 0x49f   :  { %v4055_v33 = vld [vmem:[#allocation2 + $0x288] sm:$0xf0]  ;;  %v3867_v44 = vld [vmem:[#allocation2 + $0x28c] sm:$0xf0]  ;;  %2315 = vst [vmem:[#allocation2 + $0x2b8] sm:$0xf] %v2307_v34 }
 0x4a0   :  { %v3866_v28 = vor.u32 %v4055_v33, %v3865_v55  ;;  %v3870_v45 = vor.u32 %v4052_v37, %v3867_v44  ;;  %v5639_v31 = vpop.permute.xlu1 %1640  ;;  %v5641_v42 = vpop.permute.xlu0 %2185  ;;  %v2786_v37 = vpack.c.b16 %v2695_v38, %v2695_v38 }
 0x4a1   :  { %v1646_v32 = vrot.slane %v5639_v31, 4  ;;  %v1956_v48 = vpop.permute.xlu2 %1955  ;;  %v2191_v5 = vrot.slane %v5641_v42, 4 }
 0x4a2   :  { %2966 = vmatpush.bf16.msra.mxu0 %v3866_v28  ;;  %2992 = vmatpush.bf16.msrb.mxu3 %v3870_v45  ;;  %v1960_v10 = vrot.slane %v1956_v48, 4  ;;  %v3557_v28 = vld [vmem:[#allocation2 + $0x8] sm:$0xf]  ;;  %v3975_v45 = vld [vmem:[#allocation2 + $0xc] sm:$0xf] }
 0x4a3   :  { %v1650_v24 = vsel %vm51_vm0, %v1645_v7, %v1646_v32  ;;  %v2195_v21 = vsel %vm51_vm0, %v2190_v58, %v2191_v5 }
 0x4a4   :  { %v1651_v59 = vsel %vm53_vm15, %v5520_v36, %v1650_v24  ;;  %v1965_v27 = vsel %vm51_vm0, %v1959_v6, %v1960_v10  ;;  %v1967_v56 = vsel %vm6001_vm3, %v1956_v48, %v1960_v10  ;;  %v2196_v17 = vsel %vm617_vm8, %v5299_v15, %v2195_v21 }
 0x4a5   :  { %1660 = vst [vmem:[#allocation2 + $0x24] sm:$0xff] %v1651_v59  ;;  %v1966_v7 = vsel %vm6002_vm7, %v5278_v26, %v1965_v27  ;;  %v3585_v40 = vld [vmem:[#allocation2 + $0x40] sm:$0xf]  ;;  %v3982_v58 = vld [vmem:[#allocation2 + $0x44] sm:$0xf]  ;;  %v2787_v48 = vpack.c.b16 %v2696_v11, %v2696_v11  ;;  %vm6004_vm3 = vcmask 531456   ;;  %vm6005_vm7 = vmmov %vm6003_vm4 }
 0x4a6   :  { %1974 = vst [vmem:[#allocation2 + $0x160] sm:$0xff] %v1966_v7  ;;  %v3586_v4 = vor.u32 %v3985_v43, %v3585_v40  ;;  %v3590_v36 = vor.u32 %v3982_v58, %v3587_v13  ;;  %v2418_v40 = vunpack.c.l.b16 %v5588_v57 }
 0x4a7   :  { %1975 = vst [vmem:[#allocation2 + $0x168] sm:$0xf] %v1967_v56 }
 0x4a8   :  { %2205 = vst [vmem:[#allocation2 + $0x238] sm:$0xff] %v2196_v17  ;;  %2955 = vmatpush.bf16.msra.mxu2 %v3586_v4  ;;  %2981 = vmatpush.bf16.msrb.mxu1 %v3590_v36  ;;  %v5665_v6 = vpop.permute.xlu1 %2123  ;;  %v1902_v18 = vpop.permute.xlu0 %1901 }
 0x4a9   :  { %v2129_v34 = vrot.slane %v5665_v6, 4  ;;  %v5668_v26 = vpop.permute.xlu2 %2212  ;;  %v1906_v55 = vrot.slane %v1902_v18, 4 }
 0x4aa   :  { %v2218_v15 = vrot.slane %v5668_v26, 4 }
 0x4ab   :  { %v2133_v30 = vsel %vm51_vm0, %v2128_v51, %v2129_v34  ;;  %v1911_v33 = vsel %vm51_vm0, %v1905_v63, %v1906_v55  ;;  %v1913_v44 = vsel %vm6003_vm4, %v1902_v18, %v1906_v55  ;;  %vm6006_vm4 = vcmask 711680  }
 0x4ac   :  { %v2134_v10 = vsel %vm6004_vm3, %v5380_v39, %v2133_v30  ;;  %v2222_v24 = vsel %vm51_vm0, %v2217_v29, %v2218_v15  ;;  %v1912_v51 = vsel %vm6005_vm7, %v5357_v53, %v1911_v33  ;;  %1921 = vst [vmem:[#allocation2 + $0x130] sm:$0xf] %v1913_v44  ;;  %v3978_v21 = vld [vmem:[#allocation2 + $0x20] sm:$0xf0]  ;;  %v3559_v63 = vld [vmem:[#allocation2 + $0x24] sm:$0xf0]  ;;  %vm6007_vm3 = vmmov %vm6006_vm4  ;;  %v5716_v33 = vpack.c.b16 %v2418_v40, %v2418_v40 }
 0x4ad   :  { %2143 = vst [vmem:[#allocation2 + $0x200] sm:$0xff] %v2134_v10  ;;  %v2223_v59 = vsel %vm645_vm9, %v5340_v60, %v2222_v24  ;;  %v3558_v27 = vor.u32 %v3978_v21, %v3557_v28  ;;  %v3562_v56 = vor.u32 %v3975_v45, %v3559_v63  ;;  %v2889_v39 = vsel %vm51_vm0, %v2786_v37, 0 }
 0x4ae   :  { %2232 = vst [vmem:[#allocation2 + $0x254] sm:$0xff] %v2223_v59  ;;  %v2892_v29 = vsel %vm51_vm0, %v2787_v48, 0  ;;  %2905 = vmatmul.bf16.vlgmr.msrb.gmra.mxu0 %v5716_v33  ;;  %2931 = vmatmul.bf16.vlgmr.msra.gmra.mxu3 %v5716_v33  ;;  %v6008_v10 = vrot.slane %v5464_v47, 4 }
 0x4af   :  { %1920 = vst [vmem:[#allocation2 + $0x128] sm:$0xff] %v1912_v51  ;;  %2956 = vmatpush.bf16.msra.mxu2 %v3558_v27  ;;  %2982 = vmatpush.bf16.msrb.mxu1 %v3562_v56  ;;  %v3837_v18 = vld [vmem:[#allocation2 + $0x238] sm:$0xf]  ;;  %v6009_v51 = vrot.slane %v5444_v35, 4 }
 0x4b0   :  { %v2269_v43 = vpop.permute.xlu1 %2268  ;;  %v5693_v53 = vpop.permute.xlu0 %2150 }
 0x4b1   :  { %v2273_v13 = vrot.slane %v2269_v43, 4  ;;  %v1929_v7 = vpop.permute.xlu2 %1928  ;;  %v2156_v17 = vrot.slane %v5693_v53, 4 }
 0x4b2   :  { %v1933_v60 = vrot.slane %v1929_v7, 4  ;;  %2957 = vmatmul.bf16.vlgmr.msra.gmra.mxu2 %v5716_v33  ;;  %2983 = vmatmul.bf16.vlgmr.msrb.gmra.mxu1 %v5716_v33 }
 0x4b3   :  { %3017 = vmatpush.bf16.msrb.mxu2 %v2889_v39  ;;  %3043 = vmatpush.bf16.msra.mxu1 %v2892_v29  ;;  %v2278_v58 = vsel %vm51_vm0, %v2272_v61, %v2273_v13  ;;  %v2280_v4 = vsel %vm701_vm5, %v2269_v43, %v2273_v13  ;;  %v2160_v36 = vsel %vm51_vm0, %v2155_v12, %v2156_v17  ;;  %v4045_v61 = vld [vmem:[#allocation2 + $0x23c] sm:$0xf] }
 0x4b4   :  { %v2279_v38 = vsel %vm701_vm5, %v5579_v20, %v2278_v58  ;;  %2288 = vst [vmem:[#allocation2 + $0x29c] sm:$0xf] %v2280_v4  ;;  %v1938_v57 = vsel %vm51_vm0, %v1932_v54, %v1933_v60  ;;  %v1940_v11 = vsel %vm6006_vm4, %v1929_v7, %v1933_v60  ;;  %v2161_v37 = vsel %vm581_vm13, %v5378_v8, %v2160_v36  ;;  %v3809_v43 = vld [vmem:[#allocation2 + $0x200] sm:$0xf]  ;;  %v4038_v13 = vld [vmem:[#allocation2 + $0x204] sm:$0xf] }
 0x4b5   :  { %2287 = vst [vmem:[#allocation2 + $0x294] sm:$0xff] %v2279_v38  ;;  %v1939_v55 = vsel %vm6007_vm3, %v5383_v1, %v1938_v57  ;;  %v4048_v12 = vld [vmem:[#allocation2 + $0x250] sm:$0xf0]  ;;  %v3839_v30 = vld [vmem:[#allocation2 + $0x254] sm:$0xf0]  ;;  %vm6010_vm5 = vcmask 375808  }
 0x4b6   :  { %1947 = vst [vmem:[#allocation2 + $0x144] sm:$0xff] %v1939_v55  ;;  %v3838_v20 = vor.u32 %v4048_v12, %v3837_v18  ;;  %v3842_v44 = vor.u32 %v4045_v61, %v3839_v30  ;;  %vm6011_vm7 = vmmov %vm6010_vm5  ;;  %v6013_v55 = vrot.slane %v5414_v2, 4 }
 0x4b7   :  { %1948 = vst [vmem:[#allocation2 + $0x14c] sm:$0xf] %v1940_v11  ;;  %v6012_v11 = vrot.slane %v5462_v14, 4 }
 0x4b8   :  { %2170 = vst [vmem:[#allocation2 + $0x21c] sm:$0xff] %v2161_v37  ;;  %2967 = vmatpush.bf16.msra.mxu0 %v3838_v20  ;;  %2993 = vmatpush.bf16.msrb.mxu3 %v3842_v44  ;;  %v5720_v54 = vpop.permute.xlu1 %2069  ;;  %v1840_v1 = vpop.permute.xlu0 %1839 }
 0x4b9   :  { %v2075_v8 = vrot.slane %v5720_v54, 4  ;;  %v2242_v28 = vpop.permute.xlu2 %2241  ;;  %v1844_v45 = vrot.slane %v1840_v1, 4 }
 0x4ba   :  { %v2246_v48 = vrot.slane %v2242_v28, 4 }
 0x4bb   :  { %v2079_v24 = vsel %vm51_vm0, %v6008_v10, %v2075_v8  ;;  %v1849_v21 = vsel %vm51_vm0, %v6009_v51, %v1844_v45  ;;  %v1851_v63 = vsel %vm257_vm14, %v1840_v1, %v1844_v45 }
 0x4bc   :  { %v2080_v59 = vsel %vm497_vm12, %v5464_v47, %v2079_v24  ;;  %v2251_v27 = vsel %vm51_vm0, %v2245_v0, %v2246_v48  ;;  %v2253_v56 = vsel %vm6010_vm5, %v2242_v28, %v2246_v48  ;;  %1859 = vst [vmem:[#allocation2 + $0xf8] sm:$0xf] %v1851_v63  ;;  %v1850_v29 = vsel %vm257_vm14, %v5444_v35, %v1849_v21  ;;  %v4056_v30 = vld [vmem:[#allocation2 + $0x290] sm:$0xf0] }
 0x4bd   :  { %2089 = vst [vmem:[#allocation2 + $0x1c8] sm:$0xff] %v2080_v59  ;;  %v2252_v39 = vsel %vm6011_vm7, %v5547_v19, %v2251_v27  ;;  %vm6014_vm14 = vcmask 850944   ;;  %v6017_v59 = vrot.slane %v5499_v23, 4  ;;  %vm6019_vm5 = vcmask 875520  }
 0x4be   :  { %2260 = vst [vmem:[#allocation2 + $0x278] sm:$0xff] %v2252_v39  ;;  %vm6015_vm4 = vmmov %vm6014_vm14 }
 0x4bf   :  { %2261 = vst [vmem:[#allocation2 + $0x280] sm:$0xf] %v2253_v56  ;;  %v4041_v7 = vld [vmem:[#allocation2 + $0x218] sm:$0xf0]  ;;  %v3811_v47 = vld [vmem:[#allocation2 + $0x21c] sm:$0xf0]  ;;  %vm6020_vm7 = vmmov %vm6019_vm5 }
 0x4c0   :  { %1858 = vst [vmem:[#allocation2 + $0xf0] sm:$0xff] %v1850_v29  ;;  %v3810_v60 = vor.u32 %v4041_v7, %v3809_v43  ;;  %v3814_v40 = vor.u32 %v4038_v13, %v3811_v47  ;;  %v2215_v0 = vpop.permute.xlu1 %2214  ;;  %v5744_v58 = vpop.permute.xlu0 %2096  ;;  %v4028_v13 = vld [vmem:[#allocation2 + $0x1b0] sm:$0xf0] }
 0x4c1   :  { %v2219_v4 = vrot.slane %v2215_v0, 4  ;;  %v1867_v36 = vpop.permute.xlu2 %1866  ;;  %v2102_v38 = vrot.slane %v5744_v58, 4 }
 0x4c2   :  { %2968 = vmatpush.bf16.msra.mxu0 %v3810_v60  ;;  %2994 = vmatpush.bf16.msrb.mxu3 %v3814_v40  ;;  %v1871_v19 = vrot.slane %v1867_v36, 4 }
 0x4c3   :  { %v2224_v35 = vsel %vm51_vm0, %v2218_v15, %v2219_v4  ;;  %v2226_v57 = vsel %vm645_vm9, %v2215_v0, %v2219_v4  ;;  %v2106_v18 = vsel %vm51_vm0, %v6012_v11, %v2102_v38  ;;  %v3875_v15 = vld [vmem:[#allocation2 + $0x294] sm:$0xf0] }
 0x4c4   :  { %v2225_v61 = vsel %vm645_vm9, %v5668_v26, %v2224_v35  ;;  %2234 = vst [vmem:[#allocation2 + $0x264] sm:$0xf] %v2226_v57  ;;  %v1876_v37 = vsel %vm51_vm0, %v6013_v55, %v1871_v19  ;;  %v1878_v12 = vsel %vm6014_vm14, %v1867_v36, %v1871_v19  ;;  %v2107_v44 = vsel %vm525_vm11, %v5462_v14, %v2106_v18  ;;  %v3781_v47 = vld [vmem:[#allocation2 + $0x1c8] sm:$0xf]  ;;  %v3761_v19 = vld [vmem:[#allocation2 + $0x198] sm:$0xf] }
 0x4c5   :  { %2233 = vst [vmem:[#allocation2 + $0x25c] sm:$0xff] %v2225_v61  ;;  %v1877_v20 = vsel %vm6015_vm4, %v5414_v2, %v1876_v37  ;;  %v3873_v1 = vld [vmem:[#allocation2 + $0x278] sm:$0xf]  ;;  %v4053_v28 = vld [vmem:[#allocation2 + $0x27c] sm:$0xf]  ;;  %vm6016_vm9 = vcmask 531456   ;;  %v3762_v11 = vor.u32 %v4028_v13, %v3761_v19 }
 0x4c6   :  { %1885 = vst [vmem:[#allocation2 + $0x10c] sm:$0xff] %v1877_v20  ;;  %v3874_v26 = vor.u32 %v4056_v30, %v3873_v1  ;;  %v3878_v45 = vor.u32 %v4053_v28, %v3875_v15  ;;  %vm6018_vm3 = vmmov %vm6016_vm9  ;;  %v3763_v35 = vld [vmem:[#allocation2 + $0x1b4] sm:$0xf0]  ;;  %v4025_v61 = vld [vmem:[#allocation2 + $0x19c] sm:$0xf] }
 0x4c7   :  { %1886 = vst [vmem:[#allocation2 + $0x114] sm:$0xf] %v1878_v12  ;;  %v3733_v55 = vld [vmem:[#allocation2 + $0x160] sm:$0xf]  ;;  %v3766_v15 = vor.u32 %v4025_v61, %v3763_v35  ;;  %v4021_v20 = vld [vmem:[#allocation2 + $0x178] sm:$0xf0] }
 0x4c8   :  { %2116 = vst [vmem:[#allocation2 + $0x1e4] sm:$0xff] %v2107_v44  ;;  %3018 = vmatpush.bf16.msrb.mxu2 %v3874_v26  ;;  %3044 = vmatpush.bf16.msra.mxu1 %v3878_v45  ;;  %v2126_v48 = vpop.permute.xlu1 %2125  ;;  %v1786_v10 = vpop.permute.xlu0 %1785  ;;  %v4018_v44 = vld [vmem:[#allocation2 + $0x164] sm:$0xf]  ;;  %v4011_v13 = vld [vmem:[#allocation2 + $0x12c] sm:$0xf] }
 0x4c9   :  { %v2130_v24 = vrot.slane %v2126_v48, 4  ;;  %v2188_v51 = vpop.permute.xlu2 %2187  ;;  %v1790_v21 = vrot.slane %v1786_v10, 4 }
 0x4ca   :  { %v2192_v63 = vrot.slane %v2188_v51, 4 }
 0x4cb   :  { %v2135_v2 = vsel %vm51_vm0, %v2129_v34, %v2130_v24  ;;  %v2137_v14 = vsel %vm6016_vm9, %v2126_v48, %v2130_v24  ;;  %v1795_v27 = vsel %vm51_vm0, %v6017_v59, %v1790_v21  ;;  %v1797_v7 = vsel %vm6020_vm7, %v1786_v10, %v1790_v21  ;;  %v3705_v59 = vld [vmem:[#allocation2 + $0x128] sm:$0xf] }
 0x4cc   :  { %v2136_v56 = vsel %vm6018_vm3, %v5665_v6, %v2135_v2  ;;  %2145 = vst [vmem:[#allocation2 + $0x210] sm:$0xf] %v2137_v14  ;;  %v2197_v39 = vsel %vm51_vm0, %v2191_v5, %v2192_v63  ;;  %v2199_v29 = vsel %vm617_vm8, %v2188_v51, %v2192_v63  ;;  %v1796_v43 = vsel %vm6019_vm5, %v5499_v23, %v1795_v27  ;;  %v4031_v6 = vld [vmem:[#allocation2 + $0x1cc] sm:$0xf]  ;;  %v4049_v26 = vld [vmem:[#allocation2 + $0x258] sm:$0xf0] }
 0x4cd   :  { %2144 = vst [vmem:[#allocation2 + $0x208] sm:$0xff] %v2136_v56  ;;  %v2198_v34 = vsel %vm617_vm8, %v5641_v42, %v2197_v39  ;;  %v3847_v45 = vld [vmem:[#allocation2 + $0x25c] sm:$0xf0]  ;;  %v3734_v10 = vor.u32 %v4021_v20, %v3733_v55  ;;  %v4014_v2 = vld [vmem:[#allocation2 + $0x140] sm:$0xf0] }
 0x4ce   :  { %2206 = vst [vmem:[#allocation2 + $0x240] sm:$0xff] %v2198_v34  ;;  %v3735_v51 = vld [vmem:[#allocation2 + $0x17c] sm:$0xf0]  ;;  %v3707_v27 = vld [vmem:[#allocation2 + $0x144] sm:$0xf0]  ;;  %v3706_v34 = vor.u32 %v4014_v2, %v3705_v59 }
 0x4cf   :  { %2207 = vst [vmem:[#allocation2 + $0x248] sm:$0xf] %v2199_v29  ;;  %v4034_v60 = vld [vmem:[#allocation2 + $0x1e0] sm:$0xf0]  ;;  %v3783_v40 = vld [vmem:[#allocation2 + $0x1e4] sm:$0xf0] }
 0x4d0   :  { %1804 = vst [vmem:[#allocation2 + $0xb8] sm:$0xff] %v1796_v43  ;;  %v3782_v5 = vor.u32 %v4034_v60, %v3781_v47  ;;  %v3786_v0 = vor.u32 %v4031_v6, %v3783_v40  ;;  %v1759_v4 = vpop.permute.xlu1 %1758  ;;  %v2153_v36 = vpop.permute.xlu0 %2152  ;;  %v3710_v40 = vor.u32 %v4011_v13, %v3707_v27  ;;  %v3679_v19 = vld [vmem:[#allocation2 + $0x10c] sm:$0xf0]  ;;  %v4029_v2 = vld [vmem:[#allocation2 + $0x1b8] sm:$0xf0] }
 0x4d1   :  { %1805 = vst [vmem:[#allocation2 + $0xc0] sm:$0xf] %v1797_v7  ;;  %v1763_v42 = vrot.slane %v1759_v4, 4  ;;  %v1813_v57 = vpop.permute.xlu2 %1812  ;;  %v2157_v23 = vrot.slane %v2153_v36, 4  ;;  %v4007_v7 = vld [vmem:[#allocation2 + $0x108] sm:$0xf0] }
 0x4d2   :  { %2969 = vmatpush.bf16.msra.mxu0 %v3782_v5  ;;  %2995 = vmatpush.bf16.msrb.mxu3 %v3786_v0  ;;  %v1817_v18 = vrot.slane %v1813_v57, 4  ;;  %v3677_v5 = vld [vmem:[#allocation2 + $0xf0] sm:$0xf] }
 0x4d3   :  { %v1768_v37 = vsel %vm51_vm0, %v1762_v49, %v1763_v42  ;;  %v1770_v12 = vsel %vm173_vm1, %v1759_v4, %v1763_v42  ;;  %v2162_v30 = vsel %vm51_vm0, %v2156_v17, %v2157_v23  ;;  %v3678_v42 = vor.u32 %v4007_v7, %v3677_v5  ;;  %v3741_v5 = vld [vmem:[#allocation2 + $0x168] sm:$0xf] }
 0x4d4   :  { %v1769_v1 = vsel %vm173_vm1, %v5518_v22, %v1768_v37  ;;  %1778 = vst [vmem:[#allocation2 + $0xa4] sm:$0xf] %v1770_v12  ;;  %v1822_v28 = vsel %vm51_vm0, %v1816_v41, %v1817_v18  ;;  %v1824_v49 = vsel %vm229_vm2, %v1813_v57, %v1817_v18  ;;  %v2163_v48 = vsel %vm581_vm13, %v5693_v53, %v2162_v30  ;;  %v3817_v57 = vld [vmem:[#allocation2 + $0x208] sm:$0xf] }
 0x4d5   :  { %1777 = vst [vmem:[#allocation2 + $0x9c] sm:$0xff] %v1769_v1  ;;  %v1823_v17 = vsel %vm229_vm2, %v5523_v16, %v1822_v28  ;;  %v3845_v24 = vld [vmem:[#allocation2 + $0x240] sm:$0xf]  ;;  %v4046_v22 = vld [vmem:[#allocation2 + $0x244] sm:$0xf]  ;;  %vm6021_vm1 = vcmask 588800   ;;  %v2164_v41 = vsel %vm581_vm13, %v2153_v36, %v2157_v23  ;;  %v3738_v16 = vor.u32 %v4018_v44, %v3735_v51 }
 0x4d6   :  { %3001 = vmatpush.bf16.msrb.mxu0 %v3762_v11  ;;  %3027 = vmatpush.bf16.msra.mxu3 %v3766_v15  ;;  %1831 = vst [vmem:[#allocation2 + $0xd4] sm:$0xff] %v1823_v17  ;;  %v3846_v21 = vor.u32 %v4049_v26, %v3845_v24  ;;  %v3850_v63 = vor.u32 %v4046_v22, %v3847_v45  ;;  %vm6022_vm8 = vmmov %vm6021_vm1  ;;  %vm6023_vm2 = vcmask 1014784  }
 0x4d7   :  { %3885 = vmatmul.msk.bf16.vlgmr.msra.gmra.mxu0 %vm6021_vm1, %v5611_v50  ;;  %3886 = vmatmul.msk.bf16.vlgmr.msrb.gmra.mxu3 %vm6022_vm8, %v5611_v50  ;;  %1832 = vst [vmem:[#allocation2 + $0xdc] sm:$0xf] %v1824_v49  ;;  %vm6024_vm13 = vmmov %vm6023_vm2  ;;  %v3997_v15 = vld [vmem:[#allocation2 + $0xbc] sm:$0xf] }
 0x4d8   :  { %2171 = vst [vmem:[#allocation2 + $0x224] sm:$0xff] %v2163_v48  ;;  %3019 = vmatpush.bf16.msrb.mxu2 %v3846_v21  ;;  %3045 = vmatpush.bf16.msra.mxu1 %v3850_v63  ;;  %v1670_v53 = vpop.permute.xlu1 %1669  ;;  %v2072_v14 = vpop.permute.xlu0 %2071 }
 0x4d9   :  { %2172 = vst [vmem:[#allocation2 + $0x22c] sm:$0xf] %v2164_v41  ;;  %v1674_v56 = vrot.slane %v1670_v53, 4  ;;  %v1724_v39 = vpop.permute.xlu2 %1723  ;;  %v2076_v29 = vrot.slane %v2072_v14, 4 }
 0x4da   :  { %3002 = vmatpush.bf16.msrb.mxu0 %v3734_v10  ;;  %3028 = vmatpush.bf16.msra.mxu3 %v3738_v16  ;;  %v1728_v43 = vrot.slane %v1724_v39, 4 }
 0x4db   :  { %v1679_v47 = vsel %vm51_vm0, %v1673_v46, %v1674_v56  ;;  %v1681_v6 = vsel %vm81_vm10, %v1670_v53, %v1674_v56  ;;  %v2081_v60 = vsel %vm51_vm0, %v2075_v8, %v2076_v29  ;;  %v4004_v46 = vld [vmem:[#allocation2 + $0xf4] sm:$0xf]  ;;  %v2083_v11 = vsel %vm497_vm12, %v2072_v14, %v2076_v29 }
 0x4dc   :  { %v1680_v0 = vsel %vm81_vm10, %v5617_v62, %v1679_v47  ;;  %1689 = vst [vmem:[#allocation2 + $0x50] sm:$0xf] %v1681_v6  ;;  %v1733_v4 = vsel %vm51_vm0, %v1727_v52, %v1728_v43  ;;  %v1735_v36 = vsel %vm6023_vm2, %v1724_v39, %v1728_v43  ;;  %v2082_v8 = vsel %vm497_vm12, %v5720_v54, %v2081_v60  ;;  %v4039_v62 = vld [vmem:[#allocation2 + $0x20c] sm:$0xf]  ;;  %v3649_v52 = vld [vmem:[#allocation2 + $0xb8] sm:$0xf]  ;;  %vm6026_vm10 = vmmov %vm6021_vm1 }
 0x4dd   :  { %1688 = vst [vmem:[#allocation2 + $0x48] sm:$0xff] %v1680_v0  ;;  %v1734_v35 = vsel %vm6024_vm13, %v5550_v25, %v1733_v4  ;;  %v4000_v23 = vld [vmem:[#allocation2 + $0xd0] sm:$0xf0]  ;;  %v3651_v18 = vld [vmem:[#allocation2 + $0xd4] sm:$0xf0]  ;;  %v3682_v61 = vor.u32 %v4004_v46, %v3679_v19 }
 0x4de   :  { %3003 = vmatpush.bf16.msrb.mxu0 %v3706_v34  ;;  %3029 = vmatpush.bf16.msra.mxu3 %v3710_v40  ;;  %1742 = vst [vmem:[#allocation2 + $0x80] sm:$0xff] %v1734_v35  ;;  %v3650_v12 = vor.u32 %v4000_v23, %v3649_v52  ;;  %v3654_v1 = vor.u32 %v3997_v15, %v3651_v18  ;;  %v3993_v10 = vld [vmem:[#allocation2 + $0x98] sm:$0xf0]  ;;  %v3623_v24 = vld [vmem:[#allocation2 + $0x9c] sm:$0xf0] }
 0x4df   :  { %1743 = vst [vmem:[#allocation2 + $0x88] sm:$0xf] %v1735_v36  ;;  %v4042_v55 = vld [vmem:[#allocation2 + $0x220] sm:$0xf0]  ;;  %v3819_v37 = vld [vmem:[#allocation2 + $0x224] sm:$0xf0] }
 0x4e0   :  { %2090 = vst [vmem:[#allocation2 + $0x1d0] sm:$0xff] %v2082_v8  ;;  %v3818_v25 = vor.u32 %v4042_v55, %v3817_v57  ;;  %v3822_v30 = vor.u32 %v4039_v62, %v3819_v37  ;;  %v1697_v54 = vpop.permute.xlu0 %1696  ;;  %v3565_v4 = vld [vmem:[#allocation2 + $0x10] sm:$0xf]  ;;  %v3976_v36 = vld [vmem:[#allocation2 + $0x14] sm:$0xf] }
 0x4e1   :  { %2091 = vst [vmem:[#allocation2 + $0x1d8] sm:$0xf] %v2083_v11  ;;  %v2099_v20 = vpop.permute.xlu2 %2098  ;;  %v1701_v44 = vrot.slane %v1697_v54, 4  ;;  %v4015_v8 = vld [vmem:[#allocation2 + $0x148] sm:$0xf0] }
 0x4e2   :  { %3004 = vmatpush.bf16.msrb.mxu0 %v3678_v42  ;;  %3030 = vmatpush.bf16.msra.mxu3 %v3682_v61  ;;  %v2103_v28 = vrot.slane %v2099_v20, 4  ;;  %v3713_v62 = vld [vmem:[#allocation2 + $0x130] sm:$0xf]  ;;  %v3881_v52 = vld [vmem:[#allocation2 + $0x280] sm:$0xf] }
 0x4e3   :  { %3020 = vmatpush.bf16.msrb.mxu2 %v3818_v25  ;;  %3046 = vmatpush.bf16.msra.mxu1 %v3822_v30  ;;  %v1706_v49 = vsel %vm51_vm0, %v1700_v9, %v1701_v44  ;;  %v1708_v26 = vsel %vm109_vm6, %v1697_v54, %v1701_v44  ;;  %v3714_v23 = vor.u32 %v4015_v8, %v3713_v62  ;;  %v4008_v18 = vld [vmem:[#allocation2 + $0x110] sm:$0xf0]  ;;  %v4057_v61 = vld [vmem:[#allocation2 + $0x298] sm:$0xf0]  ;;  %v3685_v55 = vld [vmem:[#allocation2 + $0xf8] sm:$0xf] }
 0x4e4   :  { %v2108_v45 = vsel %vm51_vm0, %v2102_v38, %v2103_v28  ;;  %v2110_v17 = vsel %vm525_vm11, %v2099_v20, %v2103_v28  ;;  %v1707_v48 = vsel %vm109_vm6, %v5577_v3, %v1706_v49  ;;  %1716 = vst [vmem:[#allocation2 + $0x6c] sm:$0xf] %v1708_v26  ;;  %v2416_v3 = vld [vmem:[#allocation2 + $0x2b8] sm:$0xf]  ;;  %v3593_v53 = vld [vmem:[#allocation2 + $0x48] sm:$0xf]  ;;  %vm6025_vm6 = vmmov %vm6021_vm1  ;;  %v3882_v37 = vor.u32 %v4057_v61, %v3881_v52 }
 0x4e5   :  { %v2109_v22 = vsel %vm525_vm11, %v5744_v58, %v2108_v45  ;;  %2118 = vst [vmem:[#allocation2 + $0x1f4] sm:$0xf] %v2110_v17  ;;  %v3621_v9 = vld [vmem:[#allocation2 + $0x80] sm:$0xf]  ;;  %v3990_v41 = vld [vmem:[#allocation2 + $0x84] sm:$0xf]  ;;  %v2697_v40 = vunpack.c.l.b16 %v2416_v3 }
 0x4e6   :  { %3005 = vmatpush.bf16.msrb.mxu0 %v3650_v12  ;;  %3031 = vmatpush.bf16.msra.mxu3 %v3654_v1  ;;  %2117 = vst [vmem:[#allocation2 + $0x1ec] sm:$0xff] %v2109_v22  ;;  %v3622_v51 = vor.u32 %v3993_v10, %v3621_v9  ;;  %v3626_v21 = vor.u32 %v3990_v41, %v3623_v24  ;;  %v3983_v59 = vld [vmem:[#allocation2 + $0x4c] sm:$0xf]  ;;  %v3853_v25 = vld [vmem:[#allocation2 + $0x248] sm:$0xf] }
 0x4e7   :  { %1715 = vst [vmem:[#allocation2 + $0x64] sm:$0xff] %v1707_v48  ;;  %v3789_v14 = vld [vmem:[#allocation2 + $0x1d0] sm:$0xf]  ;;  %v4032_v27 = vld [vmem:[#allocation2 + $0x1d4] sm:$0xf]  ;;  %v2788_v46 = vpack.c.b16 %v2697_v40, %v2697_v40  ;;  %v3686_v12 = vor.u32 %v4008_v18, %v3685_v55 }
 0x4e8   :  { %v4001_v30 = vld [vmem:[#allocation2 + $0xd8] sm:$0xf0]  ;;  %v4050_v54 = vld [vmem:[#allocation2 + $0x260] sm:$0xf0]  ;;  %v3657_v15 = vld [vmem:[#allocation2 + $0xc0] sm:$0xf] }
 0x4e9   :  { %v1643_v38 = vpop.permute.xlu2 %1642  ;;  %v2895_v11 = vsel %vm51_vm0, %v2788_v46, 0  ;;  %v3854_v20 = vor.u32 %v4050_v54, %v3853_v25  ;;  %v3658_v44 = vor.u32 %v4001_v30, %v3657_v15  ;;  %v4043_v1 = vld [vmem:[#allocation2 + $0x228] sm:$0xf0]  ;;  %v3629_v28 = vld [vmem:[#allocation2 + $0x88] sm:$0xf] }
 0x4ea   :  { %3006 = vmatpush.bf16.msrb.mxu0 %v3622_v51  ;;  %3032 = vmatpush.bf16.msra.mxu3 %v3626_v21  ;;  %v1647_v63 = vrot.slane %v1643_v38, 4  ;;  %v3825_v49 = vld [vmem:[#allocation2 + $0x210] sm:$0xf]  ;;  %v3994_v26 = vld [vmem:[#allocation2 + $0xa0] sm:$0xf0] }
 0x4eb   :  { %v3826_v45 = vor.u32 %v4043_v1, %v3825_v49  ;;  %v3630_v17 = vor.u32 %v3994_v26, %v3629_v28  ;;  %v3987_v10 = vld [vmem:[#allocation2 + $0x68] sm:$0xf0]  ;;  %v3797_v24 = vld [vmem:[#allocation2 + $0x1d8] sm:$0xf]  ;;  %v3601_v22 = vld [vmem:[#allocation2 + $0x50] sm:$0xf] }
 0x4ec   :  { %v1652_v16 = vsel %vm51_vm0, %v1646_v32, %v1647_v63  ;;  %v1654_v58 = vsel %vm53_vm15, %v1643_v38, %v1647_v63  ;;  %v3769_v32 = vld [vmem:[#allocation2 + $0x1a0] sm:$0xf]  ;;  %v4036_v48 = vld [vmem:[#allocation2 + $0x1f0] sm:$0xf0]  ;;  %v3602_v41 = vor.u32 %v3987_v10, %v3601_v22  ;;  %v3573_v21 = vld [vmem:[#allocation2 + $0x18] sm:$0xf] }
 0x4ed   :  { %v1653_v56 = vsel %vm53_vm15, %v5639_v31, %v1652_v16  ;;  %1662 = vst [vmem:[#allocation2 + $0x34] sm:$0xf] %v1654_v58  ;;  %v4035_v39 = vld [vmem:[#allocation2 + $0x1e8] sm:$0xf0]  ;;  %v3791_v29 = vld [vmem:[#allocation2 + $0x1ec] sm:$0xf0]  ;;  %v3770_v60 = vor.u32 %v4029_v2, %v3769_v32  ;;  %v3798_v9 = vor.u32 %v4036_v48, %v3797_v24  ;;  %vm6027_vm0 = vmmov %vm6021_vm1 }
 0x4ee   :  { %1661 = vst [vmem:[#allocation2 + $0x2c] sm:$0xff] %v1653_v56  ;;  %v3986_v34 = vld [vmem:[#allocation2 + $0x60] sm:$0xf0]  ;;  %v3790_v43 = vor.u32 %v4035_v39, %v3789_v14  ;;  %v3595_v13 = vld [vmem:[#allocation2 + $0x64] sm:$0xf0]  ;;  %v3794_v7 = vor.u32 %v4032_v27, %v3791_v29 }
 0x4ef   :  { %v3594_v47 = vor.u32 %v3986_v34, %v3593_v53  ;;  %v3598_v6 = vor.u32 %v3983_v59, %v3595_v13  ;;  %v4022_v31 = vld [vmem:[#allocation2 + $0x180] sm:$0xf0] }
 0x4f0   :  { %3021 = vmatpush.bf16.msrb.mxu2 %v3790_v43  ;;  %3047 = vmatpush.bf16.msra.mxu1 %v3794_v7  ;;  %v3742_v0 = vor.u32 %v4022_v31, %v3741_v5  ;;  %v3203_v40 = vld [vmem:[%s5933_s2 + $0x1] ss:$2 sm:$0xff] }
 0x4f1   :  { %3007 = vmatpush.bf16.msrb.mxu0 %v3594_v47  ;;  %3033 = vmatpush.bf16.msra.mxu3 %v3598_v6  ;;  %v3083_v8 = vperm.slane %v3203_v40, 2  ;;  %v3084_v52 = vperm.slane %v3203_v40, 3  ;;  %v3086_v15 = vperm.slane %v3203_v40, 5  ;;  %v3087_v48 = vperm.slane %v3203_v40, 6 }
 0x4f3   :  { %3887 = vmatmul.msk.bf16.vlgmr.msrb.gmra.mxu2 %vm6025_vm6, %v5611_v50  ;;  %3888 = vmatmul.msk.bf16.vlgmr.msra.gmra.mxu1 %vm6026_vm10, %v5611_v50 }
 0x4f4   :  { %3053 = vmatpush.bf16.msra.mxu2 %v3770_v60  ;;  %v3980_v51 = vld [vmem:[#allocation2 + $0x30] sm:$0xf0] }
 0x4f5   :  { %v3979_v19 = vld [vmem:[#allocation2 + $0x28] sm:$0xf0]  ;;  %v3567_v35 = vld [vmem:[#allocation2 + $0x2c] sm:$0xf0]  ;;  %v3574_v38 = vor.u32 %v3980_v51, %v3573_v21 }
 0x4f6   :  { %v3566_v42 = vor.u32 %v3979_v19, %v3565_v4  ;;  %v3570_v57 = vor.u32 %v3976_v36, %v3567_v35  ;;  %v3082_v4 = vperm.slane %v3203_v40, 1 }
 0x4f8   :  { %3054 = vmatpush.bf16.msra.mxu2 %v3742_v0  ;;  %3008 = vmatpush.bf16.msrb.mxu0 %v3566_v42  ;;  %v3081_v0 = vperm.slane %v3203_v40, 0 }
 0x4f9   :  { %3034 = vmatpush.bf16.msra.mxu3 %v3570_v57 }
 0x4fb   :  { %3009 = vmatmul.bf16.vlgmr.msrb.gmra.mxu0 %v5716_v33 }
 0x4fc   :  { %3069 = vmatpush.bf16.msra.mxu0 %v2895_v11  ;;  %3055 = vmatpush.bf16.msra.mxu2 %v3714_v23 }
 0x4fd   :  { %3035 = vmatmul.bf16.vlgmr.msra.gmra.mxu3 %v5716_v33 }
 0x500   :  { %3070 = vmatpush.bf16.msra.mxu0 %v3882_v37  ;;  %3056 = vmatpush.bf16.msra.mxu2 %v3686_v12  ;;  %v3085_v37 = vperm.slane %v3203_v40, 4  ;;  %v4096_v40 = vld [vmem:[%s5934_s5] sm:$0xff] }
 0x504   :  { %3071 = vmatpush.bf16.msra.mxu0 %v3854_v20  ;;  %3057 = vmatpush.bf16.msra.mxu2 %v3658_v44 }
 0x508   :  { %3072 = vmatpush.bf16.msra.mxu0 %v3826_v45  ;;  %3058 = vmatpush.bf16.msra.mxu2 %v3630_v17 }
 0x50c   :  { %3073 = vmatpush.bf16.msra.mxu0 %v3798_v9  ;;  %3059 = vmatpush.bf16.msra.mxu2 %v3602_v41 }
 0x50f   :  { %3889 = vmatmul.msk.bf16.vlgmr.msra.gmra.mxu0 %vm6027_vm0, %v5611_v50 }
 0x510   :  { %3060 = vmatpush.bf16.msra.mxu2 %v3574_v38 }
 0x513   :  { %3061 = vmatmul.bf16.vlgmr.msra.gmra.mxu2 %v5716_v33  ;;  %v2945_v2 = vpop.f32.mrf.mxu1 }
 0x517   :  { %v2919_v63 = vpop.f32.mrf.mxu2 }
 0x51b   :  { %v2947_v16 = vpop.f32.mrf.mxu1 }
 0x51f   :  { %v2921_v3 = vpop.f32.mrf.mxu2 }
 0x52b   :  { %v2906_v58 = vpop.f32.mrf.mxu0 }
 0x52c   :  { %v5852_v53 = vadd.f32 %v2919_v63, %v2906_v58 }
 0x52e   :  { %v3095_v46 = vmul.f32 %v3081_v0, %v5852_v53  ;;  %v4125_v0 = vmov 3  }
 0x52f   :  { %v2984_v14 = vpop.f32.mrf.mxu1  ;;  %4091 = vset.pattern.permute.xlu0 %v4125_v0 }
 0x530   :  { %v3110_v57 = vmul.f32 %v3095_v46, %v5852_v53 }
 0x531   :  { %v2932_v59 = vpop.f32.mrf.mxu3 }
 0x532   :  { %v5854_v27 = vadd.f32 %v2945_v2, %v2932_v59  ;;  %v4124_v59 = vmov 2  }
 0x533   :  { %v2908_v56 = vpop.f32.mrf.mxu0  ;;  %4089 = vset.pattern.permute.xlu2 %v4124_v59 }
 0x534   :  { %v3096_v19 = vmul.f32 %v3082_v4, %v5854_v27 }
 0x535   :  { %v2958_v39 = vpop.f32.mrf.mxu2 }
 0x536   :  { %v3111_v62 = vmul.f32 %v3096_v19, %v5854_v27  ;;  %v3102_v61 = vadd.f32 %v3096_v19, %v3095_v46 }
 0x537   :  { %v2986_v29 = vpop.f32.mrf.mxu1 }
 0x538   :  { %v3117_v12 = vadd.f32 %v3111_v62, %v3110_v57 }
 0x539   :  { %v2934_v34 = vpop.f32.mrf.mxu3 }
 0x53d   :  { %v2960_v43 = vpop.f32.mrf.mxu2 }
 0x554   :  { %v2971_v50 = vpop.f32.mrf.mxu0 }
 0x555   :  { %v5861_v35 = vadd.f32 %v2971_v50, %v2958_v39 }
 0x557   :  { %v3097_v23 = vmul.f32 %v3083_v8, %v5861_v35 }
 0x559   :  { %v3112_v25 = vmul.f32 %v3097_v23, %v5861_v35  ;;  %v3103_v20 = vadd.f32 %v3102_v61, %v3097_v23 }
 0x55a   :  { %v2997_v13 = vpop.f32.mrf.mxu3 }
 0x55b   :  { %v5866_v11 = vadd.f32 %v2997_v13, %v2984_v14  ;;  %v3118_v1 = vadd.f32 %v3117_v12, %v3112_v25 }
 0x55c   :  { %v2973_v7 = vpop.f32.mrf.mxu0 }
 0x55d   :  { %v3098_v30 = vmul.f32 %v3084_v52, %v5866_v11 }
 0x55f   :  { %v3113_v28 = vmul.f32 %v3098_v30, %v5866_v11  ;;  %v3104_v45 = vadd.f32 %v3103_v20, %v3098_v30 }
 0x561   :  { %v3119_v24 = vadd.f32 %v3118_v1, %v3113_v28  ;;  %v3182_v28 = vld [vmem:[%s5936_s1 + $0x20] sm:$0xff] }
 0x562   :  { %v2999_v33 = vpop.f32.mrf.mxu3 }
 0x570   :  { %v3049_v47 = vpop.f32.mrf.mxu1 }
 0x576   :  { %v3023_v6 = vpop.f32.mrf.mxu2 }
 0x578   :  { %v3010_v32 = vpop.f32.mrf.mxu0  ;;  %v3051_v60 = vpop.f32.mrf.mxu1 }
 0x579   :  { %v5868_v55 = vadd.f32 %v3023_v6, %v3010_v32 }
 0x57b   :  { %v3099_v44 = vmul.f32 %v3085_v37, %v5868_v55 }
 0x57d   :  { %v3114_v17 = vmul.f32 %v3099_v44, %v5868_v55  ;;  %v3105_v22 = vadd.f32 %v3104_v45, %v3099_v44  ;;  %v3183_v45 = vld [vmem:[%s5936_s1 + $0x28] sm:$0xff] }
 0x57e   :  { %v3025_v31 = vpop.f32.mrf.mxu2 }
 0x57f   :  { %v3120_v51 = vadd.f32 %v3119_v24, %v3114_v17 }
 0x580   :  { %v3036_v5 = vpop.f32.mrf.mxu3  ;;  %v3012_v36 = vpop.f32.mrf.mxu0 }
 0x581   :  { %v5872_v54 = vadd.f32 %v3049_v47, %v3036_v5 }
 0x583   :  { %v3100_v49 = vmul.f32 %v3086_v15, %v5872_v54 }
 0x585   :  { %v3115_v9 = vmul.f32 %v3100_v49, %v5872_v54  ;;  %v3106_v38 = vadd.f32 %v3105_v22, %v3100_v49  ;;  %v3184_v22 = vld [vmem:[%s5936_s1 + $0x30] sm:$0xff] }
 0x587   :  { %v3121_v3 = vadd.f32 %v3120_v51, %v3115_v9 }
 0x588   :  { %v3038_v42 = vpop.f32.mrf.mxu3 }
 0x58c   :  { %v3075_v18 = vpop.f32.mrf.mxu0 }
 0x594   :  { %v3077_v26 = vpop.f32.mrf.mxu0 }
 0x596   :  { %v3062_v10 = vpop.f32.mrf.mxu2 }
 0x597   :  { %v3076_v41 = vadd.f32 %v3075_v18, %v3062_v10 }
 0x599   :  { %v3101_v21 = vmul.f32 %v3087_v48, %v3076_v41 }
 0x59b   :  { %v3116_v63 = vmul.f32 %v3101_v21, %v3076_v41  ;;  %v3107_v2 = vadd.f32 %v3106_v38, %v3101_v21 }
 0x59d   :  { %3108 = vadd.xlane.f32.xlu1 %v3107_v2  ;;  %v3122_v16 = vadd.f32 %v3121_v3, %v3116_v63 }
 0x59e   :  { %v3064_v58 = vpop.f32.mrf.mxu2 }
 0x59f   :  { %3123 = vadd.xlane.f32.xlu0 %v3122_v16 }
 0x610   :  { %v3109_v14 = vpop.xlane.xlu1 %3108 }
 0x611   :  { %v3125_v56 = vmul.f32 0.001953125, %v3109_v14 }
 0x612   :  { %v3124_v39 = vpop.xlane.xlu0 %3123 }
 0x613   :  { %v3127_v29 = vmul.f32 %v3125_v56, %v3125_v56  ;;  %v3126_v34 = vmul.f32 0.001953125, %v3124_v39 }
 0x615   :  { %v3128_v43 = vsub.f32 %v3126_v34, %v3127_v29 }
 0x617   :  { %v3129_v50 = vadd.f32 1e-05, %v3128_v43 }
 0x619   :  { %4094 = vrsqrt.f32 %v3129_v50  ;;  %vm3136_vm12 = vweird.f32 %v3129_v50 }
 0x61f   :  { %v4095_v13 = vpop.eup %4094 }
 0x620   :  { %v3131_v7 = vmul.f32 %v4095_v13, %v3129_v50  ;;  %vm3137_vm11 = vweird.f32 %v4095_v13 }
 0x621   :  { %vm3138_vm15 = vmor %vm3136_vm12, %vm3137_vm11 }
 0x622   :  { %v3132_v33 = vmul.f32 %v4095_v13, %v3131_v7 }
 0x624   :  { %v3133_v47 = vmul.f32 0.5, %v3132_v33 }
 0x626   :  { %v3134_v6 = vsub.f32 1.5, %v3133_v47 }
 0x628   :  { %v3135_v32 = vmul.f32 %v4095_v13, %v3134_v6 }
 0x62a   :  { %v3139_v60 = vsel %vm3138_vm15, %v4095_v13, %v3135_v32 }
 0x62b   :  { %v3140_v5 = vmul.f32 %v4096_v40, %v3139_v60 }
 0x62d   :  { %v3141_v31 = vmul.f32 %v3140_v5, %v3125_v56 }
 0x62f   :  { %3143 = vrot.lane.b32.xlu2 %v3141_v31, %s4122_s18 }
 0x637   :  { %3149 = vperm.xlu2 %4089, %v3140_v5  }
 0x63f   :  { %4090 = vset.pattern.permute.xlu2 %v4125_v0 }
 0x689   :  { %v3144_v4 = vpop.permute.xlu2 %3143 }
 0x68a   :  { %v3146_v36 = vsub.f32 %v4096_v40, %v3144_v4 }
 0x68c   :  { %3161 = vperm.xlu2 %4090, %v3146_v36  }
 0x691   :  { %v3150_v46 = vpop.permute.xlu2 %3149 }
 0x692   :  { %v3152_v19 = vmul.f32 %v3150_v46, %v5852_v53  ;;  %v3153_v8 = vmul.f32 %v3150_v46, %v5854_v27  ;;  %v3154_v42 = vmul.f32 %v3150_v46, %v5861_v35  ;;  %v3155_v57 = vmul.f32 %v3150_v46, %v5866_v11  ;;  %v3178_v53 = vld [vmem:[%s5936_s1] sm:$0xff]  ;;  %v3179_v27 = vld [vmem:[%s5936_s1 + $0x8] sm:$0xff]  ;;  %v3180_v35 = vld [vmem:[%s5936_s1 + $0x10] sm:$0xff] }
 0x693   :  { %v3156_v62 = vmul.f32 %v3150_v46, %v5868_v55  ;;  %v3157_v23 = vmul.f32 %v3150_v46, %v5872_v54  ;;  %v3158_v52 = vmul.f32 %v3150_v46, %v3076_v41  ;;  %v3181_v54 = vld [vmem:[%s5936_s1 + $0x18] sm:$0xff] }
 0x6e6   :  { %v3162_v18 = vpop.permute.xlu2 %3161 }
 0x6e7   :  { %v3164_v61 = vadd.f32 %v3162_v18, %v3152_v19  ;;  %v3165_v37 = vadd.f32 %v3162_v18, %v3153_v8  ;;  %v3166_v12 = vadd.f32 %v3162_v18, %v3154_v42  ;;  %v3167_v25 = vadd.f32 %v3162_v18, %v3155_v57 }
 0x6e8   :  { %v3168_v11 = vadd.f32 %v3162_v18, %v3156_v62  ;;  %v3169_v55 = vadd.f32 %v3162_v18, %v3157_v23  ;;  %v3170_v30 = vadd.f32 %v3162_v18, %v3158_v52 }
 0x6e9   :  { %v3171_v15 = vmax.f32 %v3164_v61, 0.0  ;;  %v3172_v20 = vmax.f32 %v3165_v37, 0.0  ;;  %v3173_v44 = vmax.f32 %v3166_v12, 0.0  ;;  %v3174_v1 = vmax.f32 %v3167_v25, 0.0 }
 0x6ea   :  { %v3175_v49 = vmax.f32 %v3168_v11, 0.0  ;;  %v3176_v26 = vmax.f32 %v3169_v55, 0.0  ;;  %v3177_v17 = vmax.f32 %v3170_v30, 0.0 }
 0x6eb   :  { %v3185_v48 = vadd.f32 %v3178_v53, %v3171_v15  ;;  %v3186_v10 = vadd.f32 %v3179_v27, %v3172_v20  ;;  %v3187_v24 = vadd.f32 %v3180_v35, %v3173_v44  ;;  %v3188_v9 = vadd.f32 %v3181_v54, %v3174_v1 }
 0x6ec   :  { %v3189_v41 = vadd.f32 %v3182_v28, %v3175_v49  ;;  %v3190_v51 = vadd.f32 %v3183_v45, %v3176_v26  ;;  %v3191_v21 = vadd.f32 %v3184_v22, %v3177_v17 }
 0x6ed   :  { %3192 = vst [vmem:[%s5937_s6] sm:$0xff] %v3185_v48 }
 0x6ee   :  { %3193 = vst [vmem:[%s5937_s6 + $0x8] sm:$0xff] %v3186_v10 }
 0x6ef   :  { %3194 = vst [vmem:[%s5937_s6 + $0x10] sm:$0xff] %v3187_v24 }
 0x6f0   :  { %3195 = vst [vmem:[%s5937_s6 + $0x18] sm:$0xff] %v3188_v9 }
 0x6f1   :  { %3196 = vst [vmem:[%s5937_s6 + $0x20] sm:$0xff] %v3189_v41 }
 0x6f2   :  { %3197 = vst [vmem:[%s5937_s6 + $0x28] sm:$0xff] %v3190_v51 }
 0x6f3   :  { %3198 = vst [vmem:[%s5937_s6 + $0x30] sm:$0xff] %v3191_v21 }

</bundles_post_ra>
